<compile_context>
chip_gen: v6e
topology: v6e:2x2x1
jax: 0.10.0
libtpu: 0.0.40
codegen_flags: <defaults>
</compile_context>

<pallas_src>
import math
import jax
import jax.numpy as jnp
import numpy as np
from jax import lax
from jax.experimental import pallas as pl
from jax.experimental.pallas import tpu as pltpu

EPS = 1e-5        # nn.LayerNorm default eps
NEG_INF = -1e30   # additive attention mask value (finite -> no NaNs)


def _layer_norm(x, w, b):
    mu = jnp.mean(x, axis=-1, keepdims=True)
    var = jnp.mean((x - mu) ** 2, axis=-1, keepdims=True)
    return (x - mu) * lax.rsqrt(var + EPS) * w + b


# ------------------------ fused full-forward kernel --------------------------
def make_fused_kernel(n_heads, n_layers):
    def kernel(xcat_ref, wcat_ref, pos_ref, mask_ref,
               ln1w_ref, ln1b_ref, wq_ref, wk_ref, wv_ref,
               bq_ref, bk_ref, bv_ref, wo_ref, bo_ref,
               ln2w_ref, ln2b_ref, w1_ref, b1_ref, w2_ref, b2_ref,
               lnfw_ref, lnfb_ref, o_ref):
        mask = mask_ref[...]                            # (R, R) additive mask

        # ---- token embedding (one bf16 matmul over all B*L_pad rows) + pos
        h = jnp.dot(xcat_ref[...], wcat_ref[...],
                    preferred_element_type=jnp.float32) + pos_ref[...]

        # NL=2: full unroll is fine / gives LLO scheduling visibility.
        # TODO(synk): for large n_layers switch to lax.fori_loop over the
        # stacked weights and stream per-layer weights from HBM
        # (pl.ANY + pltpu.make_async_copy) instead of keeping all resident.
        for l in range(n_layers):
            # ---- pre-LN + multi-head self attention (per-head weights) ----
            xn = _layer_norm(h, ln1w_ref[l], ln1b_ref[l])
            xnb = xn.astype(jnp.bfloat16)
            attn = None
            for hh in range(n_heads):
                li = l * n_heads + hh
                qh = jnp.dot(xnb, wq_ref[li],
                             preferred_element_type=jnp.float32) + bq_ref[li]
                kh = jnp.dot(xnb, wk_ref[li],
                             preferred_element_type=jnp.float32) + bk_ref[li]
                vh = jnp.dot(xnb, wv_ref[li],
                             preferred_element_type=jnp.float32) + bv_ref[li]
                # scores = qh @ kh^T without materializing the transpose:
                # contract dim 1 of both operands ('qd,kd->qk').
                s = lax.dot_general(qh, kh, (((1,), (1,)), ((), ())),
                                    preferred_element_type=jnp.float32)
                s = s + mask                             # block-diag + pad mask
                s = s - jnp.max(s, axis=-1, keepdims=True)
                p = jnp.exp(s)
                p = p * pl.reciprocal(jnp.sum(p, axis=-1, keepdims=True),
                                      approx=True)
                hv = jnp.dot(p, vh, preferred_element_type=jnp.float32)
                # concat_h(hv_h) @ Wo == sum_h hv_h @ Wo_h  (no lane concat)
                contrib = jnp.dot(hv.astype(jnp.bfloat16), wo_ref[li],
                                  preferred_element_type=jnp.float32)
                attn = contrib if attn is None else attn + contrib
            h = h + attn + bo_ref[l]

            # ---- pre-LN + feed forward (exact GELU, matches nn.GELU) ----
            xn2 = _layer_norm(h, ln2w_ref[l], ln2b_ref[l])
            hid = jnp.dot(xn2.astype(jnp.bfloat16), w1_ref[l],
                          preferred_element_type=jnp.float32) + b1_ref[l]
            hid = 0.5 * hid * (1.0 + lax.erf(hid * (1.0 / math.sqrt(2.0))))
            h = h + jnp.dot(hid.astype(jnp.bfloat16), w2_ref[l],
                            preferred_element_type=jnp.float32) + b2_ref[l]

        # ---- final encoder LayerNorm, single lane-dense slab store ----
        o_ref[...] = _layer_norm(h, lnfw_ref[...], lnfb_ref[...])
    return kernel


# ------------------------------- full forward --------------------------------
def timedrl_forward(x, params, n_heads):
    B, T, C = x.shape
    L = T + 1
    D = params['pos'].shape[-1]
    H = n_heads
    Dh = D // H
    NL = len(params['layers'])
    L_pad = ((L + 7) // 8) * 8        # sublane-align each batch's row block
    R = B * L_pad
    scale = 1.0 / math.sqrt(Dh)

    # ---- host-side glue (tiny): cls prepend, circular pad, 3 conv taps ----
    cls = jnp.broadcast_to(params['cls_token'], (B, 1, C))
    xc = jnp.concatenate([cls, x], axis=1)                        # (B, L, C)
    xp = jnp.concatenate([xc[:, -1:], xc, xc[:, :1]], axis=1)     # (B, L+2, C)
    x_cat = jnp.concatenate([xp[:, 0:L], xp[:, 1:L + 1], xp[:, 2:L + 2]],
                            axis=-1)                              # (B, L, 3C)
    x_cat = jnp.pad(x_cat, ((0, 0), (0, L_pad - L), (0, 0)))
    x_cat = x_cat.reshape(R, 3 * C).astype(jnp.bfloat16)          # (R, 3C)
    w_cat = jnp.concatenate([params['w0'], params['w1'], params['w2']],
                            axis=0).astype(jnp.bfloat16)          # (3C, D)
    pos = jnp.tile(jnp.pad(params['pos'], ((0, L_pad - L), (0, 0))),
                   (B, 1))                                        # (R, D) f32

    # Block-diagonal additive attention mask: a query row may only attend
    # to valid (non-pad) key rows of its own batch element.
    rb = np.arange(R) // L_pad
    ok = (np.arange(R) % L_pad) < L
    attn_mask = jnp.asarray(
        np.where((rb[:, None] == rb[None, :]) & ok[None, :],
                 0.0, NEG_INF).astype(np.float32))                # (R, R)

    # ---- per-head weight split (host-side, once) ----
    def heads_in(w):   # (D, D) -> (H, D, Dh): columns split per head
        return jnp.transpose(w.reshape(D, H, Dh), (1, 0, 2))

    def heads_b(b):    # (1, D) -> (H, 1, Dh)
        return jnp.transpose(b.reshape(1, H, Dh), (1, 0, 2))

    lay = params['layers']
    bf = jnp.bfloat16
    wq = jnp.stack([heads_in(lp['wq'] * scale) for lp in lay]
                   ).reshape(NL * H, D, Dh).astype(bf)   # scale folded in
    wk = jnp.stack([heads_in(lp['wk']) for lp in lay]).reshape(NL * H, D, Dh).astype(bf)
    wv = jnp.stack([heads_in(lp['wv']) for lp in lay]).reshape(NL * H, D, Dh).astype(bf)
    bq = jnp.stack([heads_b(lp['bq'] * scale) for lp in lay]).reshape(NL * H, 1, Dh)
    bk = jnp.stack([heads_b(lp['bk']) for lp in lay]).reshape(NL * H, 1, Dh)
    bv = jnp.stack([heads_b(lp['bv']) for lp in lay]).reshape(NL * H, 1, Dh)
    wo = jnp.stack([lp['wo'].reshape(H, Dh, D) for lp in lay]
                   ).reshape(NL * H, Dh, D).astype(bf)
    bo = jnp.stack([lp['bo'] for lp in lay])
    ln1w = jnp.stack([lp['ln1w'] for lp in lay])
    ln1b = jnp.stack([lp['ln1b'] for lp in lay])
    ln2w = jnp.stack([lp['ln2w'] for lp in lay])
    ln2b = jnp.stack([lp['ln2b'] for lp in lay])
    w1 = jnp.stack([lp['w1'] for lp in lay]).astype(bf)
    b1 = jnp.stack([lp['b1'] for lp in lay])
    w2 = jnp.stack([lp['w2'] for lp in lay]).astype(bf)
    b2 = jnp.stack([lp['b2'] for lp in lay])

    args = [x_cat, w_cat, pos, attn_mask,
            ln1w, ln1b, wq, wk, wv, bq, bk, bv, wo, bo,
            ln2w, ln2b, w1, b1, w2, b2,
            params['lnf_w'], params['lnf_b']]

    vmem_spec = pl.BlockSpec(memory_space=pltpu.MemorySpace.VMEM)
    resident = sum(int(a.size) * a.dtype.itemsize for a in args) + R * D * 4
    vmem_limit = int(min(100 * 1024 * 1024,
                         max(4 * 1024 * 1024, 4 * resident)))

    # TODO(synk): training-mode dropout not implemented (p=0.0 / inference).
    # Note: on v7x the batch could instead be a ("parallel",) grid axis to
    # use both TensorCores, but with the batch folded into the rows a single
    # grid-less call is faster on v5e/v6e and is what we ship here.
    out = pl.pallas_call(
        make_fused_kernel(H, NL),
        out_shape=jax.ShapeDtypeStruct((R, D), jnp.float32),
        in_specs=[vmem_spec] * len(args),
        out_specs=vmem_spec,
        compiler_params=pltpu.CompilerParams(vmem_limit_bytes=vmem_limit),
    )(*args)
    return out.reshape(B, L_pad, D)[:, :L]


# --------------------------- pure-JAX reference ------------------------------
def ref_layer(x, lp, n_heads):
    B, L, D = x.shape
    Dh = D // n_heads
    mu = x.mean(-1, keepdims=True)
    var = ((x - mu) ** 2).mean(-1, keepdims=True)
    xn = (x - mu) / jnp.sqrt(var + EPS) * lp['ln1w'] + lp['ln1b']
    q = xn @ lp['wq'] + lp['bq']
    k = xn @ lp['wk'] + lp['bk']
    v = xn @ lp['wv'] + lp['bv']
    q = q.reshape(B, L, n_heads, Dh)
    k = k.reshape(B, L, n_heads, Dh)
    v = v.reshape(B, L, n_heads, Dh)
    s = jnp.einsum('bqhd,bkhd->bhqk', q, k) / math.sqrt(Dh)
    p = jax.nn.softmax(s, axis=-1)
    o = jnp.einsum('bhqk,bkhd->bqhd', p, v).reshape(B, L, D)
    x1 = x + o @ lp['wo'] + lp['bo']
    mu2 = x1.mean(-1, keepdims=True)
    var2 = ((x1 - mu2) ** 2).mean(-1, keepdims=True)
    xn2 = (x1 - mu2) / jnp.sqrt(var2 + EPS) * lp['ln2w'] + lp['ln2b']
    h = xn2 @ lp['w1'] + lp['b1']
    h = 0.5 * h * (1.0 + jax.lax.erf(h / math.sqrt(2.0)))
    return x1 + h @ lp['w2'] + lp['b2']


def ref_forward(x, params, n_heads):
    B, T, C = x.shape
    L = T + 1
    cls = jnp.broadcast_to(params['cls_token'], (B, 1, C))
    xc = jnp.concatenate([cls, x], axis=1)
    xp = jnp.concatenate([xc[:, -1:], xc, xc[:, :1]], axis=1)
    h = (jnp.einsum('blc,cd->bld', xp[:, 0:L], params['w0'])
         + jnp.einsum('blc,cd->bld', xp[:, 1:L + 1], params['w1'])
         + jnp.einsum('blc,cd->bld', xp[:, 2:L + 2], params['w2']))
    h = h + params['pos'][None]
    for lp in params['layers']:
        h = ref_layer(h, lp, n_heads)
    mu = h.mean(-1, keepdims=True)
    var = ((h - mu) ** 2).mean(-1, keepdims=True)
    return (h - mu) / jnp.sqrt(var + EPS) * params['lnf_w'] + params['lnf_b']


# --------------------------------- params ------------------------------------
def init_params(key, seq_len, in_ch, d_model, n_layers, ksize=3):
    keys = iter(jax.random.split(key, 64))
    nrm = lambda shape, std: std * jax.random.normal(next(keys), shape, jnp.float32)

    conv_w = nrm((d_model, in_ch, ksize), math.sqrt(2.0 / (in_ch * ksize)))
    params = {
        'cls_token': nrm((1, 1, in_ch), 1.0),
        'w0': conv_w[:, :, 0].T,                    # (C, D)
        'w1': conv_w[:, :, 1].T,
        'w2': conv_w[:, :, 2].T,
        'pos': nrm((seq_len + 1, d_model), 1.0),    # learnable positional emb
        'lnf_w': jnp.ones((1, d_model), jnp.float32),
        'lnf_b': jnp.zeros((1, d_model), jnp.float32),
        'layers': [],
    }
    wstd = 1.0 / math.sqrt(d_model)
    for _ in range(n_layers):
        lp = {
            'ln1w': jnp.ones((1, d_model), jnp.float32),
            'ln1b': jnp.zeros((1, d_model), jnp.float32),
            'wq': nrm((d_model, d_model), wstd),
            'wk': nrm((d_model, d_model), wstd),
            'wv': nrm((d_model, d_model), wstd),
            'bq': nrm((1, d_model), 0.02),
            'bk': nrm((1, d_model), 0.02),
            'bv': nrm((1, d_model), 0.02),
            'wo': nrm((d_model, d_model), wstd),
            'bo': nrm((1, d_model), 0.02),
            'ln2w': jnp.ones((1, d_model), jnp.float32),
            'ln2b': jnp.zeros((1, d_model), jnp.float32),
            'w1': nrm((d_model, 4 * d_model), wstd),
            'b1': nrm((1, 4 * d_model), 0.02),
            'w2': nrm((4 * d_model, d_model), 1.0 / math.sqrt(4 * d_model)),
            'b2': nrm((1, d_model), 0.02),
        }
        params['layers'].append(lp)
    return params


if __name__ == "__main__":
    # config: sequence_len=8, input_channels=4, d_model=32, n_heads=4,
    #         n_layers=2, token_embedding_kernel_size=3, dropout=0.0
    B, T, C, D, H, NL = 2, 8, 4, 32, 4, 2

    key = jax.random.PRNGKey(0)
    kx, kp = jax.random.split(key)
    x = jax.random.normal(kx, (B, T, C), jnp.float32)
    params = init_params(kp, T, C, D, NL)

    out = jax.block_until_ready(timedrl_forward(x, params, H))
    assert out.shape == (B, T + 1, D), out.shape

    ref = jax.block_until_ready(ref_forward(x, params, H))
    # Tolerance covers bf16 weight matmuls + approx-reciprocal softmax denom
    # against the full-f32 reference.
    np.testing.assert_allclose(np.asarray(out), np.asarray(ref),
                               rtol=3e-2, atol=3e-2)

    print("KERNEL_OK")
</pallas_src>

<mosaic_0001>
module attributes {stable_mosaic.version = 11 : i64} {
  func.func @kernel(%arg0: memref<32x12xbf16, #tpu.memory_space<vmem>>, %arg1: memref<12x32xbf16, #tpu.memory_space<vmem>>, %arg2: memref<32x32xf32, #tpu.memory_space<vmem>>, %arg3: memref<32x32xf32, #tpu.memory_space<vmem>>, %arg4: memref<2x1x32xf32, #tpu.memory_space<vmem>>, %arg5: memref<2x1x32xf32, #tpu.memory_space<vmem>>, %arg6: memref<8x32x8xbf16, #tpu.memory_space<vmem>>, %arg7: memref<8x32x8xbf16, #tpu.memory_space<vmem>>, %arg8: memref<8x32x8xbf16, #tpu.memory_space<vmem>>, %arg9: memref<8x1x8xf32, #tpu.memory_space<vmem>>, %arg10: memref<8x1x8xf32, #tpu.memory_space<vmem>>, %arg11: memref<8x1x8xf32, #tpu.memory_space<vmem>>, %arg12: memref<8x8x32xbf16, #tpu.memory_space<vmem>>, %arg13: memref<2x1x32xf32, #tpu.memory_space<vmem>>, %arg14: memref<2x1x32xf32, #tpu.memory_space<vmem>>, %arg15: memref<2x1x32xf32, #tpu.memory_space<vmem>>, %arg16: memref<2x32x128xbf16, #tpu.memory_space<vmem>>, %arg17: memref<2x1x128xf32, #tpu.memory_space<vmem>>, %arg18: memref<2x128x32xbf16, #tpu.memory_space<vmem>>, %arg19: memref<2x1x32xf32, #tpu.memory_space<vmem>>, %arg20: memref<1x32xf32, #tpu.memory_space<vmem>>, %arg21: memref<1x32xf32, #tpu.memory_space<vmem>>, %arg22: memref<32x32xf32, #tpu.memory_space<vmem>>) attributes {dimension_semantics = [], scalar_prefetch = 0 : i64, scratch_operands = 0 : i64, tpu.core_type = #tpu.core_type<tc>} {
    %c0 = arith.constant 0 : index
    %c0_0 = arith.constant 0 : index
    %0 = vector.load %arg3[%c0, %c0_0] : memref<32x32xf32, #tpu.memory_space<vmem>>, vector<32x32xf32>
    %c0_1 = arith.constant 0 : index
    %c0_2 = arith.constant 0 : index
    %1 = vector.load %arg0[%c0_1, %c0_2] : memref<32x12xbf16, #tpu.memory_space<vmem>>, vector<32x12xbf16>
    %c0_3 = arith.constant 0 : index
    %c0_4 = arith.constant 0 : index
    %2 = vector.load %arg1[%c0_3, %c0_4] : memref<12x32xbf16, #tpu.memory_space<vmem>>, vector<12x32xbf16>
    %cst = arith.constant dense<0.000000e+00> : vector<32x32xf32>
    %3 = tpu.matmul %1, %2, %cst {dimension_numbers = #tpu.dot_dimension_numbers<[1], [0], [0], [1], [0, 0, 1, 1], [], []>} : vector<32x12xbf16>, vector<12x32xbf16>, vector<32x32xf32> -> vector<32x32xf32>
    %c0_5 = arith.constant 0 : index
    %c0_6 = arith.constant 0 : index
    %4 = vector.load %arg2[%c0_5, %c0_6] : memref<32x32xf32, #tpu.memory_space<vmem>>, vector<32x32xf32>
    %5 = arith.addf %3, %4 : vector<32x32xf32>
    %c0_7 = arith.constant 0 : index
    %c0_8 = arith.constant 0 : index
    %c0_9 = arith.constant 0 : index
    %6 = vector.load %arg4[%c0_7, %c0_8, %c0_9] : memref<2x1x32xf32, #tpu.memory_space<vmem>>, vector<1x1x32xf32>
    %7 = vector.shape_cast %6 : vector<1x1x32xf32> to vector<1x32xf32>
    %c0_10 = arith.constant 0 : index
    %c0_11 = arith.constant 0 : index
    %c0_12 = arith.constant 0 : index
    %8 = vector.load %arg5[%c0_10, %c0_11, %c0_12] : memref<2x1x32xf32, #tpu.memory_space<vmem>>, vector<1x1x32xf32>
    %9 = vector.shape_cast %8 : vector<1x1x32xf32> to vector<1x32xf32>
    %cst_13 = arith.constant dense<0.000000e+00> : vector<32xf32>
    %10 = vector.multi_reduction <add>, %5, %cst_13 [1] : vector<32x32xf32> to vector<32xf32>
    %11 = vector.shape_cast %10 : vector<32xf32> to vector<32x1xf32>
    %cst_14 = arith.constant 3.200000e+01 : f32
    %12 = vector.broadcast %cst_14 : f32 to vector<32x1xf32>
    %13 = arith.divf %11, %12 : vector<32x1xf32>
    %14 = vector.broadcast %13 : vector<32x1xf32> to vector<32x32xf32>
    %15 = arith.subf %5, %14 : vector<32x32xf32>
    %16 = arith.mulf %15, %15 : vector<32x32xf32>
    %cst_15 = arith.constant dense<0.000000e+00> : vector<32xf32>
    %17 = vector.multi_reduction <add>, %16, %cst_15 [1] : vector<32x32xf32> to vector<32xf32>
    %18 = vector.shape_cast %17 : vector<32xf32> to vector<32x1xf32>
    %cst_16 = arith.constant 3.200000e+01 : f32
    %19 = vector.broadcast %cst_16 : f32 to vector<32x1xf32>
    %20 = arith.divf %18, %19 : vector<32x1xf32>
    %21 = vector.broadcast %13 : vector<32x1xf32> to vector<32x32xf32>
    %22 = arith.subf %5, %21 : vector<32x32xf32>
    %cst_17 = arith.constant 9.99999974E-6 : f32
    %23 = vector.broadcast %cst_17 : f32 to vector<32x1xf32>
    %24 = arith.addf %20, %23 : vector<32x1xf32>
    %25 = math.rsqrt %24 : vector<32x1xf32>
    %26 = vector.broadcast %25 : vector<32x1xf32> to vector<32x32xf32>
    %27 = arith.mulf %22, %26 : vector<32x32xf32>
    %28 = vector.broadcast %7 : vector<1x32xf32> to vector<32x32xf32>
    %29 = arith.mulf %27, %28 : vector<32x32xf32>
    %30 = vector.broadcast %9 : vector<1x32xf32> to vector<32x32xf32>
    %31 = arith.addf %29, %30 : vector<32x32xf32>
    %32 = arith.truncf %31 : vector<32x32xf32> to vector<32x32xbf16>
    %c0_18 = arith.constant 0 : index
    %c0_19 = arith.constant 0 : index
    %c0_20 = arith.constant 0 : index
    %33 = vector.load %arg6[%c0_18, %c0_19, %c0_20] : memref<8x32x8xbf16, #tpu.memory_space<vmem>>, vector<1x32x8xbf16>
    %34 = vector.shape_cast %33 : vector<1x32x8xbf16> to vector<32x8xbf16>
    %cst_21 = arith.constant dense<0.000000e+00> : vector<32x8xf32>
    %35 = tpu.matmul %32, %34, %cst_21 {dimension_numbers = #tpu.dot_dimension_numbers<[1], [0], [0], [1], [0, 0, 1, 1], [], []>} : vector<32x32xbf16>, vector<32x8xbf16>, vector<32x8xf32> -> vector<32x8xf32>
    %c0_22 = arith.constant 0 : index
    %c0_23 = arith.constant 0 : index
    %c0_24 = arith.constant 0 : index
    %36 = vector.load %arg9[%c0_22, %c0_23, %c0_24] : memref<8x1x8xf32, #tpu.memory_space<vmem>>, vector<1x1x8xf32>
    %37 = vector.shape_cast %36 : vector<1x1x8xf32> to vector<1x8xf32>
    %38 = vector.broadcast %37 : vector<1x8xf32> to vector<32x8xf32>
    %39 = arith.addf %35, %38 : vector<32x8xf32>
    %c0_25 = arith.constant 0 : index
    %c0_26 = arith.constant 0 : index
    %c0_27 = arith.constant 0 : index
    %40 = vector.load %arg7[%c0_25, %c0_26, %c0_27] : memref<8x32x8xbf16, #tpu.memory_space<vmem>>, vector<1x32x8xbf16>
    %41 = vector.shape_cast %40 : vector<1x32x8xbf16> to vector<32x8xbf16>
    %cst_28 = arith.constant dense<0.000000e+00> : vector<32x8xf32>
    %42 = tpu.matmul %32, %41, %cst_28 {dimension_numbers = #tpu.dot_dimension_numbers<[1], [0], [0], [1], [0, 0, 1, 1], [], []>} : vector<32x32xbf16>, vector<32x8xbf16>, vector<32x8xf32> -> vector<32x8xf32>
    %c0_29 = arith.constant 0 : index
    %c0_30 = arith.constant 0 : index
    %c0_31 = arith.constant 0 : index
    %43 = vector.load %arg10[%c0_29, %c0_30, %c0_31] : memref<8x1x8xf32, #tpu.memory_space<vmem>>, vector<1x1x8xf32>
    %44 = vector.shape_cast %43 : vector<1x1x8xf32> to vector<1x8xf32>
    %45 = vector.broadcast %44 : vector<1x8xf32> to vector<32x8xf32>
    %46 = arith.addf %42, %45 : vector<32x8xf32>
    %c0_32 = arith.constant 0 : index
    %c0_33 = arith.constant 0 : index
    %c0_34 = arith.constant 0 : index
    %47 = vector.load %arg8[%c0_32, %c0_33, %c0_34] : memref<8x32x8xbf16, #tpu.memory_space<vmem>>, vector<1x32x8xbf16>
    %48 = vector.shape_cast %47 : vector<1x32x8xbf16> to vector<32x8xbf16>
    %cst_35 = arith.constant dense<0.000000e+00> : vector<32x8xf32>
    %49 = tpu.matmul %32, %48, %cst_35 {dimension_numbers = #tpu.dot_dimension_numbers<[1], [0], [0], [1], [0, 0, 1, 1], [], []>} : vector<32x32xbf16>, vector<32x8xbf16>, vector<32x8xf32> -> vector<32x8xf32>
    %c0_36 = arith.constant 0 : index
    %c0_37 = arith.constant 0 : index
    %c0_38 = arith.constant 0 : index
    %50 = vector.load %arg11[%c0_36, %c0_37, %c0_38] : memref<8x1x8xf32, #tpu.memory_space<vmem>>, vector<1x1x8xf32>
    %51 = vector.shape_cast %50 : vector<1x1x8xf32> to vector<1x8xf32>
    %52 = vector.broadcast %51 : vector<1x8xf32> to vector<32x8xf32>
    %53 = arith.addf %49, %52 : vector<32x8xf32>
    %cst_39 = arith.constant dense<0.000000e+00> : vector<32x32xf32>
    %54 = tpu.matmul %39, %46, %cst_39 {dimension_numbers = #tpu.dot_dimension_numbers<[1], [1], [0], [0], [0, 0, 1, 0], [], []>} : vector<32x8xf32>, vector<32x8xf32>, vector<32x32xf32> -> vector<32x32xf32>
    %55 = arith.addf %54, %0 : vector<32x32xf32>
    %cst_40 = arith.constant dense<0xFF800000> : vector<32xf32>
    %56 = vector.multi_reduction <maximumf>, %55, %cst_40 [1] : vector<32x32xf32> to vector<32xf32>
    %57 = vector.shape_cast %56 : vector<32xf32> to vector<32x1xf32>
    %58 = vector.broadcast %57 : vector<32x1xf32> to vector<32x32xf32>
    %59 = arith.subf %55, %58 : vector<32x32xf32>
    %60 = math.exp %59 : vector<32x32xf32>
    %cst_41 = arith.constant dense<0.000000e+00> : vector<32xf32>
    %61 = vector.multi_reduction <add>, %60, %cst_41 [1] : vector<32x32xf32> to vector<32xf32>
    %62 = vector.shape_cast %61 : vector<32xf32> to vector<32x1xf32>
    %63 = tpu.reciprocal %62 {approx = true} : vector<32x1xf32> -> vector<32x1xf32>
    %64 = vector.broadcast %63 : vector<32x1xf32> to vector<32x32xf32>
    %65 = arith.mulf %60, %64 : vector<32x32xf32>
    %cst_42 = arith.constant dense<0.000000e+00> : vector<32x8xf32>
    %66 = tpu.matmul %65, %53, %cst_42 {dimension_numbers = #tpu.dot_dimension_numbers<[1], [0], [0], [1], [0, 0, 1, 1], [], []>} : vector<32x32xf32>, vector<32x8xf32>, vector<32x8xf32> -> vector<32x8xf32>
    %67 = arith.truncf %66 : vector<32x8xf32> to vector<32x8xbf16>
    %c0_43 = arith.constant 0 : index
    %c0_44 = arith.constant 0 : index
    %c0_45 = arith.constant 0 : index
    %68 = vector.load %arg12[%c0_43, %c0_44, %c0_45] : memref<8x8x32xbf16, #tpu.memory_space<vmem>>, vector<1x8x32xbf16>
    %69 = vector.shape_cast %68 : vector<1x8x32xbf16> to vector<8x32xbf16>
    %cst_46 = arith.constant dense<0.000000e+00> : vector<32x32xf32>
    %70 = tpu.matmul %67, %69, %cst_46 {dimension_numbers = #tpu.dot_dimension_numbers<[1], [0], [0], [1], [0, 0, 1, 1], [], []>} : vector<32x8xbf16>, vector<8x32xbf16>, vector<32x32xf32> -> vector<32x32xf32>
    %c1 = arith.constant 1 : index
    %c0_47 = arith.constant 0 : index
    %c0_48 = arith.constant 0 : index
    %71 = vector.load %arg6[%c1, %c0_47, %c0_48] : memref<8x32x8xbf16, #tpu.memory_space<vmem>>, vector<1x32x8xbf16>
    %72 = vector.shape_cast %71 : vector<1x32x8xbf16> to vector<32x8xbf16>
    %cst_49 = arith.constant dense<0.000000e+00> : vector<32x8xf32>
    %73 = tpu.matmul %32, %72, %cst_49 {dimension_numbers = #tpu.dot_dimension_numbers<[1], [0], [0], [1], [0, 0, 1, 1], [], []>} : vector<32x32xbf16>, vector<32x8xbf16>, vector<32x8xf32> -> vector<32x8xf32>
    %c1_50 = arith.constant 1 : index
    %c0_51 = arith.constant 0 : index
    %c0_52 = arith.constant 0 : index
    %74 = vector.load %arg9[%c1_50, %c0_51, %c0_52] : memref<8x1x8xf32, #tpu.memory_space<vmem>>, vector<1x1x8xf32>
    %75 = vector.shape_cast %74 : vector<1x1x8xf32> to vector<1x8xf32>
    %76 = vector.broadcast %75 : vector<1x8xf32> to vector<32x8xf32>
    %77 = arith.addf %73, %76 : vector<32x8xf32>
    %c1_53 = arith.constant 1 : index
    %c0_54 = arith.constant 0 : index
    %c0_55 = arith.constant 0 : index
    %78 = vector.load %arg7[%c1_53, %c0_54, %c0_55] : memref<8x32x8xbf16, #tpu.memory_space<vmem>>, vector<1x32x8xbf16>
    %79 = vector.shape_cast %78 : vector<1x32x8xbf16> to vector<32x8xbf16>
    %cst_56 = arith.constant dense<0.000000e+00> : vector<32x8xf32>
    %80 = tpu.matmul %32, %79, %cst_56 {dimension_numbers = #tpu.dot_dimension_numbers<[1], [0], [0], [1], [0, 0, 1, 1], [], []>} : vector<32x32xbf16>, vector<32x8xbf16>, vector<32x8xf32> -> vector<32x8xf32>
    %c1_57 = arith.constant 1 : index
    %c0_58 = arith.constant 0 : index
    %c0_59 = arith.constant 0 : index
    %81 = vector.load %arg10[%c1_57, %c0_58, %c0_59] : memref<8x1x8xf32, #tpu.memory_space<vmem>>, vector<1x1x8xf32>
    %82 = vector.shape_cast %81 : vector<1x1x8xf32> to vector<1x8xf32>
    %83 = vector.broadcast %82 : vector<1x8xf32> to vector<32x8xf32>
    %84 = arith.addf %80, %83 : vector<32x8xf32>
    %c1_60 = arith.constant 1 : index
    %c0_61 = arith.constant 0 : index
    %c0_62 = arith.constant 0 : index
    %85 = vector.load %arg8[%c1_60, %c0_61, %c0_62] : memref<8x32x8xbf16, #tpu.memory_space<vmem>>, vector<1x32x8xbf16>
    %86 = vector.shape_cast %85 : vector<1x32x8xbf16> to vector<32x8xbf16>
    %cst_63 = arith.constant dense<0.000000e+00> : vector<32x8xf32>
    %87 = tpu.matmul %32, %86, %cst_63 {dimension_numbers = #tpu.dot_dimension_numbers<[1], [0], [0], [1], [0, 0, 1, 1], [], []>} : vector<32x32xbf16>, vector<32x8xbf16>, vector<32x8xf32> -> vector<32x8xf32>
    %c1_64 = arith.constant 1 : index
    %c0_65 = arith.constant 0 : index
    %c0_66 = arith.constant 0 : index
    %88 = vector.load %arg11[%c1_64, %c0_65, %c0_66] : memref<8x1x8xf32, #tpu.memory_space<vmem>>, vector<1x1x8xf32>
    %89 = vector.shape_cast %88 : vector<1x1x8xf32> to vector<1x8xf32>
    %90 = vector.broadcast %89 : vector<1x8xf32> to vector<32x8xf32>
    %91 = arith.addf %87, %90 : vector<32x8xf32>
    %cst_67 = arith.constant dense<0.000000e+00> : vector<32x32xf32>
    %92 = tpu.matmul %77, %84, %cst_67 {dimension_numbers = #tpu.dot_dimension_numbers<[1], [1], [0], [0], [0, 0, 1, 0], [], []>} : vector<32x8xf32>, vector<32x8xf32>, vector<32x32xf32> -> vector<32x32xf32>
    %93 = arith.addf %92, %0 : vector<32x32xf32>
    %cst_68 = arith.constant dense<0xFF800000> : vector<32xf32>
    %94 = vector.multi_reduction <maximumf>, %93, %cst_68 [1] : vector<32x32xf32> to vector<32xf32>
    %95 = vector.shape_cast %94 : vector<32xf32> to vector<32x1xf32>
    %96 = vector.broadcast %95 : vector<32x1xf32> to vector<32x32xf32>
    %97 = arith.subf %93, %96 : vector<32x32xf32>
    %98 = math.exp %97 : vector<32x32xf32>
    %cst_69 = arith.constant dense<0.000000e+00> : vector<32xf32>
    %99 = vector.multi_reduction <add>, %98, %cst_69 [1] : vector<32x32xf32> to vector<32xf32>
    %100 = vector.shape_cast %99 : vector<32xf32> to vector<32x1xf32>
    %101 = tpu.reciprocal %100 {approx = true} : vector<32x1xf32> -> vector<32x1xf32>
    %102 = vector.broadcast %101 : vector<32x1xf32> to vector<32x32xf32>
    %103 = arith.mulf %98, %102 : vector<32x32xf32>
    %cst_70 = arith.constant dense<0.000000e+00> : vector<32x8xf32>
    %104 = tpu.matmul %103, %91, %cst_70 {dimension_numbers = #tpu.dot_dimension_numbers<[1], [0], [0], [1], [0, 0, 1, 1], [], []>} : vector<32x32xf32>, vector<32x8xf32>, vector<32x8xf32> -> vector<32x8xf32>
    %105 = arith.truncf %104 : vector<32x8xf32> to vector<32x8xbf16>
    %c1_71 = arith.constant 1 : index
    %c0_72 = arith.constant 0 : index
    %c0_73 = arith.constant 0 : index
    %106 = vector.load %arg12[%c1_71, %c0_72, %c0_73] : memref<8x8x32xbf16, #tpu.memory_space<vmem>>, vector<1x8x32xbf16>
    %107 = vector.shape_cast %106 : vector<1x8x32xbf16> to vector<8x32xbf16>
    %cst_74 = arith.constant dense<0.000000e+00> : vector<32x32xf32>
    %108 = tpu.matmul %105, %107, %cst_74 {dimension_numbers = #tpu.dot_dimension_numbers<[1], [0], [0], [1], [0, 0, 1, 1], [], []>} : vector<32x8xbf16>, vector<8x32xbf16>, vector<32x32xf32> -> vector<32x32xf32>
    %109 = arith.addf %70, %108 : vector<32x32xf32>
    %c2 = arith.constant 2 : index
    %c0_75 = arith.constant 0 : index
    %c0_76 = arith.constant 0 : index
    %110 = vector.load %arg6[%c2, %c0_75, %c0_76] : memref<8x32x8xbf16, #tpu.memory_space<vmem>>, vector<1x32x8xbf16>
    %111 = vector.shape_cast %110 : vector<1x32x8xbf16> to vector<32x8xbf16>
    %cst_77 = arith.constant dense<0.000000e+00> : vector<32x8xf32>
    %112 = tpu.matmul %32, %111, %cst_77 {dimension_numbers = #tpu.dot_dimension_numbers<[1], [0], [0], [1], [0, 0, 1, 1], [], []>} : vector<32x32xbf16>, vector<32x8xbf16>, vector<32x8xf32> -> vector<32x8xf32>
    %c2_78 = arith.constant 2 : index
    %c0_79 = arith.constant 0 : index
    %c0_80 = arith.constant 0 : index
    %113 = vector.load %arg9[%c2_78, %c0_79, %c0_80] : memref<8x1x8xf32, #tpu.memory_space<vmem>>, vector<1x1x8xf32>
    %114 = vector.shape_cast %113 : vector<1x1x8xf32> to vector<1x8xf32>
    %115 = vector.broadcast %114 : vector<1x8xf32> to vector<32x8xf32>
    %116 = arith.addf %112, %115 : vector<32x8xf32>
    %c2_81 = arith.constant 2 : index
    %c0_82 = arith.constant 0 : index
    %c0_83 = arith.constant 0 : index
    %117 = vector.load %arg7[%c2_81, %c0_82, %c0_83] : memref<8x32x8xbf16, #tpu.memory_space<vmem>>, vector<1x32x8xbf16>
    %118 = vector.shape_cast %117 : vector<1x32x8xbf16> to vector<32x8xbf16>
    %cst_84 = arith.constant dense<0.000000e+00> : vector<32x8xf32>
    %119 = tpu.matmul %32, %118, %cst_84 {dimension_numbers = #tpu.dot_dimension_numbers<[1], [0], [0], [1], [0, 0, 1, 1], [], []>} : vector<32x32xbf16>, vector<32x8xbf16>, vector<32x8xf32> -> vector<32x8xf32>
    %c2_85 = arith.constant 2 : index
    %c0_86 = arith.constant 0 : index
    %c0_87 = arith.constant 0 : index
    %120 = vector.load %arg10[%c2_85, %c0_86, %c0_87] : memref<8x1x8xf32, #tpu.memory_space<vmem>>, vector<1x1x8xf32>
    %121 = vector.shape_cast %120 : vector<1x1x8xf32> to vector<1x8xf32>
    %122 = vector.broadcast %121 : vector<1x8xf32> to vector<32x8xf32>
    %123 = arith.addf %119, %122 : vector<32x8xf32>
    %c2_88 = arith.constant 2 : index
    %c0_89 = arith.constant 0 : index
    %c0_90 = arith.constant 0 : index
    %124 = vector.load %arg8[%c2_88, %c0_89, %c0_90] : memref<8x32x8xbf16, #tpu.memory_space<vmem>>, vector<1x32x8xbf16>
    %125 = vector.shape_cast %124 : vector<1x32x8xbf16> to vector<32x8xbf16>
    %cst_91 = arith.constant dense<0.000000e+00> : vector<32x8xf32>
    %126 = tpu.matmul %32, %125, %cst_91 {dimension_numbers = #tpu.dot_dimension_numbers<[1], [0], [0], [1], [0, 0, 1, 1], [], []>} : vector<32x32xbf16>, vector<32x8xbf16>, vector<32x8xf32> -> vector<32x8xf32>
    %c2_92 = arith.constant 2 : index
    %c0_93 = arith.constant 0 : index
    %c0_94 = arith.constant 0 : index
    %127 = vector.load %arg11[%c2_92, %c0_93, %c0_94] : memref<8x1x8xf32, #tpu.memory_space<vmem>>, vector<1x1x8xf32>
    %128 = vector.shape_cast %127 : vector<1x1x8xf32> to vector<1x8xf32>
    %129 = vector.broadcast %128 : vector<1x8xf32> to vector<32x8xf32>
    %130 = arith.addf %126, %129 : vector<32x8xf32>
    %cst_95 = arith.constant dense<0.000000e+00> : vector<32x32xf32>
    %131 = tpu.matmul %116, %123, %cst_95 {dimension_numbers = #tpu.dot_dimension_numbers<[1], [1], [0], [0], [0, 0, 1, 0], [], []>} : vector<32x8xf32>, vector<32x8xf32>, vector<32x32xf32> -> vector<32x32xf32>
    %132 = arith.addf %131, %0 : vector<32x32xf32>
    %cst_96 = arith.constant dense<0xFF800000> : vector<32xf32>
    %133 = vector.multi_reduction <maximumf>, %132, %cst_96 [1] : vector<32x32xf32> to vector<32xf32>
    %134 = vector.shape_cast %133 : vector<32xf32> to vector<32x1xf32>
    %135 = vector.broadcast %134 : vector<32x1xf32> to vector<32x32xf32>
    %136 = arith.subf %132, %135 : vector<32x32xf32>
    %137 = math.exp %136 : vector<32x32xf32>
    %cst_97 = arith.constant dense<0.000000e+00> : vector<32xf32>
    %138 = vector.multi_reduction <add>, %137, %cst_97 [1] : vector<32x32xf32> to vector<32xf32>
    %139 = vector.shape_cast %138 : vector<32xf32> to vector<32x1xf32>
    %140 = tpu.reciprocal %139 {approx = true} : vector<32x1xf32> -> vector<32x1xf32>
    %141 = vector.broadcast %140 : vector<32x1xf32> to vector<32x32xf32>
    %142 = arith.mulf %137, %141 : vector<32x32xf32>
    %cst_98 = arith.constant dense<0.000000e+00> : vector<32x8xf32>
    %143 = tpu.matmul %142, %130, %cst_98 {dimension_numbers = #tpu.dot_dimension_numbers<[1], [0], [0], [1], [0, 0, 1, 1], [], []>} : vector<32x32xf32>, vector<32x8xf32>, vector<32x8xf32> -> vector<32x8xf32>
    %144 = arith.truncf %143 : vector<32x8xf32> to vector<32x8xbf16>
    %c2_99 = arith.constant 2 : index
    %c0_100 = arith.constant 0 : index
    %c0_101 = arith.constant 0 : index
    %145 = vector.load %arg12[%c2_99, %c0_100, %c0_101] : memref<8x8x32xbf16, #tpu.memory_space<vmem>>, vector<1x8x32xbf16>
    %146 = vector.shape_cast %145 : vector<1x8x32xbf16> to vector<8x32xbf16>
    %cst_102 = arith.constant dense<0.000000e+00> : vector<32x32xf32>
    %147 = tpu.matmul %144, %146, %cst_102 {dimension_numbers = #tpu.dot_dimension_numbers<[1], [0], [0], [1], [0, 0, 1, 1], [], []>} : vector<32x8xbf16>, vector<8x32xbf16>, vector<32x32xf32> -> vector<32x32xf32>
    %148 = arith.addf %109, %147 : vector<32x32xf32>
    %c3 = arith.constant 3 : index
    %c0_103 = arith.constant 0 : index
    %c0_104 = arith.constant 0 : index
    %149 = vector.load %arg6[%c3, %c0_103, %c0_104] : memref<8x32x8xbf16, #tpu.memory_space<vmem>>, vector<1x32x8xbf16>
    %150 = vector.shape_cast %149 : vector<1x32x8xbf16> to vector<32x8xbf16>
    %cst_105 = arith.constant dense<0.000000e+00> : vector<32x8xf32>
    %151 = tpu.matmul %32, %150, %cst_105 {dimension_numbers = #tpu.dot_dimension_numbers<[1], [0], [0], [1], [0, 0, 1, 1], [], []>} : vector<32x32xbf16>, vector<32x8xbf16>, vector<32x8xf32> -> vector<32x8xf32>
    %c3_106 = arith.constant 3 : index
    %c0_107 = arith.constant 0 : index
    %c0_108 = arith.constant 0 : index
    %152 = vector.load %arg9[%c3_106, %c0_107, %c0_108] : memref<8x1x8xf32, #tpu.memory_space<vmem>>, vector<1x1x8xf32>
    %153 = vector.shape_cast %152 : vector<1x1x8xf32> to vector<1x8xf32>
    %154 = vector.broadcast %153 : vector<1x8xf32> to vector<32x8xf32>
    %155 = arith.addf %151, %154 : vector<32x8xf32>
    %c3_109 = arith.constant 3 : index
    %c0_110 = arith.constant 0 : index
    %c0_111 = arith.constant 0 : index
    %156 = vector.load %arg7[%c3_109, %c0_110, %c0_111] : memref<8x32x8xbf16, #tpu.memory_space<vmem>>, vector<1x32x8xbf16>
    %157 = vector.shape_cast %156 : vector<1x32x8xbf16> to vector<32x8xbf16>
    %cst_112 = arith.constant dense<0.000000e+00> : vector<32x8xf32>
    %158 = tpu.matmul %32, %157, %cst_112 {dimension_numbers = #tpu.dot_dimension_numbers<[1], [0], [0], [1], [0, 0, 1, 1], [], []>} : vector<32x32xbf16>, vector<32x8xbf16>, vector<32x8xf32> -> vector<32x8xf32>
    %c3_113 = arith.constant 3 : index
    %c0_114 = arith.constant 0 : index
    %c0_115 = arith.constant 0 : index
    %159 = vector.load %arg10[%c3_113, %c0_114, %c0_115] : memref<8x1x8xf32, #tpu.memory_space<vmem>>, vector<1x1x8xf32>
    %160 = vector.shape_cast %159 : vector<1x1x8xf32> to vector<1x8xf32>
    %161 = vector.broadcast %160 : vector<1x8xf32> to vector<32x8xf32>
    %162 = arith.addf %158, %161 : vector<32x8xf32>
    %c3_116 = arith.constant 3 : index
    %c0_117 = arith.constant 0 : index
    %c0_118 = arith.constant 0 : index
    %163 = vector.load %arg8[%c3_116, %c0_117, %c0_118] : memref<8x32x8xbf16, #tpu.memory_space<vmem>>, vector<1x32x8xbf16>
    %164 = vector.shape_cast %163 : vector<1x32x8xbf16> to vector<32x8xbf16>
    %cst_119 = arith.constant dense<0.000000e+00> : vector<32x8xf32>
    %165 = tpu.matmul %32, %164, %cst_119 {dimension_numbers = #tpu.dot_dimension_numbers<[1], [0], [0], [1], [0, 0, 1, 1], [], []>} : vector<32x32xbf16>, vector<32x8xbf16>, vector<32x8xf32> -> vector<32x8xf32>
    %c3_120 = arith.constant 3 : index
    %c0_121 = arith.constant 0 : index
    %c0_122 = arith.constant 0 : index
    %166 = vector.load %arg11[%c3_120, %c0_121, %c0_122] : memref<8x1x8xf32, #tpu.memory_space<vmem>>, vector<1x1x8xf32>
    %167 = vector.shape_cast %166 : vector<1x1x8xf32> to vector<1x8xf32>
    %168 = vector.broadcast %167 : vector<1x8xf32> to vector<32x8xf32>
    %169 = arith.addf %165, %168 : vector<32x8xf32>
    %cst_123 = arith.constant dense<0.000000e+00> : vector<32x32xf32>
    %170 = tpu.matmul %155, %162, %cst_123 {dimension_numbers = #tpu.dot_dimension_numbers<[1], [1], [0], [0], [0, 0, 1, 0], [], []>} : vector<32x8xf32>, vector<32x8xf32>, vector<32x32xf32> -> vector<32x32xf32>
    %171 = arith.addf %170, %0 : vector<32x32xf32>
    %cst_124 = arith.constant dense<0xFF800000> : vector<32xf32>
    %172 = vector.multi_reduction <maximumf>, %171, %cst_124 [1] : vector<32x32xf32> to vector<32xf32>
    %173 = vector.shape_cast %172 : vector<32xf32> to vector<32x1xf32>
    %174 = vector.broadcast %173 : vector<32x1xf32> to vector<32x32xf32>
    %175 = arith.subf %171, %174 : vector<32x32xf32>
    %176 = math.exp %175 : vector<32x32xf32>
    %cst_125 = arith.constant dense<0.000000e+00> : vector<32xf32>
    %177 = vector.multi_reduction <add>, %176, %cst_125 [1] : vector<32x32xf32> to vector<32xf32>
    %178 = vector.shape_cast %177 : vector<32xf32> to vector<32x1xf32>
    %179 = tpu.reciprocal %178 {approx = true} : vector<32x1xf32> -> vector<32x1xf32>
    %180 = vector.broadcast %179 : vector<32x1xf32> to vector<32x32xf32>
    %181 = arith.mulf %176, %180 : vector<32x32xf32>
    %cst_126 = arith.constant dense<0.000000e+00> : vector<32x8xf32>
    %182 = tpu.matmul %181, %169, %cst_126 {dimension_numbers = #tpu.dot_dimension_numbers<[1], [0], [0], [1], [0, 0, 1, 1], [], []>} : vector<32x32xf32>, vector<32x8xf32>, vector<32x8xf32> -> vector<32x8xf32>
    %183 = arith.truncf %182 : vector<32x8xf32> to vector<32x8xbf16>
    %c3_127 = arith.constant 3 : index
    %c0_128 = arith.constant 0 : index
    %c0_129 = arith.constant 0 : index
    %184 = vector.load %arg12[%c3_127, %c0_128, %c0_129] : memref<8x8x32xbf16, #tpu.memory_space<vmem>>, vector<1x8x32xbf16>
    %185 = vector.shape_cast %184 : vector<1x8x32xbf16> to vector<8x32xbf16>
    %cst_130 = arith.constant dense<0.000000e+00> : vector<32x32xf32>
    %186 = tpu.matmul %183, %185, %cst_130 {dimension_numbers = #tpu.dot_dimension_numbers<[1], [0], [0], [1], [0, 0, 1, 1], [], []>} : vector<32x8xbf16>, vector<8x32xbf16>, vector<32x32xf32> -> vector<32x32xf32>
    %187 = arith.addf %148, %186 : vector<32x32xf32>
    %188 = arith.addf %5, %187 : vector<32x32xf32>
    %c0_131 = arith.constant 0 : index
    %c0_132 = arith.constant 0 : index
    %c0_133 = arith.constant 0 : index
    %189 = vector.load %arg13[%c0_131, %c0_132, %c0_133] : memref<2x1x32xf32, #tpu.memory_space<vmem>>, vector<1x1x32xf32>
    %190 = vector.shape_cast %189 : vector<1x1x32xf32> to vector<1x32xf32>
    %191 = vector.broadcast %190 : vector<1x32xf32> to vector<32x32xf32>
    %192 = arith.addf %188, %191 : vector<32x32xf32>
    %c0_134 = arith.constant 0 : index
    %c0_135 = arith.constant 0 : index
    %c0_136 = arith.constant 0 : index
    %193 = vector.load %arg14[%c0_134, %c0_135, %c0_136] : memref<2x1x32xf32, #tpu.memory_space<vmem>>, vector<1x1x32xf32>
    %194 = vector.shape_cast %193 : vector<1x1x32xf32> to vector<1x32xf32>
    %c0_137 = arith.constant 0 : index
    %c0_138 = arith.constant 0 : index
    %c0_139 = arith.constant 0 : index
    %195 = vector.load %arg15[%c0_137, %c0_138, %c0_139] : memref<2x1x32xf32, #tpu.memory_space<vmem>>, vector<1x1x32xf32>
    %196 = vector.shape_cast %195 : vector<1x1x32xf32> to vector<1x32xf32>
    %cst_140 = arith.constant dense<0.000000e+00> : vector<32xf32>
    %197 = vector.multi_reduction <add>, %192, %cst_140 [1] : vector<32x32xf32> to vector<32xf32>
    %198 = vector.shape_cast %197 : vector<32xf32> to vector<32x1xf32>
    %cst_141 = arith.constant 3.200000e+01 : f32
    %199 = vector.broadcast %cst_141 : f32 to vector<32x1xf32>
    %200 = arith.divf %198, %199 : vector<32x1xf32>
    %201 = vector.broadcast %200 : vector<32x1xf32> to vector<32x32xf32>
    %202 = arith.subf %192, %201 : vector<32x32xf32>
    %203 = arith.mulf %202, %202 : vector<32x32xf32>
    %cst_142 = arith.constant dense<0.000000e+00> : vector<32xf32>
    %204 = vector.multi_reduction <add>, %203, %cst_142 [1] : vector<32x32xf32> to vector<32xf32>
    %205 = vector.shape_cast %204 : vector<32xf32> to vector<32x1xf32>
    %cst_143 = arith.constant 3.200000e+01 : f32
    %206 = vector.broadcast %cst_143 : f32 to vector<32x1xf32>
    %207 = arith.divf %205, %206 : vector<32x1xf32>
    %208 = vector.broadcast %200 : vector<32x1xf32> to vector<32x32xf32>
    %209 = arith.subf %192, %208 : vector<32x32xf32>
    %cst_144 = arith.constant 9.99999974E-6 : f32
    %210 = vector.broadcast %cst_144 : f32 to vector<32x1xf32>
    %211 = arith.addf %207, %210 : vector<32x1xf32>
    %212 = math.rsqrt %211 : vector<32x1xf32>
    %213 = vector.broadcast %212 : vector<32x1xf32> to vector<32x32xf32>
    %214 = arith.mulf %209, %213 : vector<32x32xf32>
    %215 = vector.broadcast %194 : vector<1x32xf32> to vector<32x32xf32>
    %216 = arith.mulf %214, %215 : vector<32x32xf32>
    %217 = vector.broadcast %196 : vector<1x32xf32> to vector<32x32xf32>
    %218 = arith.addf %216, %217 : vector<32x32xf32>
    %219 = arith.truncf %218 : vector<32x32xf32> to vector<32x32xbf16>
    %c0_145 = arith.constant 0 : index
    %c0_146 = arith.constant 0 : index
    %c0_147 = arith.constant 0 : index
    %220 = vector.load %arg16[%c0_145, %c0_146, %c0_147] : memref<2x32x128xbf16, #tpu.memory_space<vmem>>, vector<1x32x128xbf16>
    %221 = vector.shape_cast %220 : vector<1x32x128xbf16> to vector<32x128xbf16>
    %cst_148 = arith.constant dense<0.000000e+00> : vector<32x128xf32>
    %222 = tpu.matmul %219, %221, %cst_148 {dimension_numbers = #tpu.dot_dimension_numbers<[1], [0], [0], [1], [0, 0, 1, 1], [], []>} : vector<32x32xbf16>, vector<32x128xbf16>, vector<32x128xf32> -> vector<32x128xf32>
    %c0_149 = arith.constant 0 : index
    %c0_150 = arith.constant 0 : index
    %c0_151 = arith.constant 0 : index
    %223 = vector.load %arg17[%c0_149, %c0_150, %c0_151] : memref<2x1x128xf32, #tpu.memory_space<vmem>>, vector<1x1x128xf32>
    %224 = vector.shape_cast %223 : vector<1x1x128xf32> to vector<1x128xf32>
    %225 = vector.broadcast %224 : vector<1x128xf32> to vector<32x128xf32>
    %226 = arith.addf %222, %225 : vector<32x128xf32>
    %cst_152 = arith.constant 5.000000e-01 : f32
    %227 = vector.broadcast %cst_152 : f32 to vector<32x128xf32>
    %228 = arith.mulf %227, %226 : vector<32x128xf32>
    %cst_153 = arith.constant 0.707106769 : f32
    %229 = vector.broadcast %cst_153 : f32 to vector<32x128xf32>
    %230 = arith.mulf %226, %229 : vector<32x128xf32>
    %231 = math.erf %230 : vector<32x128xf32>
    %cst_154 = arith.constant 1.000000e+00 : f32
    %232 = vector.broadcast %cst_154 : f32 to vector<32x128xf32>
    %233 = arith.addf %232, %231 : vector<32x128xf32>
    %234 = arith.mulf %228, %233 : vector<32x128xf32>
    %235 = arith.truncf %234 : vector<32x128xf32> to vector<32x128xbf16>
    %c0_155 = arith.constant 0 : index
    %c0_156 = arith.constant 0 : index
    %c0_157 = arith.constant 0 : index
    %236 = vector.load %arg18[%c0_155, %c0_156, %c0_157] : memref<2x128x32xbf16, #tpu.memory_space<vmem>>, vector<1x128x32xbf16>
    %237 = vector.shape_cast %236 : vector<1x128x32xbf16> to vector<128x32xbf16>
    %cst_158 = arith.constant dense<0.000000e+00> : vector<32x32xf32>
    %238 = tpu.matmul %235, %237, %cst_158 {dimension_numbers = #tpu.dot_dimension_numbers<[1], [0], [0], [1], [0, 0, 1, 1], [], []>} : vector<32x128xbf16>, vector<128x32xbf16>, vector<32x32xf32> -> vector<32x32xf32>
    %239 = arith.addf %192, %238 : vector<32x32xf32>
    %c0_159 = arith.constant 0 : index
    %c0_160 = arith.constant 0 : index
    %c0_161 = arith.constant 0 : index
    %240 = vector.load %arg19[%c0_159, %c0_160, %c0_161] : memref<2x1x32xf32, #tpu.memory_space<vmem>>, vector<1x1x32xf32>
    %241 = vector.shape_cast %240 : vector<1x1x32xf32> to vector<1x32xf32>
    %242 = vector.broadcast %241 : vector<1x32xf32> to vector<32x32xf32>
    %243 = arith.addf %239, %242 : vector<32x32xf32>
    %c1_162 = arith.constant 1 : index
    %c0_163 = arith.constant 0 : index
    %c0_164 = arith.constant 0 : index
    %244 = vector.load %arg4[%c1_162, %c0_163, %c0_164] : memref<2x1x32xf32, #tpu.memory_space<vmem>>, vector<1x1x32xf32>
    %245 = vector.shape_cast %244 : vector<1x1x32xf32> to vector<1x32xf32>
    %c1_165 = arith.constant 1 : index
    %c0_166 = arith.constant 0 : index
    %c0_167 = arith.constant 0 : index
    %246 = vector.load %arg5[%c1_165, %c0_166, %c0_167] : memref<2x1x32xf32, #tpu.memory_space<vmem>>, vector<1x1x32xf32>
    %247 = vector.shape_cast %246 : vector<1x1x32xf32> to vector<1x32xf32>
    %cst_168 = arith.constant dense<0.000000e+00> : vector<32xf32>
    %248 = vector.multi_reduction <add>, %243, %cst_168 [1] : vector<32x32xf32> to vector<32xf32>
    %249 = vector.shape_cast %248 : vector<32xf32> to vector<32x1xf32>
    %cst_169 = arith.constant 3.200000e+01 : f32
    %250 = vector.broadcast %cst_169 : f32 to vector<32x1xf32>
    %251 = arith.divf %249, %250 : vector<32x1xf32>
    %252 = vector.broadcast %251 : vector<32x1xf32> to vector<32x32xf32>
    %253 = arith.subf %243, %252 : vector<32x32xf32>
    %254 = arith.mulf %253, %253 : vector<32x32xf32>
    %cst_170 = arith.constant dense<0.000000e+00> : vector<32xf32>
    %255 = vector.multi_reduction <add>, %254, %cst_170 [1] : vector<32x32xf32> to vector<32xf32>
    %256 = vector.shape_cast %255 : vector<32xf32> to vector<32x1xf32>
    %cst_171 = arith.constant 3.200000e+01 : f32
    %257 = vector.broadcast %cst_171 : f32 to vector<32x1xf32>
    %258 = arith.divf %256, %257 : vector<32x1xf32>
    %259 = vector.broadcast %251 : vector<32x1xf32> to vector<32x32xf32>
    %260 = arith.subf %243, %259 : vector<32x32xf32>
    %cst_172 = arith.constant 9.99999974E-6 : f32
    %261 = vector.broadcast %cst_172 : f32 to vector<32x1xf32>
    %262 = arith.addf %258, %261 : vector<32x1xf32>
    %263 = math.rsqrt %262 : vector<32x1xf32>
    %264 = vector.broadcast %263 : vector<32x1xf32> to vector<32x32xf32>
    %265 = arith.mulf %260, %264 : vector<32x32xf32>
    %266 = vector.broadcast %245 : vector<1x32xf32> to vector<32x32xf32>
    %267 = arith.mulf %265, %266 : vector<32x32xf32>
    %268 = vector.broadcast %247 : vector<1x32xf32> to vector<32x32xf32>
    %269 = arith.addf %267, %268 : vector<32x32xf32>
    %270 = arith.truncf %269 : vector<32x32xf32> to vector<32x32xbf16>
    %c4 = arith.constant 4 : index
    %c0_173 = arith.constant 0 : index
    %c0_174 = arith.constant 0 : index
    %271 = vector.load %arg6[%c4, %c0_173, %c0_174] : memref<8x32x8xbf16, #tpu.memory_space<vmem>>, vector<1x32x8xbf16>
    %272 = vector.shape_cast %271 : vector<1x32x8xbf16> to vector<32x8xbf16>
    %cst_175 = arith.constant dense<0.000000e+00> : vector<32x8xf32>
    %273 = tpu.matmul %270, %272, %cst_175 {dimension_numbers = #tpu.dot_dimension_numbers<[1], [0], [0], [1], [0, 0, 1, 1], [], []>} : vector<32x32xbf16>, vector<32x8xbf16>, vector<32x8xf32> -> vector<32x8xf32>
    %c4_176 = arith.constant 4 : index
    %c0_177 = arith.constant 0 : index
    %c0_178 = arith.constant 0 : index
    %274 = vector.load %arg9[%c4_176, %c0_177, %c0_178] : memref<8x1x8xf32, #tpu.memory_space<vmem>>, vector<1x1x8xf32>
    %275 = vector.shape_cast %274 : vector<1x1x8xf32> to vector<1x8xf32>
    %276 = vector.broadcast %275 : vector<1x8xf32> to vector<32x8xf32>
    %277 = arith.addf %273, %276 : vector<32x8xf32>
    %c4_179 = arith.constant 4 : index
    %c0_180 = arith.constant 0 : index
    %c0_181 = arith.constant 0 : index
    %278 = vector.load %arg7[%c4_179, %c0_180, %c0_181] : memref<8x32x8xbf16, #tpu.memory_space<vmem>>, vector<1x32x8xbf16>
    %279 = vector.shape_cast %278 : vector<1x32x8xbf16> to vector<32x8xbf16>
    %cst_182 = arith.constant dense<0.000000e+00> : vector<32x8xf32>
    %280 = tpu.matmul %270, %279, %cst_182 {dimension_numbers = #tpu.dot_dimension_numbers<[1], [0], [0], [1], [0, 0, 1, 1], [], []>} : vector<32x32xbf16>, vector<32x8xbf16>, vector<32x8xf32> -> vector<32x8xf32>
    %c4_183 = arith.constant 4 : index
    %c0_184 = arith.constant 0 : index
    %c0_185 = arith.constant 0 : index
    %281 = vector.load %arg10[%c4_183, %c0_184, %c0_185] : memref<8x1x8xf32, #tpu.memory_space<vmem>>, vector<1x1x8xf32>
    %282 = vector.shape_cast %281 : vector<1x1x8xf32> to vector<1x8xf32>
    %283 = vector.broadcast %282 : vector<1x8xf32> to vector<32x8xf32>
    %284 = arith.addf %280, %283 : vector<32x8xf32>
    %c4_186 = arith.constant 4 : index
    %c0_187 = arith.constant 0 : index
    %c0_188 = arith.constant 0 : index
    %285 = vector.load %arg8[%c4_186, %c0_187, %c0_188] : memref<8x32x8xbf16, #tpu.memory_space<vmem>>, vector<1x32x8xbf16>
    %286 = vector.shape_cast %285 : vector<1x32x8xbf16> to vector<32x8xbf16>
    %cst_189 = arith.constant dense<0.000000e+00> : vector<32x8xf32>
    %287 = tpu.matmul %270, %286, %cst_189 {dimension_numbers = #tpu.dot_dimension_numbers<[1], [0], [0], [1], [0, 0, 1, 1], [], []>} : vector<32x32xbf16>, vector<32x8xbf16>, vector<32x8xf32> -> vector<32x8xf32>
    %c4_190 = arith.constant 4 : index
    %c0_191 = arith.constant 0 : index
    %c0_192 = arith.constant 0 : index
    %288 = vector.load %arg11[%c4_190, %c0_191, %c0_192] : memref<8x1x8xf32, #tpu.memory_space<vmem>>, vector<1x1x8xf32>
    %289 = vector.shape_cast %288 : vector<1x1x8xf32> to vector<1x8xf32>
    %290 = vector.broadcast %289 : vector<1x8xf32> to vector<32x8xf32>
    %291 = arith.addf %287, %290 : vector<32x8xf32>
    %cst_193 = arith.constant dense<0.000000e+00> : vector<32x32xf32>
    %292 = tpu.matmul %277, %284, %cst_193 {dimension_numbers = #tpu.dot_dimension_numbers<[1], [1], [0], [0], [0, 0, 1, 0], [], []>} : vector<32x8xf32>, vector<32x8xf32>, vector<32x32xf32> -> vector<32x32xf32>
    %293 = arith.addf %292, %0 : vector<32x32xf32>
    %cst_194 = arith.constant dense<0xFF800000> : vector<32xf32>
    %294 = vector.multi_reduction <maximumf>, %293, %cst_194 [1] : vector<32x32xf32> to vector<32xf32>
    %295 = vector.shape_cast %294 : vector<32xf32> to vector<32x1xf32>
    %296 = vector.broadcast %295 : vector<32x1xf32> to vector<32x32xf32>
    %297 = arith.subf %293, %296 : vector<32x32xf32>
    %298 = math.exp %297 : vector<32x32xf32>
    %cst_195 = arith.constant dense<0.000000e+00> : vector<32xf32>
    %299 = vector.multi_reduction <add>, %298, %cst_195 [1] : vector<32x32xf32> to vector<32xf32>
    %300 = vector.shape_cast %299 : vector<32xf32> to vector<32x1xf32>
    %301 = tpu.reciprocal %300 {approx = true} : vector<32x1xf32> -> vector<32x1xf32>
    %302 = vector.broadcast %301 : vector<32x1xf32> to vector<32x32xf32>
    %303 = arith.mulf %298, %302 : vector<32x32xf32>
    %cst_196 = arith.constant dense<0.000000e+00> : vector<32x8xf32>
    %304 = tpu.matmul %303, %291, %cst_196 {dimension_numbers = #tpu.dot_dimension_numbers<[1], [0], [0], [1], [0, 0, 1, 1], [], []>} : vector<32x32xf32>, vector<32x8xf32>, vector<32x8xf32> -> vector<32x8xf32>
    %305 = arith.truncf %304 : vector<32x8xf32> to vector<32x8xbf16>
    %c4_197 = arith.constant 4 : index
    %c0_198 = arith.constant 0 : index
    %c0_199 = arith.constant 0 : index
    %306 = vector.load %arg12[%c4_197, %c0_198, %c0_199] : memref<8x8x32xbf16, #tpu.memory_space<vmem>>, vector<1x8x32xbf16>
    %307 = vector.shape_cast %306 : vector<1x8x32xbf16> to vector<8x32xbf16>
    %cst_200 = arith.constant dense<0.000000e+00> : vector<32x32xf32>
    %308 = tpu.matmul %305, %307, %cst_200 {dimension_numbers = #tpu.dot_dimension_numbers<[1], [0], [0], [1], [0, 0, 1, 1], [], []>} : vector<32x8xbf16>, vector<8x32xbf16>, vector<32x32xf32> -> vector<32x32xf32>
    %c5 = arith.constant 5 : index
    %c0_201 = arith.constant 0 : index
    %c0_202 = arith.constant 0 : index
    %309 = vector.load %arg6[%c5, %c0_201, %c0_202] : memref<8x32x8xbf16, #tpu.memory_space<vmem>>, vector<1x32x8xbf16>
    %310 = vector.shape_cast %309 : vector<1x32x8xbf16> to vector<32x8xbf16>
    %cst_203 = arith.constant dense<0.000000e+00> : vector<32x8xf32>
    %311 = tpu.matmul %270, %310, %cst_203 {dimension_numbers = #tpu.dot_dimension_numbers<[1], [0], [0], [1], [0, 0, 1, 1], [], []>} : vector<32x32xbf16>, vector<32x8xbf16>, vector<32x8xf32> -> vector<32x8xf32>
    %c5_204 = arith.constant 5 : index
    %c0_205 = arith.constant 0 : index
    %c0_206 = arith.constant 0 : index
    %312 = vector.load %arg9[%c5_204, %c0_205, %c0_206] : memref<8x1x8xf32, #tpu.memory_space<vmem>>, vector<1x1x8xf32>
    %313 = vector.shape_cast %312 : vector<1x1x8xf32> to vector<1x8xf32>
    %314 = vector.broadcast %313 : vector<1x8xf32> to vector<32x8xf32>
    %315 = arith.addf %311, %314 : vector<32x8xf32>
    %c5_207 = arith.constant 5 : index
    %c0_208 = arith.constant 0 : index
    %c0_209 = arith.constant 0 : index
    %316 = vector.load %arg7[%c5_207, %c0_208, %c0_209] : memref<8x32x8xbf16, #tpu.memory_space<vmem>>, vector<1x32x8xbf16>
    %317 = vector.shape_cast %316 : vector<1x32x8xbf16> to vector<32x8xbf16>
    %cst_210 = arith.constant dense<0.000000e+00> : vector<32x8xf32>
    %318 = tpu.matmul %270, %317, %cst_210 {dimension_numbers = #tpu.dot_dimension_numbers<[1], [0], [0], [1], [0, 0, 1, 1], [], []>} : vector<32x32xbf16>, vector<32x8xbf16>, vector<32x8xf32> -> vector<32x8xf32>
    %c5_211 = arith.constant 5 : index
    %c0_212 = arith.constant 0 : index
    %c0_213 = arith.constant 0 : index
    %319 = vector.load %arg10[%c5_211, %c0_212, %c0_213] : memref<8x1x8xf32, #tpu.memory_space<vmem>>, vector<1x1x8xf32>
    %320 = vector.shape_cast %319 : vector<1x1x8xf32> to vector<1x8xf32>
    %321 = vector.broadcast %320 : vector<1x8xf32> to vector<32x8xf32>
    %322 = arith.addf %318, %321 : vector<32x8xf32>
    %c5_214 = arith.constant 5 : index
    %c0_215 = arith.constant 0 : index
    %c0_216 = arith.constant 0 : index
    %323 = vector.load %arg8[%c5_214, %c0_215, %c0_216] : memref<8x32x8xbf16, #tpu.memory_space<vmem>>, vector<1x32x8xbf16>
    %324 = vector.shape_cast %323 : vector<1x32x8xbf16> to vector<32x8xbf16>
    %cst_217 = arith.constant dense<0.000000e+00> : vector<32x8xf32>
    %325 = tpu.matmul %270, %324, %cst_217 {dimension_numbers = #tpu.dot_dimension_numbers<[1], [0], [0], [1], [0, 0, 1, 1], [], []>} : vector<32x32xbf16>, vector<32x8xbf16>, vector<32x8xf32> -> vector<32x8xf32>
    %c5_218 = arith.constant 5 : index
    %c0_219 = arith.constant 0 : index
    %c0_220 = arith.constant 0 : index
    %326 = vector.load %arg11[%c5_218, %c0_219, %c0_220] : memref<8x1x8xf32, #tpu.memory_space<vmem>>, vector<1x1x8xf32>
    %327 = vector.shape_cast %326 : vector<1x1x8xf32> to vector<1x8xf32>
    %328 = vector.broadcast %327 : vector<1x8xf32> to vector<32x8xf32>
    %329 = arith.addf %325, %328 : vector<32x8xf32>
    %cst_221 = arith.constant dense<0.000000e+00> : vector<32x32xf32>
    %330 = tpu.matmul %315, %322, %cst_221 {dimension_numbers = #tpu.dot_dimension_numbers<[1], [1], [0], [0], [0, 0, 1, 0], [], []>} : vector<32x8xf32>, vector<32x8xf32>, vector<32x32xf32> -> vector<32x32xf32>
    %331 = arith.addf %330, %0 : vector<32x32xf32>
    %cst_222 = arith.constant dense<0xFF800000> : vector<32xf32>
    %332 = vector.multi_reduction <maximumf>, %331, %cst_222 [1] : vector<32x32xf32> to vector<32xf32>
    %333 = vector.shape_cast %332 : vector<32xf32> to vector<32x1xf32>
    %334 = vector.broadcast %333 : vector<32x1xf32> to vector<32x32xf32>
    %335 = arith.subf %331, %334 : vector<32x32xf32>
    %336 = math.exp %335 : vector<32x32xf32>
    %cst_223 = arith.constant dense<0.000000e+00> : vector<32xf32>
    %337 = vector.multi_reduction <add>, %336, %cst_223 [1] : vector<32x32xf32> to vector<32xf32>
    %338 = vector.shape_cast %337 : vector<32xf32> to vector<32x1xf32>
    %339 = tpu.reciprocal %338 {approx = true} : vector<32x1xf32> -> vector<32x1xf32>
    %340 = vector.broadcast %339 : vector<32x1xf32> to vector<32x32xf32>
    %341 = arith.mulf %336, %340 : vector<32x32xf32>
    %cst_224 = arith.constant dense<0.000000e+00> : vector<32x8xf32>
    %342 = tpu.matmul %341, %329, %cst_224 {dimension_numbers = #tpu.dot_dimension_numbers<[1], [0], [0], [1], [0, 0, 1, 1], [], []>} : vector<32x32xf32>, vector<32x8xf32>, vector<32x8xf32> -> vector<32x8xf32>
    %343 = arith.truncf %342 : vector<32x8xf32> to vector<32x8xbf16>
    %c5_225 = arith.constant 5 : index
    %c0_226 = arith.constant 0 : index
    %c0_227 = arith.constant 0 : index
    %344 = vector.load %arg12[%c5_225, %c0_226, %c0_227] : memref<8x8x32xbf16, #tpu.memory_space<vmem>>, vector<1x8x32xbf16>
    %345 = vector.shape_cast %344 : vector<1x8x32xbf16> to vector<8x32xbf16>
    %cst_228 = arith.constant dense<0.000000e+00> : vector<32x32xf32>
    %346 = tpu.matmul %343, %345, %cst_228 {dimension_numbers = #tpu.dot_dimension_numbers<[1], [0], [0], [1], [0, 0, 1, 1], [], []>} : vector<32x8xbf16>, vector<8x32xbf16>, vector<32x32xf32> -> vector<32x32xf32>
    %347 = arith.addf %308, %346 : vector<32x32xf32>
    %c6 = arith.constant 6 : index
    %c0_229 = arith.constant 0 : index
    %c0_230 = arith.constant 0 : index
    %348 = vector.load %arg6[%c6, %c0_229, %c0_230] : memref<8x32x8xbf16, #tpu.memory_space<vmem>>, vector<1x32x8xbf16>
    %349 = vector.shape_cast %348 : vector<1x32x8xbf16> to vector<32x8xbf16>
    %cst_231 = arith.constant dense<0.000000e+00> : vector<32x8xf32>
    %350 = tpu.matmul %270, %349, %cst_231 {dimension_numbers = #tpu.dot_dimension_numbers<[1], [0], [0], [1], [0, 0, 1, 1], [], []>} : vector<32x32xbf16>, vector<32x8xbf16>, vector<32x8xf32> -> vector<32x8xf32>
    %c6_232 = arith.constant 6 : index
    %c0_233 = arith.constant 0 : index
    %c0_234 = arith.constant 0 : index
    %351 = vector.load %arg9[%c6_232, %c0_233, %c0_234] : memref<8x1x8xf32, #tpu.memory_space<vmem>>, vector<1x1x8xf32>
    %352 = vector.shape_cast %351 : vector<1x1x8xf32> to vector<1x8xf32>
    %353 = vector.broadcast %352 : vector<1x8xf32> to vector<32x8xf32>
    %354 = arith.addf %350, %353 : vector<32x8xf32>
    %c6_235 = arith.constant 6 : index
    %c0_236 = arith.constant 0 : index
    %c0_237 = arith.constant 0 : index
    %355 = vector.load %arg7[%c6_235, %c0_236, %c0_237] : memref<8x32x8xbf16, #tpu.memory_space<vmem>>, vector<1x32x8xbf16>
    %356 = vector.shape_cast %355 : vector<1x32x8xbf16> to vector<32x8xbf16>
    %cst_238 = arith.constant dense<0.000000e+00> : vector<32x8xf32>
    %357 = tpu.matmul %270, %356, %cst_238 {dimension_numbers = #tpu.dot_dimension_numbers<[1], [0], [0], [1], [0, 0, 1, 1], [], []>} : vector<32x32xbf16>, vector<32x8xbf16>, vector<32x8xf32> -> vector<32x8xf32>
    %c6_239 = arith.constant 6 : index
    %c0_240 = arith.constant 0 : index
    %c0_241 = arith.constant 0 : index
    %358 = vector.load %arg10[%c6_239, %c0_240, %c0_241] : memref<8x1x8xf32, #tpu.memory_space<vmem>>, vector<1x1x8xf32>
    %359 = vector.shape_cast %358 : vector<1x1x8xf32> to vector<1x8xf32>
    %360 = vector.broadcast %359 : vector<1x8xf32> to vector<32x8xf32>
    %361 = arith.addf %357, %360 : vector<32x8xf32>
    %c6_242 = arith.constant 6 : index
    %c0_243 = arith.constant 0 : index
    %c0_244 = arith.constant 0 : index
    %362 = vector.load %arg8[%c6_242, %c0_243, %c0_244] : memref<8x32x8xbf16, #tpu.memory_space<vmem>>, vector<1x32x8xbf16>
    %363 = vector.shape_cast %362 : vector<1x32x8xbf16> to vector<32x8xbf16>
    %cst_245 = arith.constant dense<0.000000e+00> : vector<32x8xf32>
    %364 = tpu.matmul %270, %363, %cst_245 {dimension_numbers = #tpu.dot_dimension_numbers<[1], [0], [0], [1], [0, 0, 1, 1], [], []>} : vector<32x32xbf16>, vector<32x8xbf16>, vector<32x8xf32> -> vector<32x8xf32>
    %c6_246 = arith.constant 6 : index
    %c0_247 = arith.constant 0 : index
    %c0_248 = arith.constant 0 : index
    %365 = vector.load %arg11[%c6_246, %c0_247, %c0_248] : memref<8x1x8xf32, #tpu.memory_space<vmem>>, vector<1x1x8xf32>
    %366 = vector.shape_cast %365 : vector<1x1x8xf32> to vector<1x8xf32>
    %367 = vector.broadcast %366 : vector<1x8xf32> to vector<32x8xf32>
    %368 = arith.addf %364, %367 : vector<32x8xf32>
    %cst_249 = arith.constant dense<0.000000e+00> : vector<32x32xf32>
    %369 = tpu.matmul %354, %361, %cst_249 {dimension_numbers = #tpu.dot_dimension_numbers<[1], [1], [0], [0], [0, 0, 1, 0], [], []>} : vector<32x8xf32>, vector<32x8xf32>, vector<32x32xf32> -> vector<32x32xf32>
    %370 = arith.addf %369, %0 : vector<32x32xf32>
    %cst_250 = arith.constant dense<0xFF800000> : vector<32xf32>
    %371 = vector.multi_reduction <maximumf>, %370, %cst_250 [1] : vector<32x32xf32> to vector<32xf32>
    %372 = vector.shape_cast %371 : vector<32xf32> to vector<32x1xf32>
    %373 = vector.broadcast %372 : vector<32x1xf32> to vector<32x32xf32>
    %374 = arith.subf %370, %373 : vector<32x32xf32>
    %375 = math.exp %374 : vector<32x32xf32>
    %cst_251 = arith.constant dense<0.000000e+00> : vector<32xf32>
    %376 = vector.multi_reduction <add>, %375, %cst_251 [1] : vector<32x32xf32> to vector<32xf32>
    %377 = vector.shape_cast %376 : vector<32xf32> to vector<32x1xf32>
    %378 = tpu.reciprocal %377 {approx = true} : vector<32x1xf32> -> vector<32x1xf32>
    %379 = vector.broadcast %378 : vector<32x1xf32> to vector<32x32xf32>
    %380 = arith.mulf %375, %379 : vector<32x32xf32>
    %cst_252 = arith.constant dense<0.000000e+00> : vector<32x8xf32>
    %381 = tpu.matmul %380, %368, %cst_252 {dimension_numbers = #tpu.dot_dimension_numbers<[1], [0], [0], [1], [0, 0, 1, 1], [], []>} : vector<32x32xf32>, vector<32x8xf32>, vector<32x8xf32> -> vector<32x8xf32>
    %382 = arith.truncf %381 : vector<32x8xf32> to vector<32x8xbf16>
    %c6_253 = arith.constant 6 : index
    %c0_254 = arith.constant 0 : index
    %c0_255 = arith.constant 0 : index
    %383 = vector.load %arg12[%c6_253, %c0_254, %c0_255] : memref<8x8x32xbf16, #tpu.memory_space<vmem>>, vector<1x8x32xbf16>
    %384 = vector.shape_cast %383 : vector<1x8x32xbf16> to vector<8x32xbf16>
    %cst_256 = arith.constant dense<0.000000e+00> : vector<32x32xf32>
    %385 = tpu.matmul %382, %384, %cst_256 {dimension_numbers = #tpu.dot_dimension_numbers<[1], [0], [0], [1], [0, 0, 1, 1], [], []>} : vector<32x8xbf16>, vector<8x32xbf16>, vector<32x32xf32> -> vector<32x32xf32>
    %386 = arith.addf %347, %385 : vector<32x32xf32>
    %c7 = arith.constant 7 : index
    %c0_257 = arith.constant 0 : index
    %c0_258 = arith.constant 0 : index
    %387 = vector.load %arg6[%c7, %c0_257, %c0_258] : memref<8x32x8xbf16, #tpu.memory_space<vmem>>, vector<1x32x8xbf16>
    %388 = vector.shape_cast %387 : vector<1x32x8xbf16> to vector<32x8xbf16>
    %cst_259 = arith.constant dense<0.000000e+00> : vector<32x8xf32>
    %389 = tpu.matmul %270, %388, %cst_259 {dimension_numbers = #tpu.dot_dimension_numbers<[1], [0], [0], [1], [0, 0, 1, 1], [], []>} : vector<32x32xbf16>, vector<32x8xbf16>, vector<32x8xf32> -> vector<32x8xf32>
    %c7_260 = arith.constant 7 : index
    %c0_261 = arith.constant 0 : index
    %c0_262 = arith.constant 0 : index
    %390 = vector.load %arg9[%c7_260, %c0_261, %c0_262] : memref<8x1x8xf32, #tpu.memory_space<vmem>>, vector<1x1x8xf32>
    %391 = vector.shape_cast %390 : vector<1x1x8xf32> to vector<1x8xf32>
    %392 = vector.broadcast %391 : vector<1x8xf32> to vector<32x8xf32>
    %393 = arith.addf %389, %392 : vector<32x8xf32>
    %c7_263 = arith.constant 7 : index
    %c0_264 = arith.constant 0 : index
    %c0_265 = arith.constant 0 : index
    %394 = vector.load %arg7[%c7_263, %c0_264, %c0_265] : memref<8x32x8xbf16, #tpu.memory_space<vmem>>, vector<1x32x8xbf16>
    %395 = vector.shape_cast %394 : vector<1x32x8xbf16> to vector<32x8xbf16>
    %cst_266 = arith.constant dense<0.000000e+00> : vector<32x8xf32>
    %396 = tpu.matmul %270, %395, %cst_266 {dimension_numbers = #tpu.dot_dimension_numbers<[1], [0], [0], [1], [0, 0, 1, 1], [], []>} : vector<32x32xbf16>, vector<32x8xbf16>, vector<32x8xf32> -> vector<32x8xf32>
    %c7_267 = arith.constant 7 : index
    %c0_268 = arith.constant 0 : index
    %c0_269 = arith.constant 0 : index
    %397 = vector.load %arg10[%c7_267, %c0_268, %c0_269] : memref<8x1x8xf32, #tpu.memory_space<vmem>>, vector<1x1x8xf32>
    %398 = vector.shape_cast %397 : vector<1x1x8xf32> to vector<1x8xf32>
    %399 = vector.broadcast %398 : vector<1x8xf32> to vector<32x8xf32>
    %400 = arith.addf %396, %399 : vector<32x8xf32>
    %c7_270 = arith.constant 7 : index
    %c0_271 = arith.constant 0 : index
    %c0_272 = arith.constant 0 : index
    %401 = vector.load %arg8[%c7_270, %c0_271, %c0_272] : memref<8x32x8xbf16, #tpu.memory_space<vmem>>, vector<1x32x8xbf16>
    %402 = vector.shape_cast %401 : vector<1x32x8xbf16> to vector<32x8xbf16>
    %cst_273 = arith.constant dense<0.000000e+00> : vector<32x8xf32>
    %403 = tpu.matmul %270, %402, %cst_273 {dimension_numbers = #tpu.dot_dimension_numbers<[1], [0], [0], [1], [0, 0, 1, 1], [], []>} : vector<32x32xbf16>, vector<32x8xbf16>, vector<32x8xf32> -> vector<32x8xf32>
    %c7_274 = arith.constant 7 : index
    %c0_275 = arith.constant 0 : index
    %c0_276 = arith.constant 0 : index
    %404 = vector.load %arg11[%c7_274, %c0_275, %c0_276] : memref<8x1x8xf32, #tpu.memory_space<vmem>>, vector<1x1x8xf32>
    %405 = vector.shape_cast %404 : vector<1x1x8xf32> to vector<1x8xf32>
    %406 = vector.broadcast %405 : vector<1x8xf32> to vector<32x8xf32>
    %407 = arith.addf %403, %406 : vector<32x8xf32>
    %cst_277 = arith.constant dense<0.000000e+00> : vector<32x32xf32>
    %408 = tpu.matmul %393, %400, %cst_277 {dimension_numbers = #tpu.dot_dimension_numbers<[1], [1], [0], [0], [0, 0, 1, 0], [], []>} : vector<32x8xf32>, vector<32x8xf32>, vector<32x32xf32> -> vector<32x32xf32>
    %409 = arith.addf %408, %0 : vector<32x32xf32>
    %cst_278 = arith.constant dense<0xFF800000> : vector<32xf32>
    %410 = vector.multi_reduction <maximumf>, %409, %cst_278 [1] : vector<32x32xf32> to vector<32xf32>
    %411 = vector.shape_cast %410 : vector<32xf32> to vector<32x1xf32>
    %412 = vector.broadcast %411 : vector<32x1xf32> to vector<32x32xf32>
    %413 = arith.subf %409, %412 : vector<32x32xf32>
    %414 = math.exp %413 : vector<32x32xf32>
    %cst_279 = arith.constant dense<0.000000e+00> : vector<32xf32>
    %415 = vector.multi_reduction <add>, %414, %cst_279 [1] : vector<32x32xf32> to vector<32xf32>
    %416 = vector.shape_cast %415 : vector<32xf32> to vector<32x1xf32>
    %417 = tpu.reciprocal %416 {approx = true} : vector<32x1xf32> -> vector<32x1xf32>
    %418 = vector.broadcast %417 : vector<32x1xf32> to vector<32x32xf32>
    %419 = arith.mulf %414, %418 : vector<32x32xf32>
    %cst_280 = arith.constant dense<0.000000e+00> : vector<32x8xf32>
    %420 = tpu.matmul %419, %407, %cst_280 {dimension_numbers = #tpu.dot_dimension_numbers<[1], [0], [0], [1], [0, 0, 1, 1], [], []>} : vector<32x32xf32>, vector<32x8xf32>, vector<32x8xf32> -> vector<32x8xf32>
    %421 = arith.truncf %420 : vector<32x8xf32> to vector<32x8xbf16>
    %c7_281 = arith.constant 7 : index
    %c0_282 = arith.constant 0 : index
    %c0_283 = arith.constant 0 : index
    %422 = vector.load %arg12[%c7_281, %c0_282, %c0_283] : memref<8x8x32xbf16, #tpu.memory_space<vmem>>, vector<1x8x32xbf16>
    %423 = vector.shape_cast %422 : vector<1x8x32xbf16> to vector<8x32xbf16>
    %cst_284 = arith.constant dense<0.000000e+00> : vector<32x32xf32>
    %424 = tpu.matmul %421, %423, %cst_284 {dimension_numbers = #tpu.dot_dimension_numbers<[1], [0], [0], [1], [0, 0, 1, 1], [], []>} : vector<32x8xbf16>, vector<8x32xbf16>, vector<32x32xf32> -> vector<32x32xf32>
    %425 = arith.addf %386, %424 : vector<32x32xf32>
    %426 = arith.addf %243, %425 : vector<32x32xf32>
    %c1_285 = arith.constant 1 : index
    %c0_286 = arith.constant 0 : index
    %c0_287 = arith.constant 0 : index
    %427 = vector.load %arg13[%c1_285, %c0_286, %c0_287] : memref<2x1x32xf32, #tpu.memory_space<vmem>>, vector<1x1x32xf32>
    %428 = vector.shape_cast %427 : vector<1x1x32xf32> to vector<1x32xf32>
    %429 = vector.broadcast %428 : vector<1x32xf32> to vector<32x32xf32>
    %430 = arith.addf %426, %429 : vector<32x32xf32>
    %c1_288 = arith.constant 1 : index
    %c0_289 = arith.constant 0 : index
    %c0_290 = arith.constant 0 : index
    %431 = vector.load %arg14[%c1_288, %c0_289, %c0_290] : memref<2x1x32xf32, #tpu.memory_space<vmem>>, vector<1x1x32xf32>
    %432 = vector.shape_cast %431 : vector<1x1x32xf32> to vector<1x32xf32>
    %c1_291 = arith.constant 1 : index
    %c0_292 = arith.constant 0 : index
    %c0_293 = arith.constant 0 : index
    %433 = vector.load %arg15[%c1_291, %c0_292, %c0_293] : memref<2x1x32xf32, #tpu.memory_space<vmem>>, vector<1x1x32xf32>
    %434 = vector.shape_cast %433 : vector<1x1x32xf32> to vector<1x32xf32>
    %cst_294 = arith.constant dense<0.000000e+00> : vector<32xf32>
    %435 = vector.multi_reduction <add>, %430, %cst_294 [1] : vector<32x32xf32> to vector<32xf32>
    %436 = vector.shape_cast %435 : vector<32xf32> to vector<32x1xf32>
    %cst_295 = arith.constant 3.200000e+01 : f32
    %437 = vector.broadcast %cst_295 : f32 to vector<32x1xf32>
    %438 = arith.divf %436, %437 : vector<32x1xf32>
    %439 = vector.broadcast %438 : vector<32x1xf32> to vector<32x32xf32>
    %440 = arith.subf %430, %439 : vector<32x32xf32>
    %441 = arith.mulf %440, %440 : vector<32x32xf32>
    %cst_296 = arith.constant dense<0.000000e+00> : vector<32xf32>
    %442 = vector.multi_reduction <add>, %441, %cst_296 [1] : vector<32x32xf32> to vector<32xf32>
    %443 = vector.shape_cast %442 : vector<32xf32> to vector<32x1xf32>
    %cst_297 = arith.constant 3.200000e+01 : f32
    %444 = vector.broadcast %cst_297 : f32 to vector<32x1xf32>
    %445 = arith.divf %443, %444 : vector<32x1xf32>
    %446 = vector.broadcast %438 : vector<32x1xf32> to vector<32x32xf32>
    %447 = arith.subf %430, %446 : vector<32x32xf32>
    %cst_298 = arith.constant 9.99999974E-6 : f32
    %448 = vector.broadcast %cst_298 : f32 to vector<32x1xf32>
    %449 = arith.addf %445, %448 : vector<32x1xf32>
    %450 = math.rsqrt %449 : vector<32x1xf32>
    %451 = vector.broadcast %450 : vector<32x1xf32> to vector<32x32xf32>
    %452 = arith.mulf %447, %451 : vector<32x32xf32>
    %453 = vector.broadcast %432 : vector<1x32xf32> to vector<32x32xf32>
    %454 = arith.mulf %452, %453 : vector<32x32xf32>
    %455 = vector.broadcast %434 : vector<1x32xf32> to vector<32x32xf32>
    %456 = arith.addf %454, %455 : vector<32x32xf32>
    %457 = arith.truncf %456 : vector<32x32xf32> to vector<32x32xbf16>
    %c1_299 = arith.constant 1 : index
    %c0_300 = arith.constant 0 : index
    %c0_301 = arith.constant 0 : index
    %458 = vector.load %arg16[%c1_299, %c0_300, %c0_301] : memref<2x32x128xbf16, #tpu.memory_space<vmem>>, vector<1x32x128xbf16>
    %459 = vector.shape_cast %458 : vector<1x32x128xbf16> to vector<32x128xbf16>
    %cst_302 = arith.constant dense<0.000000e+00> : vector<32x128xf32>
    %460 = tpu.matmul %457, %459, %cst_302 {dimension_numbers = #tpu.dot_dimension_numbers<[1], [0], [0], [1], [0, 0, 1, 1], [], []>} : vector<32x32xbf16>, vector<32x128xbf16>, vector<32x128xf32> -> vector<32x128xf32>
    %c1_303 = arith.constant 1 : index
    %c0_304 = arith.constant 0 : index
    %c0_305 = arith.constant 0 : index
    %461 = vector.load %arg17[%c1_303, %c0_304, %c0_305] : memref<2x1x128xf32, #tpu.memory_space<vmem>>, vector<1x1x128xf32>
    %462 = vector.shape_cast %461 : vector<1x1x128xf32> to vector<1x128xf32>
    %463 = vector.broadcast %462 : vector<1x128xf32> to vector<32x128xf32>
    %464 = arith.addf %460, %463 : vector<32x128xf32>
    %cst_306 = arith.constant 5.000000e-01 : f32
    %465 = vector.broadcast %cst_306 : f32 to vector<32x128xf32>
    %466 = arith.mulf %465, %464 : vector<32x128xf32>
    %cst_307 = arith.constant 0.707106769 : f32
    %467 = vector.broadcast %cst_307 : f32 to vector<32x128xf32>
    %468 = arith.mulf %464, %467 : vector<32x128xf32>
    %469 = math.erf %468 : vector<32x128xf32>
    %cst_308 = arith.constant 1.000000e+00 : f32
    %470 = vector.broadcast %cst_308 : f32 to vector<32x128xf32>
    %471 = arith.addf %470, %469 : vector<32x128xf32>
    %472 = arith.mulf %466, %471 : vector<32x128xf32>
    %473 = arith.truncf %472 : vector<32x128xf32> to vector<32x128xbf16>
    %c1_309 = arith.constant 1 : index
    %c0_310 = arith.constant 0 : index
    %c0_311 = arith.constant 0 : index
    %474 = vector.load %arg18[%c1_309, %c0_310, %c0_311] : memref<2x128x32xbf16, #tpu.memory_space<vmem>>, vector<1x128x32xbf16>
    %475 = vector.shape_cast %474 : vector<1x128x32xbf16> to vector<128x32xbf16>
    %cst_312 = arith.constant dense<0.000000e+00> : vector<32x32xf32>
    %476 = tpu.matmul %473, %475, %cst_312 {dimension_numbers = #tpu.dot_dimension_numbers<[1], [0], [0], [1], [0, 0, 1, 1], [], []>} : vector<32x128xbf16>, vector<128x32xbf16>, vector<32x32xf32> -> vector<32x32xf32>
    %477 = arith.addf %430, %476 : vector<32x32xf32>
    %c1_313 = arith.constant 1 : index
    %c0_314 = arith.constant 0 : index
    %c0_315 = arith.constant 0 : index
    %478 = vector.load %arg19[%c1_313, %c0_314, %c0_315] : memref<2x1x32xf32, #tpu.memory_space<vmem>>, vector<1x1x32xf32>
    %479 = vector.shape_cast %478 : vector<1x1x32xf32> to vector<1x32xf32>
    %480 = vector.broadcast %479 : vector<1x32xf32> to vector<32x32xf32>
    %481 = arith.addf %477, %480 : vector<32x32xf32>
    %c0_316 = arith.constant 0 : index
    %c0_317 = arith.constant 0 : index
    %482 = vector.load %arg20[%c0_316, %c0_317] : memref<1x32xf32, #tpu.memory_space<vmem>>, vector<1x32xf32>
    %c0_318 = arith.constant 0 : index
    %c0_319 = arith.constant 0 : index
    %483 = vector.load %arg21[%c0_318, %c0_319] : memref<1x32xf32, #tpu.memory_space<vmem>>, vector<1x32xf32>
    %cst_320 = arith.constant dense<0.000000e+00> : vector<32xf32>
    %484 = vector.multi_reduction <add>, %481, %cst_320 [1] : vector<32x32xf32> to vector<32xf32>
    %485 = vector.shape_cast %484 : vector<32xf32> to vector<32x1xf32>
    %cst_321 = arith.constant 3.200000e+01 : f32
    %486 = vector.broadcast %cst_321 : f32 to vector<32x1xf32>
    %487 = arith.divf %485, %486 : vector<32x1xf32>
    %488 = vector.broadcast %487 : vector<32x1xf32> to vector<32x32xf32>
    %489 = arith.subf %481, %488 : vector<32x32xf32>
    %490 = arith.mulf %489, %489 : vector<32x32xf32>
    %cst_322 = arith.constant dense<0.000000e+00> : vector<32xf32>
    %491 = vector.multi_reduction <add>, %490, %cst_322 [1] : vector<32x32xf32> to vector<32xf32>
    %492 = vector.shape_cast %491 : vector<32xf32> to vector<32x1xf32>
    %cst_323 = arith.constant 3.200000e+01 : f32
    %493 = vector.broadcast %cst_323 : f32 to vector<32x1xf32>
    %494 = arith.divf %492, %493 : vector<32x1xf32>
    %495 = vector.broadcast %487 : vector<32x1xf32> to vector<32x32xf32>
    %496 = arith.subf %481, %495 : vector<32x32xf32>
    %cst_324 = arith.constant 9.99999974E-6 : f32
    %497 = vector.broadcast %cst_324 : f32 to vector<32x1xf32>
    %498 = arith.addf %494, %497 : vector<32x1xf32>
    %499 = math.rsqrt %498 : vector<32x1xf32>
    %500 = vector.broadcast %499 : vector<32x1xf32> to vector<32x32xf32>
    %501 = arith.mulf %496, %500 : vector<32x32xf32>
    %502 = vector.broadcast %482 : vector<1x32xf32> to vector<32x32xf32>
    %503 = arith.mulf %501, %502 : vector<32x32xf32>
    %504 = vector.broadcast %483 : vector<1x32xf32> to vector<32x32xf32>
    %505 = arith.addf %503, %504 : vector<32x32xf32>
    %c0_325 = arith.constant 0 : index
    %c0_326 = arith.constant 0 : index
    %506 = vector.load %arg22[%c0_325, %c0_326] : memref<32x32xf32, #tpu.memory_space<vmem>>, vector<32x32xf32>
    tpu.vector_store %arg22[%c0_325, %c0_326], %505 {strides = array<i32>} : memref<32x32xf32, #tpu.memory_space<vmem>>, vector<32x32xf32>,
    return
  }
}

</mosaic_0001>

<bundles_post_ra>
// kernel: tpu_custom_call.1
= control target key start
LH: loop header
LB: loop body
LE: loop exit
PB: predicated region body
PF: predicated region fallthrough
CT: control target
= control target key end

     0   :  { %s7983_s0 = inlined_call_operand.vmem [shape: bf16[32,12], index: 0, kind: input, shape index: {}]   ;;  %s7984_s1 = inlined_call_operand.vmem [shape: bf16[12,32], index: 1, kind: input, shape index: {}]   ;;  %s7985_s2 = inlined_call_operand.vmem [shape: f32[32,32], index: 2, kind: input, shape index: {}]   ;;  %s7986_s3 = inlined_call_operand.vmem [shape: f32[32,32], index: 3, kind: input, shape index: {}]   ;;  %s7987_s4 = inlined_call_operand.vmem [shape: f32[2,1,32], index: 4, kind: input, shape index: {}]   ;;  %s7988_s5 = inlined_call_operand.vmem [shape: f32[2,1,32], index: 5, kind: input, shape index: {}]   ;;  %s7989_s6 = inlined_call_operand.vmem [shape: bf16[8,32,8], index: 6, kind: input, shape index: {}]   ;;  %s7990_s7 = inlined_call_operand.vmem [shape: bf16[8,32,8], index: 7, kind: input, shape index: {}]   ;;  %s7991_s8 = inlined_call_operand.vmem [shape: bf16[8,32,8], index: 8, kind: input, shape index: {}]   ;;  %s7992_s9 = inlined_call_operand.vmem [shape: f32[8,1,8], index: 9, kind: input, shape index: {}]   ;;  %s7993_s10 = inlined_call_operand.vmem [shape: f32[8,1,8], index: 10, kind: input, shape index: {}]   ;;  %s7994_s11 = inlined_call_operand.vmem [shape: f32[8,1,8], index: 11, kind: input, shape index: {}]   ;;  %s7995_s12 = inlined_call_operand.vmem [shape: bf16[8,8,32], index: 12, kind: input, shape index: {}]   ;;  %s7996_s13 = inlined_call_operand.vmem [shape: f32[2,1,32], index: 13, kind: input, shape index: {}]   ;;  %s7997_s14 = inlined_call_operand.vmem [shape: f32[2,1,32], index: 14, kind: input, shape index: {}]   ;;  %s7998_s15 = inlined_call_operand.vmem [shape: f32[2,1,32], index: 15, kind: input, shape index: {}]   ;;  %s7999_s16 = inlined_call_operand.vmem [shape: bf16[2,32,128], index: 16, kind: input, shape index: {}]   ;;  %s8000_s17 = inlined_call_operand.vmem [shape: f32[2,1,128], index: 17, kind: input, shape index: {}]   ;;  %s8001_s18 = inlined_call_operand.vmem [shape: bf16[2,128,32], index: 18, kind: input, shape index: {}]   ;;  %s8002_s19 = inlined_call_operand.vmem [shape: f32[2,1,32], index: 19, kind: input, shape index: {}]   ;;  %s8003_s20 = inlined_call_operand.vmem [shape: f32[1,32], index: 20, kind: input, shape index: {}]   ;;  %s8004_s21 = inlined_call_operand.vmem [shape: f32[1,32], index: 21, kind: input, shape index: {}]   ;;  %s8005_s22 = inlined_call_operand.hbm [shape: f32[32,32], index: 22, kind: output, shape index: {}]  }
   0x1   :  { %8012 = sst [smem:[#allocation5_spill]] %s7983_s0 }
   0x2   :  { %8013 = sst [smem:[#allocation6_spill]] %s7984_s1 }
   0x3   :  { %8014 = sst [smem:[#allocation7_spill]] %s7985_s2 }
   0x4   :  { %8015 = sst [smem:[#allocation8_spill]] %s7986_s3 }
   0x5   :  { %8016 = sst [smem:[#allocation9_spill]] %s7987_s4 }
   0x6   :  { %8017 = sst [smem:[#allocation10_spill]] %s7988_s5 }
   0x7   :  { %8018 = sst [smem:[#allocation11_spill]] %s7989_s6 }
   0x8   :  { %s8019_s29 = sld [smem:[#allocation6_spill]]  ;;  %vm109_vm0 = vcmask 1045504   ;;  %vm102_vm1 = vcmask 97280  }
   0x9   :  { %s8020_s0 = sld [smem:[#allocation5_spill]] }
   0xe   :  { %v6585_v0 = vld [vmem:[%s8019_s29] sm:$0x3f]  }
   0xf   :  { %v6586_v1 = vld [vmem:[%s8020_s0] sm:$0xff]   ;;  %6573 = vmatprep.subr.msk.bf16.mxu0 %vm109_vm0, %v6585_v0  ;;  %v111_v2 = vsel %vm109_vm0, %v6585_v0, 0  ;;  %v6587_v3 = vld [vmem:[%s8020_s0 + $0x8] sm:$0xff]  }
  0x10   :  { %6048 = vmatpush3.bf16.msra.mxu0 %v111_v2  ;;  %6049 = vmatprep.mubr.msk.bf16.mxu0 %vm102_vm1, %v6586_v1 }
  0x13   :  { %6050 = vmatmul.mubr.msk.bf16.vlgmr.msra.gmra.mxu0 %vm102_vm1, %v6587_v3 }
  0x14   :  { %27 = vsyncpa [#allocation3], 0  ;;  %s8021_s6 = sld [smem:[#allocation7_spill]]  ;;  %vm164_vm2 = vcmask 261120   ;;  %v6588_v40 = vld [vmem:[%s7990_s7 + $0x8] sm:$0xff]   ;;  %v6590_v42 = vld [vmem:[%s7990_s7] sm:$0xff]  }
  0x15   :  { %s8022_s23 = sld [smem:[#allocation11_spill]]  ;;  %6061 = vmatprep.subr.bf16.mxu0 %v6588_v40  ;;  %v6592_v44 = vld [vmem:[%s7991_s8 + $0x8] sm:$0xff]   ;;  %vm462_vm3 = vcmask 64512   ;;  %vm1198_vm4 = vcmask 1043456  }
  0x16   :  { %6062 = vmatpush3.bf16.msra.mxu0 %v6588_v40  ;;  %s8023_s3 = sld [smem:[#allocation9_spill]] }
  0x17   :  { %6063 = vmatprep.subr.bf16.mxu0 %v6590_v42  ;;  %s8024_s30 = sld [smem:[#allocation10_spill]] }
  0x18   :  { %s8025_s1 = sld [smem:[#allocation8_spill]] }
  0x1a   :  { %v85_v4 = vld [vmem:[%s8021_s6 + $0x10] sm:$0xff]  ;;  %v83_v6 = vld [vmem:[%s8021_s6] sm:$0xff]  ;;  %v86_v9 = vld [vmem:[%s8021_s6 + $0x18] sm:$0xff]  ;;  %6064 = vmatpush3.bf16.msra.mxu0 %v6590_v42 }
  0x1b   :  { %v84_v13 = vld [vmem:[%s8021_s6 + $0x8] sm:$0xff]  ;;  %v6591_v43 = vld [vmem:[%s8022_s23] sm:$0xff]  }
  0x1c   :  { %v6589_v41 = vld [vmem:[%s8022_s23 + $0x8] sm:$0xff]   ;;  %v5357_v59 = vld [vmem:[%s8023_s3] ss:$0 sm:$0xff] }
  0x1d   :  { %6053 = vmatprep.subr.bf16.mxu1 %v6589_v41  ;;  %v5358_v0 = vld [vmem:[%s8024_s30] ss:$0 sm:$0xff] }
  0x1e   :  { %6054 = vmatpush3.bf16.msra.mxu1 %v6589_v41  ;;  %v6594_v41 = vld [vmem:[%s7990_s7 + $0x18] sm:$0xff]  }
  0x1f   :  { %6055 = vmatprep.subr.bf16.mxu1 %v6591_v43 }
  0x22   :  { %6056 = vmatpush3.bf16.msra.mxu1 %v6591_v43 }
  0x23   :  { %6069 = vmatprep.subr.bf16.mxu1 %v6592_v44 }
  0xd3   :  { %v6051_v5 = vpop.f32.mrf.mxu0 }
  0xd4   :  { %v6999_v7 = vadd.f32 %v6051_v5, %v85_v4 }
  0xd5   :  { %v147_v8 = vpop.f32.mrf.mxu0 }
  0xd6   :  { %v7004_v10 = vadd.f32 %v147_v8, %v83_v6  ;;  %v171_v11 = vsel %vm164_vm2, %v6999_v7, 0.0 }
  0xd7   :  { %172 = vadd.xlane.f32.xlu1 %v171_v11  ;;  %v6052_v12 = vpop.f32.mrf.mxu0 }
  0xd8   :  { %v7011_v14 = vadd.f32 %v6052_v12, %v86_v9  ;;  %v165_v15 = vsel %vm164_vm2, %v7004_v10, 0.0 }
  0xd9   :  { %v150_v16 = vpop.f32.mrf.mxu0  ;;  %166 = vadd.xlane.f32.xlu0 %v165_v15 }
  0xda   :  { %v7015_v17 = vadd.f32 %v150_v16, %v84_v13  ;;  %v174_v18 = vsel %vm164_vm2, %v7011_v14, 0.0  ;;  %v6593_v16 = vld [vmem:[%s7991_s8] sm:$0xff]  }
  0xdb   :  { %175 = vadd.xlane.f32.xlu1 %v174_v18 }
  0xdc   :  { %v168_v19 = vsel %vm164_vm2, %v7015_v17, 0.0 }
  0xdd   :  { %169 = vadd.xlane.f32.xlu0 %v168_v19 }
 0x160   :  { %v173_v20 = vpop.xlane.xlu1 %172 }
 0x161   :  { %v180_v21 = vmul.f32 0.03125, %v173_v20  ;;  %v5359_v20 = vld [vmem:[%s7992_s9] ss:$0 sm:$0xff] }
 0x162   :  { %v167_v22 = vpop.xlane.xlu0 %166 }
 0x163   :  { %v178_v23 = vmul.f32 0.03125, %v167_v22  ;;  %v184_v25 = vsub.f32 %v6999_v7, %v180_v21 }
 0x164   :  { %v176_v24 = vpop.xlane.xlu1 %175 }
 0x165   :  { %v182_v26 = vsub.f32 %v7004_v10, %v178_v23  ;;  %v181_v27 = vmul.f32 0.03125, %v176_v24  ;;  %v188_v34 = vmul.f32 %v184_v25, %v184_v25  ;;  %v5364_v24 = vld [vmem:[%s7993_s10] ss:$0 sm:$0xff] }
 0x166   :  { %v170_v28 = vpop.xlane.xlu0 %169 }
 0x167   :  { %v179_v29 = vmul.f32 0.03125, %v170_v28  ;;  %v186_v30 = vmul.f32 %v182_v26, %v182_v26  ;;  %v185_v31 = vsub.f32 %v7011_v14, %v181_v27  ;;  %v196_v36 = vsel %vm164_vm2, %v188_v34, 0.0  ;;  %v5369_v34 = vld [vmem:[%s7994_s11] ss:$0 sm:$0xff] }
 0x169   :  { %v183_v32 = vsub.f32 %v7015_v17, %v179_v29  ;;  %v190_v33 = vsel %vm164_vm2, %v186_v30, 0.0  ;;  %v189_v38 = vmul.f32 %v185_v31, %v185_v31 }
 0x16a   :  { %191 = vadd.xlane.f32.xlu0 %v190_v33 }
 0x16b   :  { %v187_v35 = vmul.f32 %v183_v32, %v183_v32  ;;  %v199_v39 = vsel %vm164_vm2, %v189_v38, 0.0 }
 0x16d   :  { %v193_v37 = vsel %vm164_vm2, %v187_v35, 0.0 }
 0x16e   :  { %197 = vadd.xlane.f32.xlu0 %v196_v36  ;;  %194 = vadd.xlane.f32.xlu1 %v193_v37 }
 0x172   :  { %200 = vadd.xlane.f32.xlu1 %v199_v39 }
 0x1f3   :  { %v192_v45 = vpop.xlane.xlu0 %191 }
 0x1f4   :  { %v202_v46 = vmul.f32 0.03125, %v192_v45 }
 0x1f6   :  { %v206_v47 = vadd.f32 1e-05, %v202_v46 }
 0x1f7   :  { %v195_v48 = vpop.xlane.xlu1 %194  ;;  %v198_v49 = vpop.xlane.xlu0 %197 }
 0x1f8   :  { %6656 = vrsqrt.f32 %v206_v47  ;;  %v203_v50 = vmul.f32 0.03125, %v195_v48  ;;  %v204_v51 = vmul.f32 0.03125, %v198_v49  ;;  %v7103_v47 = vld [vmem:[%s8025_s1 + $0x8] sm:$0xff]  ;;  %v7108_v49 = vld [vmem:[%s8025_s1] sm:$0xff] }
 0x1fa   :  { %v207_v52 = vadd.f32 1e-05, %v203_v50  ;;  %v208_v53 = vadd.f32 1e-05, %v204_v51 }
 0x1fb   :  { %v201_v54 = vpop.xlane.xlu1 %200 }
 0x1fc   :  { %6658 = vrsqrt.f32 %v207_v52  ;;  %v205_v55 = vmul.f32 0.03125, %v201_v54  ;;  %v7114_v52 = vld [vmem:[%s8025_s1 + $0x18] sm:$0xff] }
 0x1fd   :  { %6660 = vrsqrt.f32 %v208_v53 }
 0x1fe   :  { %v209_v56 = vadd.f32 1e-05, %v205_v55 }
 0x200   :  { %6662 = vrsqrt.f32 %v209_v56  ;;  %v7121_v56 = vld [vmem:[%s8025_s1 + $0x10] sm:$0xff] }
 0x205   :  { %v6657_v57 = vpop.eup %6656 }
 0x206   :  { %v214_v58 = vmul.f32 %v6657_v57, %v182_v26 }
 0x208   :  { %v224_v62 = vmul.f32 %v5357_v59, %v214_v58 }
 0x209   :  { %v6659_v60 = vpop.eup %6658 }
 0x20a   :  { %v6661_v61 = vpop.eup %6660  ;;  %v215_v63 = vmul.f32 %v6659_v60, %v183_v32  ;;  %v234_v4 = vadd.f32 %v5358_v0, %v224_v62 }
 0x20b   :  { %v216_v1 = vmul.f32 %v6661_v61, %v184_v25 }
 0x20c   :  { %v225_v2 = vmul.f32 %v5357_v59, %v215_v63 }
 0x20d   :  { %v6663_v3 = vpop.eup %6662  ;;  %v226_v6 = vmul.f32 %v5357_v59, %v216_v1  ;;  %v5401_v1 = vld [vmem:[%s7993_s10 + $0x1] ss:$0 sm:$0xff] }
 0x20e   :  { %v235_v5 = vadd.f32 %v5358_v0, %v225_v2  ;;  %v217_v8 = vmul.f32 %v6663_v3, %v185_v31 }
 0x20f   :  { %v236_v12 = vadd.f32 %v5358_v0, %v226_v6 }
 0x210   :  { %v7050_v9 = vpack.c.bf16 %v235_v5, %v234_v4  ;;  %v227_v11 = vmul.f32 %v5357_v59, %v217_v8 }
 0x212   :  { %v237_v13 = vadd.f32 %v5358_v0, %v227_v11  ;;  %6057 = vmatprep.mubr.msk.bf16.mxu1 %vm164_vm2, %v7050_v9  ;;  %6065 = vmatprep.mubr.msk.bf16.mxu0 %vm164_vm2, %v7050_v9 }
 0x214   :  { %v7056_v15 = vpack.c.bf16 %v237_v13, %v236_v12 }
 0x216   :  { %6058 = vmatmul.mubr.msk.bf16.vlgmr.msra.gmra.mxu1 %vm164_vm2, %v7056_v15  ;;  %6066 = vmatmul.mubr.msk.bf16.vlgmr.msra.gmra.mxu0 %vm164_vm2, %v7056_v15 }
 0x217   :  { %6070 = vmatpush3.bf16.msra.mxu1 %v6592_v44  ;;  %6073 = vmatprep.mubr.msk.bf16.mxu1 %vm164_vm2, %v7050_v9  ;;  %v6595_v44 = vld [vmem:[%s7990_s7 + $0x10] sm:$0xff]  }
 0x218   :  { %6071 = vmatprep.subr.bf16.mxu1 %v6593_v16 }
 0x21b   :  { %6072 = vmatpush3.bf16.msra.mxu1 %v6593_v16 }
 0x21e   :  { %6074 = vmatmul.mubr.msk.bf16.vlgmr.msra.gmra.mxu1 %vm164_vm2, %v7056_v15 }
 0x2d6   :  { %v6059_v18 = vpop.f32.mrf.mxu1  ;;  %v6067_v19 = vpop.f32.mrf.mxu0 }
 0x2d7   :  { %v384_v29 = vadd.f32 %v6067_v19, %v5364_v24  ;;  %v312_v45 = vadd.f32 %v6059_v18, %v5359_v20 }
 0x2d8   :  { %v303_v21 = vpop.f32.mrf.mxu1  ;;  %v375_v22 = vpop.f32.mrf.mxu0 }
 0x2d9   :  { %v304_v23 = vadd.f32 %v5359_v20, %v303_v21  ;;  %v376_v38 = vadd.f32 %v5364_v24, %v375_v22 }
 0x2da   :  { %v6060_v25 = vpop.f32.mrf.mxu1  ;;  %v6068_v26 = vpop.f32.mrf.mxu0 }
 0x2db   :  { %v387_v27 = vadd.f32 %v6068_v26, %v5364_v24  ;;  %6085 = vmatprep.mubr.msk.f32.mxu0 %vm462_vm3, %v304_v23  ;;  %v315_v46 = vadd.f32 %v6060_v25, %v5359_v20 }
 0x2dc   :  { %v306_v28 = vpop.f32.mrf.mxu1  ;;  %v378_v30 = vpop.f32.mrf.mxu0 }
 0x2dd   :  { %6077 = vmatprep.subr.msk.mxu0 %vm462_vm3, %v387_v27  ;;  %v379_v33 = vadd.f32 %v5364_v24, %v378_v30  ;;  %v307_v43 = vadd.f32 %v5359_v20, %v306_v28 }
 0x2de   :  { %v6075_v31 = vpop.f32.mrf.mxu1  ;;  %6078 = vmatpush3.xpose.msk.msra.mxu0 %vm462_vm3, %v387_v27 }
 0x2df   :  { %6079 = vmatprep.subr.msk.mxu0 %vm462_vm3, %v384_v29  ;;  %v456_v39 = vadd.f32 %v6075_v31, %v5369_v34 }
 0x2e0   :  { %v447_v32 = vpop.f32.mrf.mxu1 }
 0x2e1   :  { %v448_v42 = vadd.f32 %v5369_v34, %v447_v32 }
 0x2e2   :  { %v6076_v35 = vpop.f32.mrf.mxu1  ;;  %6080 = vmatpush3.xpose.msk.msra.mxu0 %vm462_vm3, %v384_v29 }
 0x2e3   :  { %v459_v36 = vadd.f32 %v6076_v35, %v5369_v34  ;;  %6081 = vmatprep.subr.msk.mxu0 %vm462_vm3, %v379_v33 }
 0x2e4   :  { %v450_v37 = vpop.f32.mrf.mxu1 }
 0x2e5   :  { %6091 = vmatprep.subr.mxu1 %v459_v36  ;;  %v451_v40 = vadd.f32 %v5369_v34, %v450_v37  ;;  %v6596_v34 = vld [vmem:[%s8022_s23 + $0x18] sm:$0xff]  }
 0x2e6   :  { %6082 = vmatpush3.xpose.msk.msra.mxu0 %vm462_vm3, %v379_v33  ;;  %6092 = vmatpush3.msra.mxu1 %v459_v36 }
 0x2e7   :  { %6083 = vmatprep.subr.msk.mxu0 %vm462_vm3, %v376_v38  ;;  %6093 = vmatprep.subr.mxu1 %v456_v39 }
 0x2e8   :  { %6094 = vmatpush3.msra.mxu1 %v456_v39 }
 0x2e9   :  { %6095 = vmatprep.subr.mxu1 %v451_v40 }
 0x2ea   :  { %6084 = vmatpush3.xpose.msk.msra.mxu0 %vm462_vm3, %v376_v38  ;;  %6096 = vmatpush3.msra.mxu1 %v451_v40 }
 0x2eb   :  { %6097 = vmatprep.subr.mxu1 %v448_v42  ;;  %6113 = vmatprep.subr.bf16.mxu0 %v6594_v41 }
 0x2ec   :  { %6098 = vmatpush3.msra.mxu1 %v448_v42 }
 0x2ed   :  { %6086 = vmatmul.mubr.msk.f32.vlgmr.msra.gmra.mxu0 %vm462_vm3, %v307_v43  ;;  %6105 = vmatprep.subr.bf16.mxu1 %v6596_v34  ;;  %v6597_v43 = vld [vmem:[%s8022_s23 + $0x10] sm:$0xff]  }
 0x2ee   :  { %6088 = vmatprep.mubr.msk.f32.mxu0 %vm462_vm3, %v312_v45  ;;  %6114 = vmatpush3.bf16.msra.mxu0 %v6594_v41 }
 0x2ef   :  { %6115 = vmatprep.subr.bf16.mxu0 %v6595_v44 }
 0x2f1   :  { %6089 = vmatmul.mubr.msk.f32.gmra.mxu0 %vm462_vm3, %v315_v46 }
 0x2f2   :  { %6116 = vmatpush3.bf16.msra.mxu0 %v6595_v44  ;;  %6117 = vmatprep.mubr.msk.bf16.mxu0 %vm164_vm2, %v7050_v9 }
 0x2f5   :  { %6118 = vmatmul.mubr.msk.bf16.vlgmr.msra.gmra.mxu0 %vm164_vm2, %v7056_v15 }
 0x3ad   :  { %v6087_v48 = vpop.f32.mrf.mxu0 }
 0x3ae   :  { %v559_v50 = vadd.f32 %v6087_v48, %v7103_v47 }
 0x3af   :  { %v553_v51 = vpop.f32.mrf.mxu0 }
 0x3b0   :  { %v554_v53 = vadd.f32 %v553_v51, %v7108_v49  ;;  %v575_v54 = vsel %vm164_vm2, %v559_v50, -inf  ;;  %v6599_v51 = vld [vmem:[%s7991_s8 + $0x10] sm:$0xff]  }
 0x3b1   :  { %v6090_v55 = vpop.f32.mrf.mxu0  ;;  %576 = vmax.xlane.f32.xlu1 %v575_v54 }
 0x3b2   :  { %v569_v57 = vadd.f32 %v6090_v55, %v7114_v52  ;;  %v572_v58 = vsel %vm164_vm2, %v554_v53, -inf }
 0x3b3   :  { %v563_v59 = vpop.f32.mrf.mxu0  ;;  %573 = vmax.xlane.f32.xlu0 %v572_v58 }
 0x3b4   :  { %v564_v60 = vadd.f32 %v563_v59, %v7121_v56  ;;  %v581_v61 = vsel %vm164_vm2, %v569_v57, -inf }
 0x3b5   :  { %v6119_v62 = vpop.f32.mrf.mxu0  ;;  %582 = vmax.xlane.f32.xlu1 %v581_v61 }
 0x3b6   :  { %v578_v63 = vsel %vm164_vm2, %v564_v60, -inf  ;;  %v858_v4 = vadd.f32 %v6119_v62, %v5401_v1 }
 0x3b7   :  { %v849_v0 = vpop.f32.mrf.mxu0  ;;  %579 = vmax.xlane.f32.xlu0 %v578_v63 }
 0x3b8   :  { %v850_v8 = vadd.f32 %v5401_v1, %v849_v0 }
 0x3b9   :  { %v6120_v2 = vpop.f32.mrf.mxu0 }
 0x3ba   :  { %v861_v3 = vadd.f32 %v6120_v2, %v5401_v1 }
 0x3bb   :  { %v852_v5 = vpop.f32.mrf.mxu0 }
 0x3bc   :  { %6129 = vmatprep.subr.msk.mxu0 %vm462_vm3, %v861_v3  ;;  %v853_v6 = vadd.f32 %v5401_v1, %v852_v5 }
 0x3bd   :  { %6130 = vmatpush3.xpose.msk.msra.mxu0 %vm462_vm3, %v861_v3  ;;  %v6600_v3 = vld [vmem:[%s7990_s7 + $0x28] sm:$0xff]  }
 0x3be   :  { %6131 = vmatprep.subr.msk.mxu0 %vm462_vm3, %v858_v4 }
 0x3c1   :  { %6132 = vmatpush3.xpose.msk.msra.mxu0 %vm462_vm3, %v858_v4 }
 0x3c2   :  { %6133 = vmatprep.subr.msk.mxu0 %vm462_vm3, %v853_v6 }
 0x3c5   :  { %6134 = vmatpush3.xpose.msk.msra.mxu0 %vm462_vm3, %v853_v6 }
 0x3c6   :  { %6135 = vmatprep.subr.msk.mxu0 %vm462_vm3, %v850_v8 }
 0x3c9   :  { %6136 = vmatpush3.xpose.msk.msra.mxu0 %vm462_vm3, %v850_v8 }
 0x43a   :  { %v577_v11 = vpop.xlane.xlu1 %576 }
 0x43b   :  { %v585_v12 = vsub.f32 %v559_v50, %v577_v11  ;;  %v6598_v50 = vld [vmem:[%s7991_s8 + $0x18] sm:$0xff]  }
 0x43c   :  { %v574_v13 = vpop.xlane.xlu0 %573 }
 0x43d   :  { %v590_v16 = vmul.f32 1.442695, %v585_v12  ;;  %v584_v18 = vsub.f32 %v554_v53, %v574_v13  ;;  %v715_v53 = vld [vmem:[%s7995_s12] sm:$0xf] }
 0x43e   :  { %v583_v19 = vpop.xlane.xlu1 %582  ;;  %6575 = vmatprep.subr.msk.bf16.mxu0 %vm1198_vm4, %v715_v53  ;;  %v1258_v2 = vsel %vm1198_vm4, %v715_v53, 0  ;;  %v5411_v12 = vld [vmem:[%s7994_s11 + $0x1] ss:$0 sm:$0xff] }
 0x43f   :  { %6664 = vpow2.f32 %v590_v16  ;;  %v588_v20 = vmul.f32 1.442695, %v584_v18  ;;  %v587_v21 = vsub.f32 %v569_v57, %v583_v19 }
 0x440   :  { %v580_v22 = vpop.xlane.xlu0 %579 }
 0x441   :  { %6666 = vpow2.f32 %v588_v20  ;;  %v594_v23 = vmul.f32 1.442695, %v587_v21  ;;  %v586_v24 = vsub.f32 %v564_v60, %v580_v22  ;;  %v5391_v60 = vld [vmem:[%s7992_s9 + $0x1] ss:$0 sm:$0xff] }
 0x442   :  { %v6601_v21 = vld [vmem:[%s7990_s7 + $0x20] sm:$0xff]  }
 0x443   :  { %6668 = vpow2.f32 %v594_v23  ;;  %v592_v25 = vmul.f32 1.442695, %v586_v24 }
 0x445   :  { %6670 = vpow2.f32 %v592_v25 }
 0x44c   :  { %v6665_v26 = vpop.eup %6664 }
 0x44d   :  { %v599_v27 = vsel %vm164_vm2, %v6665_v26, 0.0 }
 0x44e   :  { %v6667_v28 = vpop.eup %6666  ;;  %600 = vadd.xlane.f32.xlu1 %v599_v27 }
 0x44f   :  { %v596_v29 = vsel %vm164_vm2, %v6667_v28, 0.0 }
 0x450   :  { %v6669_v30 = vpop.eup %6668  ;;  %597 = vadd.xlane.f32.xlu0 %v596_v29 }
 0x451   :  { %v605_v31 = vsel %vm164_vm2, %v6669_v30, 0.0 }
 0x452   :  { %v6671_v32 = vpop.eup %6670  ;;  %606 = vadd.xlane.f32.xlu1 %v605_v31 }
 0x453   :  { %v602_v33 = vsel %vm164_vm2, %v6671_v32, 0.0 }
 0x454   :  { %603 = vadd.xlane.f32.xlu0 %v602_v33 }
 0x4d7   :  { %v601_v35 = vpop.xlane.xlu1 %600 }
 0x4d8   :  { %6672 = vrcp.f32 %v601_v35 }
 0x4d9   :  { %v598_v36 = vpop.xlane.xlu0 %597 }
 0x4da   :  { %6674 = vrcp.f32 %v598_v36 }
 0x4db   :  { %v607_v37 = vpop.xlane.xlu1 %606 }
 0x4dc   :  { %6676 = vrcp.f32 %v607_v37 }
 0x4dd   :  { %v604_v38 = vpop.xlane.xlu0 %603 }
 0x4de   :  { %6678 = vrcp.f32 %v604_v38 }
 0x4e5   :  { %v6673_v39 = vpop.eup %6672 }
 0x4e6   :  { %v613_v42 = vmul.f32 %v6673_v39, %v6665_v26 }
 0x4e7   :  { %v6675_v40 = vpop.eup %6674 }
 0x4e8   :  { %v612_v41 = vmul.f32 %v6675_v40, %v6667_v28 }
 0x4e9   :  { %v6677_v44 = vpop.eup %6676 }
 0x4ea   :  { %6099 = vmatprep.mubr.msk.f32.mxu1 %vm164_vm2, %v612_v41  ;;  %v615_v48 = vmul.f32 %v6677_v44, %v6669_v30 }
 0x4eb   :  { %v6679_v45 = vpop.eup %6678  ;;  %6100 = vmatmul.mubr.msk.f32.vlgmr.msra.gmra.mxu1 %vm164_vm2, %v613_v42  ;;  %v5448_v42 = vld [vmem:[%s7993_s10 + $0x2] ss:$0 sm:$0xff] }
 0x4ec   :  { %6106 = vmatpush3.bf16.msra.mxu1 %v6596_v34  ;;  %v614_v46 = vmul.f32 %v6679_v45, %v6671_v32 }
 0x4ed   :  { %6107 = vmatprep.subr.bf16.mxu1 %v6597_v43 }
 0x4ee   :  { %6102 = vmatprep.mubr.msk.f32.mxu1 %vm164_vm2, %v614_v46 }
 0x4ef   :  { %6103 = vmatmul.mubr.msk.f32.gmra.mxu1 %vm164_vm2, %v615_v48 }
 0x4f0   :  { %6108 = vmatpush3.bf16.msra.mxu1 %v6597_v43  ;;  %6109 = vmatprep.mubr.msk.bf16.mxu1 %vm164_vm2, %v7050_v9 }
 0x4f1   :  { %6121 = vmatprep.subr.bf16.mxu1 %v6598_v50 }
 0x4f3   :  { %6110 = vmatmul.mubr.msk.bf16.vlgmr.msra.gmra.mxu1 %vm164_vm2, %v7056_v15 }
 0x4f4   :  { %6122 = vmatpush3.bf16.msra.mxu1 %v6598_v50  ;;  %6125 = vmatprep.mubr.msk.bf16.mxu1 %vm164_vm2, %v7050_v9 }
 0x4f5   :  { %6123 = vmatprep.subr.bf16.mxu1 %v6599_v51 }
 0x4f8   :  { %6124 = vmatpush3.bf16.msra.mxu1 %v6599_v51 }
 0x4fb   :  { %6126 = vmatmul.mubr.msk.bf16.vlgmr.msra.gmra.mxu1 %vm164_vm2, %v7056_v15 }
 0x5ab   :  { %v6101_v54 = vpop.f32.mrf.mxu1 }
 0x5ad   :  { %v694_v55 = vpop.f32.mrf.mxu1 }
 0x5ae   :  { %v713_v11 = vpack.c.bf16 %v6101_v54, %v694_v55 }
 0x5af   :  { %v6104_v57 = vpop.f32.mrf.mxu1 }
 0x5b1   :  { %v704_v58 = vpop.f32.mrf.mxu1 }
 0x5b2   :  { %v714_v19 = vpack.c.bf16 %v6104_v57, %v704_v58 }
 0x5b3   :  { %v6111_v59 = vpop.f32.mrf.mxu1 }
 0x5b4   :  { %v784_v4 = vadd.f32 %v6111_v59, %v5391_v60 }
 0x5b5   :  { %v775_v61 = vpop.f32.mrf.mxu1 }
 0x5b6   :  { %v776_v62 = vadd.f32 %v5391_v60, %v775_v61 }
 0x5b7   :  { %v6112_v63 = vpop.f32.mrf.mxu1 }
 0x5b8   :  { %6137 = vmatprep.mubr.msk.f32.mxu0 %vm462_vm3, %v776_v62  ;;  %v787_v8 = vadd.f32 %v6112_v63, %v5391_v60 }
 0x5b9   :  { %v778_v0 = vpop.f32.mrf.mxu1 }
 0x5ba   :  { %v779_v1 = vadd.f32 %v5391_v60, %v778_v0 }
 0x5bb   :  { %v6127_v5 = vpop.f32.mrf.mxu1 }
 0x5bc   :  { %6138 = vmatmul.mubr.msk.f32.vlgmr.msra.gmra.mxu0 %vm462_vm3, %v779_v1  ;;  %v932_v20 = vadd.f32 %v6127_v5, %v5411_v12 }
 0x5bd   :  { %v923_v6 = vpop.f32.mrf.mxu1  ;;  %6140 = vmatprep.mubr.msk.f32.mxu0 %vm462_vm3, %v784_v4  ;;  %6164 = vmatpush3.bf16.msra.mxu0 %v1258_v2 }
 0x5be   :  { %6177 = vmatprep.subr.bf16.mxu0 %v6600_v3  ;;  %v924_v23 = vadd.f32 %v5411_v12, %v923_v6 }
 0x5bf   :  { %v6128_v13 = vpop.f32.mrf.mxu1 }
 0x5c0   :  { %v935_v16 = vadd.f32 %v6128_v13, %v5411_v12  ;;  %6141 = vmatmul.mubr.msk.f32.gmra.mxu0 %vm462_vm3, %v787_v8 }
 0x5c1   :  { %v926_v18 = vpop.f32.mrf.mxu1  ;;  %6165 = vmatprep.mubr.msk.bf16.mxu0 %vm462_vm3, %v713_v11 }
 0x5c2   :  { %6143 = vmatprep.subr.mxu1 %v935_v16  ;;  %v927_v22 = vadd.f32 %v5411_v12, %v926_v18 }
 0x5c3   :  { %6144 = vmatpush3.msra.mxu1 %v935_v16 }
 0x5c4   :  { %6145 = vmatprep.subr.mxu1 %v932_v20  ;;  %6166 = vmatmul.mubr.msk.bf16.vlgmr.msra.gmra.mxu0 %vm462_vm3, %v714_v19 }
 0x5c5   :  { %6146 = vmatpush3.msra.mxu1 %v932_v20  ;;  %6178 = vmatpush3.bf16.msra.mxu0 %v6600_v3 }
 0x5c6   :  { %6181 = vmatprep.mubr.msk.bf16.mxu0 %vm164_vm2, %v7050_v9  ;;  %6147 = vmatprep.subr.mxu1 %v927_v22 }
 0x5c7   :  { %6148 = vmatpush3.msra.mxu1 %v927_v22  ;;  %6179 = vmatprep.subr.bf16.mxu0 %v6601_v21 }
 0x5c8   :  { %6149 = vmatprep.subr.mxu1 %v924_v23 }
 0x5c9   :  { %6150 = vmatpush3.msra.mxu1 %v924_v23  ;;  %6180 = vmatpush3.bf16.msra.mxu0 %v6601_v21 }
 0x5cc   :  { %6182 = vmatmul.mubr.msk.bf16.vlgmr.msra.gmra.mxu0 %vm164_vm2, %v7056_v15 }
 0x67c   :  { %v6139_v24 = vpop.f32.mrf.mxu0 }
 0x67d   :  { %v1034_v25 = vadd.f32 %v6139_v24, %v7103_v47 }
 0x67e   :  { %v1028_v26 = vpop.f32.mrf.mxu0 }
 0x67f   :  { %v1029_v27 = vadd.f32 %v1028_v26, %v7108_v49  ;;  %v1050_v28 = vsel %vm164_vm2, %v1034_v25, -inf }
 0x680   :  { %1051 = vmax.xlane.f32.xlu1 %v1050_v28  ;;  %v6142_v29 = vpop.f32.mrf.mxu0 }
 0x681   :  { %v1044_v30 = vadd.f32 %v6142_v29, %v7114_v52  ;;  %v1047_v31 = vsel %vm164_vm2, %v1029_v27, -inf  ;;  %v6602_v29 = vld [vmem:[%s8022_s23 + $0x28] sm:$0xff]  }
 0x682   :  { %v1038_v32 = vpop.f32.mrf.mxu0  ;;  %1048 = vmax.xlane.f32.xlu0 %v1047_v31 }
 0x683   :  { %v1039_v33 = vadd.f32 %v1038_v32, %v7121_v56  ;;  %v1056_v34 = vsel %vm164_vm2, %v1044_v30, -inf }
 0x684   :  { %1057 = vmax.xlane.f32.xlu1 %v1056_v34  ;;  %v7201_v35 = vpop.f32.mrf.mxu0 }
 0x685   :  { %v1053_v36 = vsel %vm164_vm2, %v1039_v33, -inf }
 0x686   :  { %1054 = vmax.xlane.f32.xlu0 %v1053_v36  ;;  %v7204_v37 = vpop.f32.mrf.mxu0 }
 0x688   :  { %v7206_v38 = vpop.f32.mrf.mxu0 }
 0x68a   :  { %v7208_v39 = vpop.f32.mrf.mxu0 }
 0x68c   :  { %v6183_v40 = vpop.f32.mrf.mxu0 }
 0x68d   :  { %v1451_v45 = vadd.f32 %v6183_v40, %v5448_v42  ;;  %v6603_v40 = vld [vmem:[%s8022_s23 + $0x20] sm:$0xff]  }
 0x68e   :  { %v1442_v41 = vpop.f32.mrf.mxu0 }
 0x68f   :  { %v1443_v50 = vadd.f32 %v5448_v42, %v1442_v41  ;;  %v6604_v41 = vld [vmem:[%s7991_s8 + $0x28] sm:$0xff]  }
 0x690   :  { %v6184_v43 = vpop.f32.mrf.mxu0 }
 0x691   :  { %v1454_v44 = vadd.f32 %v6184_v43, %v5448_v42  ;;  %v6606_v43 = vld [vmem:[%s8022_s23 + $0x38] sm:$0xff]  }
 0x692   :  { %v1445_v46 = vpop.f32.mrf.mxu0 }
 0x693   :  { %6193 = vmatprep.subr.msk.mxu0 %vm462_vm3, %v1454_v44  ;;  %v1446_v48 = vadd.f32 %v5448_v42, %v1445_v46  ;;  %v6605_v42 = vld [vmem:[%s7991_s8 + $0x20] sm:$0xff]  }
 0x694   :  { %6194 = vmatpush3.xpose.msk.msra.mxu0 %vm462_vm3, %v1454_v44 }
 0x695   :  { %6195 = vmatprep.subr.msk.mxu0 %vm462_vm3, %v1451_v45 }
 0x698   :  { %6196 = vmatpush3.xpose.msk.msra.mxu0 %vm462_vm3, %v1451_v45 }
 0x699   :  { %6197 = vmatprep.subr.msk.mxu0 %vm462_vm3, %v1446_v48 }
 0x69c   :  { %6198 = vmatpush3.xpose.msk.msra.mxu0 %vm462_vm3, %v1446_v48 }
 0x69d   :  { %6199 = vmatprep.subr.msk.mxu0 %vm462_vm3, %v1443_v50 }
 0x6a0   :  { %6200 = vmatpush3.xpose.msk.msra.mxu0 %vm462_vm3, %v1443_v50 }
 0x6a1   :  { %6227 = vmatprep.subr.bf16.mxu0 %v6606_v43 }
 0x709   :  { %v1052_v51 = vpop.xlane.xlu1 %1051 }
 0x70a   :  { %v1060_v53 = vsub.f32 %v1034_v25, %v1052_v51  ;;  %v5438_v51 = vld [vmem:[%s7992_s9 + $0x2] ss:$0 sm:$0xff] }
 0x70b   :  { %v1049_v54 = vpop.xlane.xlu0 %1048 }
 0x70c   :  { %v1065_v55 = vmul.f32 1.442695, %v1060_v53  ;;  %v1059_v57 = vsub.f32 %v1029_v27, %v1049_v54  ;;  %v5428_v27 = vld [vmem:[%s7995_s12 + $0x4] sm:$0xf] }
 0x70d   :  { %v1058_v58 = vpop.xlane.xlu1 %1057  ;;  %6574 = vmatprep.subr.msk.bf16.mxu1 %vm1198_vm4, %v5428_v27  ;;  %v1200_v28 = vsel %vm1198_vm4, %v5428_v27, 0 }
 0x70e   :  { %6680 = vpow2.f32 %v1065_v55  ;;  %v1063_v59 = vmul.f32 1.442695, %v1059_v57  ;;  %v1062_v60 = vsub.f32 %v1044_v30, %v1058_v58 }
 0x70f   :  { %v1055_v61 = vpop.xlane.xlu0 %1054 }
 0x710   :  { %6682 = vpow2.f32 %v1063_v59  ;;  %v1069_v62 = vmul.f32 1.442695, %v1062_v60  ;;  %v1061_v63 = vsub.f32 %v1039_v33, %v1055_v61  ;;  %v6607_v59 = vld [vmem:[%s8022_s23 + $0x30] sm:$0xff]  }
 0x712   :  { %6684 = vpow2.f32 %v1069_v62  ;;  %v1067_v0 = vmul.f32 1.442695, %v1061_v63 }
 0x714   :  { %6686 = vpow2.f32 %v1067_v0  ;;  %v6608_v0 = vld [vmem:[%s7991_s8 + $0x38] sm:$0xff]  }
 0x71b   :  { %v6681_v1 = vpop.eup %6680 }
 0x71c   :  { %v1074_v2 = vsel %vm164_vm2, %v6681_v1, 0.0 }
 0x71d   :  { %v6683_v3 = vpop.eup %6682  ;;  %1075 = vadd.xlane.f32.xlu1 %v1074_v2 }
 0x71e   :  { %v1071_v4 = vsel %vm164_vm2, %v6683_v3, 0.0 }
 0x71f   :  { %v6685_v5 = vpop.eup %6684  ;;  %1072 = vadd.xlane.f32.xlu0 %v1071_v4 }
 0x720   :  { %v1080_v6 = vsel %vm164_vm2, %v6685_v5, 0.0 }
 0x721   :  { %v6687_v8 = vpop.eup %6686  ;;  %1081 = vadd.xlane.f32.xlu1 %v1080_v6  ;;  %v6609_v6 = vld [vmem:[%s7991_s8 + $0x30] sm:$0xff]  }
 0x722   :  { %v1077_v11 = vsel %vm164_vm2, %v6687_v8, 0.0 }
 0x723   :  { %1078 = vadd.xlane.f32.xlu0 %v1077_v11 }
 0x7a6   :  { %v1076_v12 = vpop.xlane.xlu1 %1075 }
 0x7a7   :  { %6688 = vrcp.f32 %v1076_v12 }
 0x7a8   :  { %v1073_v13 = vpop.xlane.xlu0 %1072 }
 0x7a9   :  { %6690 = vrcp.f32 %v1073_v13 }
 0x7aa   :  { %v1082_v16 = vpop.xlane.xlu1 %1081 }
 0x7ab   :  { %6692 = vrcp.f32 %v1082_v16 }
 0x7ac   :  { %v1079_v18 = vpop.xlane.xlu0 %1078 }
 0x7ad   :  { %6694 = vrcp.f32 %v1079_v18 }
 0x7b4   :  { %v6689_v19 = vpop.eup %6688 }
 0x7b5   :  { %v1088_v22 = vmul.f32 %v6689_v19, %v6681_v1  ;;  %v5458_v1 = vld [vmem:[%s7994_s11 + $0x2] ss:$0 sm:$0xff] }
 0x7b6   :  { %v6691_v20 = vpop.eup %6690 }
 0x7b7   :  { %v1087_v21 = vmul.f32 %v6691_v20, %v6683_v3 }
 0x7b8   :  { %v6693_v23 = vpop.eup %6692 }
 0x7b9   :  { %6151 = vmatprep.mubr.msk.f32.mxu1 %vm164_vm2, %v1087_v21  ;;  %v1090_v26 = vmul.f32 %v6693_v23, %v6685_v5 }
 0x7ba   :  { %v6695_v24 = vpop.eup %6694  ;;  %6152 = vmatmul.mubr.msk.f32.vlgmr.msra.gmra.mxu1 %vm164_vm2, %v1088_v22 }
 0x7bb   :  { %v1089_v25 = vmul.f32 %v6695_v24, %v6687_v8  ;;  %6158 = vmatpush3.bf16.msra.mxu1 %v1200_v28  ;;  %v7302_v24 = vld [vmem:[%s7992_s9 + $0x3] ss:$0 sm:$0xff] }
 0x7bc   :  { %6169 = vmatprep.subr.bf16.mxu1 %v6602_v29 }
 0x7bd   :  { %6154 = vmatprep.mubr.msk.f32.mxu1 %vm164_vm2, %v1089_v25 }
 0x7be   :  { %6155 = vmatmul.mubr.msk.f32.gmra.mxu1 %vm164_vm2, %v1090_v26 }
 0x87a   :  { %v6153_v30 = vpop.f32.mrf.mxu1 }
 0x87c   :  { %v1169_v31 = vpop.f32.mrf.mxu1 }
 0x87d   :  { %v1188_v32 = vpack.c.bf16 %v6153_v30, %v1169_v31 }
 0x87e   :  { %v6156_v33 = vpop.f32.mrf.mxu1 }
 0x87f   :  { %6159 = vmatprep.mubr.msk.bf16.mxu1 %vm462_vm3, %v1188_v32 }
 0x880   :  { %v1179_v34 = vpop.f32.mrf.mxu1 }
 0x881   :  { %v1189_v36 = vpack.c.bf16 %v6156_v33, %v1179_v34 }
 0x883   :  { %6160 = vmatmul.mubr.msk.bf16.vlgmr.msra.gmra.mxu1 %vm462_vm3, %v1189_v36 }
 0x884   :  { %6170 = vmatpush3.bf16.msra.mxu1 %v6602_v29  ;;  %6173 = vmatprep.mubr.msk.bf16.mxu1 %vm164_vm2, %v7050_v9 }
 0x885   :  { %6171 = vmatprep.subr.bf16.mxu1 %v6603_v40 }
 0x888   :  { %6172 = vmatpush3.bf16.msra.mxu1 %v6603_v40 }
 0x889   :  { %6185 = vmatprep.subr.bf16.mxu1 %v6604_v41 }
 0x88b   :  { %6174 = vmatmul.mubr.msk.bf16.vlgmr.msra.gmra.mxu1 %vm164_vm2, %v7056_v15 }
 0x88c   :  { %6186 = vmatpush3.bf16.msra.mxu1 %v6604_v41  ;;  %6189 = vmatprep.mubr.msk.bf16.mxu1 %vm164_vm2, %v7050_v9 }
 0x88d   :  { %6187 = vmatprep.subr.bf16.mxu1 %v6605_v42 }
 0x890   :  { %6188 = vmatpush3.bf16.msra.mxu1 %v6605_v42 }
 0x893   :  { %6190 = vmatmul.mubr.msk.bf16.vlgmr.msra.gmra.mxu1 %vm164_vm2, %v7056_v15 }
 0x943   :  { %v7259_v44 = vpop.f32.mrf.mxu1 }
 0x945   :  { %v7261_v45 = vpop.f32.mrf.mxu1 }
 0x947   :  { %v7263_v46 = vpop.f32.mrf.mxu1 }
 0x949   :  { %v7265_v48 = vpop.f32.mrf.mxu1 }
 0x94b   :  { %v6175_v50 = vpop.f32.mrf.mxu1 }
 0x94c   :  { %v1377_v60 = vadd.f32 %v6175_v50, %v5438_v51 }
 0x94d   :  { %v1368_v53 = vpop.f32.mrf.mxu1 }
 0x94e   :  { %v1369_v54 = vadd.f32 %v5438_v51, %v1368_v53 }
 0x94f   :  { %v6176_v55 = vpop.f32.mrf.mxu1 }
 0x950   :  { %6201 = vmatprep.mubr.msk.f32.mxu0 %vm462_vm3, %v1369_v54  ;;  %v1380_v63 = vadd.f32 %v6176_v55, %v5438_v51 }
 0x951   :  { %v1371_v57 = vpop.f32.mrf.mxu1 }
 0x952   :  { %v1372_v58 = vadd.f32 %v5438_v51, %v1371_v57 }
 0x953   :  { %v6191_v61 = vpop.f32.mrf.mxu1 }
 0x954   :  { %6202 = vmatmul.mubr.msk.f32.vlgmr.msra.gmra.mxu0 %vm462_vm3, %v1372_v58  ;;  %v1525_v5 = vadd.f32 %v6191_v61, %v5458_v1 }
 0x955   :  { %v1516_v62 = vpop.f32.mrf.mxu1  ;;  %6204 = vmatprep.mubr.msk.f32.mxu0 %vm462_vm3, %v1377_v60  ;;  %6228 = vmatpush3.bf16.msra.mxu0 %v6606_v43 }
 0x956   :  { %6229 = vmatprep.subr.bf16.mxu0 %v6607_v59  ;;  %v1517_v11 = vadd.f32 %v5458_v1, %v1516_v62 }
 0x957   :  { %v6192_v2 = vpop.f32.mrf.mxu1 }
 0x958   :  { %v1528_v3 = vadd.f32 %v6192_v2, %v5458_v1  ;;  %6205 = vmatmul.mubr.msk.f32.gmra.mxu0 %vm462_vm3, %v1380_v63 }
 0x959   :  { %v1519_v4 = vpop.f32.mrf.mxu1  ;;  %6230 = vmatpush3.bf16.msra.mxu0 %v6607_v59  ;;  %6231 = vmatprep.mubr.msk.bf16.mxu0 %vm164_vm2, %v7050_v9 }
 0x95a   :  { %6207 = vmatprep.subr.mxu1 %v1528_v3  ;;  %6243 = vmatprep.subr.bf16.mxu0 %v6608_v0  ;;  %v1520_v8 = vadd.f32 %v5458_v1, %v1519_v4 }
 0x95b   :  { %6208 = vmatpush3.msra.mxu1 %v1528_v3 }
 0x95c   :  { %6209 = vmatprep.subr.mxu1 %v1525_v5  ;;  %6232 = vmatmul.mubr.msk.bf16.vlgmr.msra.gmra.mxu0 %vm164_vm2, %v7056_v15 }
 0x95d   :  { %6210 = vmatpush3.msra.mxu1 %v1525_v5  ;;  %6244 = vmatpush3.bf16.msra.mxu0 %v6608_v0 }
 0x95e   :  { %6247 = vmatprep.mubr.msk.bf16.mxu0 %vm164_vm2, %v7050_v9  ;;  %6211 = vmatprep.subr.mxu1 %v1520_v8 }
 0x95f   :  { %6212 = vmatpush3.msra.mxu1 %v1520_v8  ;;  %6245 = vmatprep.subr.bf16.mxu0 %v6609_v6 }
 0x960   :  { %6213 = vmatprep.subr.mxu1 %v1517_v11 }
 0x961   :  { %6214 = vmatpush3.msra.mxu1 %v1517_v11  ;;  %6246 = vmatpush3.bf16.msra.mxu0 %v6609_v6 }
 0x964   :  { %6248 = vmatmul.mubr.msk.bf16.vlgmr.msra.gmra.mxu0 %vm164_vm2, %v7056_v15 }
 0xa14   :  { %v6203_v12 = vpop.f32.mrf.mxu0 }
 0xa15   :  { %v1627_v13 = vadd.f32 %v6203_v12, %v7103_v47 }
 0xa16   :  { %v1621_v16 = vpop.f32.mrf.mxu0 }
 0xa17   :  { %v1622_v18 = vadd.f32 %v1621_v16, %v7108_v49  ;;  %v1643_v19 = vsel %vm164_vm2, %v1627_v13, -inf }
 0xa18   :  { %1644 = vmax.xlane.f32.xlu1 %v1643_v19  ;;  %v6206_v20 = vpop.f32.mrf.mxu0 }
 0xa19   :  { %v1637_v21 = vadd.f32 %v6206_v20, %v7114_v52  ;;  %v1640_v22 = vsel %vm164_vm2, %v1622_v18, -inf  ;;  %v6610_v20 = vld [vmem:[%s7990_s7 + $0x38] sm:$0xff]  }
 0xa1a   :  { %v1631_v23 = vpop.f32.mrf.mxu0  ;;  %1641 = vmax.xlane.f32.xlu0 %v1640_v22 }
 0xa1b   :  { %v1632_v25 = vadd.f32 %v1631_v23, %v7121_v56  ;;  %v1649_v26 = vsel %vm164_vm2, %v1637_v21, -inf }
 0xa1c   :  { %1650 = vmax.xlane.f32.xlu1 %v1649_v26  ;;  %v6233_v27 = vpop.f32.mrf.mxu0 }
 0xa1d   :  { %v7307_v28 = vadd.f32 %v6233_v27, %v7302_v24  ;;  %v1646_v29 = vsel %vm164_vm2, %v1632_v25, -inf }
 0xa1e   :  { %v1906_v30 = vpop.f32.mrf.mxu0  ;;  %1647 = vmax.xlane.f32.xlu0 %v1646_v29  ;;  %v6611_v29 = vld [vmem:[%s7990_s7 + $0x30] sm:$0xff]  }
 0xa1f   :  { %v1907_v31 = vadd.f32 %v7302_v24, %v1906_v30  ;;  %v1303_v30 = vadd.f32 %v7201_v35, %v7259_v44 }
 0xa20   :  { %v6234_v44 = vpop.f32.mrf.mxu0 }
 0xa21   :  { %6259 = vmatprep.mubr.msk.f32.mxu0 %vm462_vm3, %v1907_v31 }
 0xaa1   :  { %v1645_v32 = vpop.xlane.xlu1 %1644 }
 0xaa2   :  { %v1653_v33 = vsub.f32 %v1627_v13, %v1645_v32  ;;  %v1295_v32 = vadd.f32 %v7204_v37, %v7261_v45  ;;  %v1909_v45 = vpop.f32.mrf.mxu0 }
 0xaa3   :  { %v1642_v34 = vpop.xlane.xlu0 %1641 }
 0xaa4   :  { %v1658_v36 = vmul.f32 1.442695, %v1653_v33  ;;  %v1652_v40 = vsub.f32 %v1622_v18, %v1642_v34  ;;  %v5475_v18 = vld [vmem:[%s7995_s12 + $0x8] sm:$0xf] }
 0xaa5   :  { %v1651_v41 = vpop.xlane.xlu1 %1650  ;;  %6576 = vmatprep.subr.msk.bf16.mxu1 %vm1198_vm4, %v5475_v18  ;;  %v1792_v19 = vsel %vm1198_vm4, %v5475_v18, 0 }
 0xaa6   :  { %6696 = vpow2.f32 %v1658_v36  ;;  %v1656_v42 = vmul.f32 1.442695, %v1652_v40  ;;  %v1655_v43 = vsub.f32 %v1637_v21, %v1651_v41  ;;  %v1306_v36 = vadd.f32 %v7206_v38, %v7263_v46 }
 0xaa7   :  { %v1648_v50 = vpop.xlane.xlu0 %1647  ;;  %v1298_v41 = vadd.f32 %v7208_v39, %v7265_v48 }
 0xaa8   :  { %6698 = vpow2.f32 %v1656_v42  ;;  %v1662_v51 = vmul.f32 1.442695, %v1655_v43  ;;  %v1654_v53 = vsub.f32 %v1632_v25, %v1648_v50  ;;  %v5493_v50 = vld [vmem:[%s7993_s10 + $0x3] ss:$0 sm:$0xff] }
 0xaaa   :  { %6700 = vpow2.f32 %v1662_v51  ;;  %v1660_v54 = vmul.f32 1.442695, %v1654_v53  ;;  %v6249_v53 = vpop.f32.mrf.mxu0 }
 0xaac   :  { %6702 = vpow2.f32 %v1660_v54  ;;  %v2054_v54 = vpop.f32.mrf.mxu0 }
 0xab3   :  { %v6697_v55 = vpop.eup %6696 }
 0xab4   :  { %v1667_v57 = vsel %vm164_vm2, %v6697_v55, 0.0 }
 0xab5   :  { %v6699_v58 = vpop.eup %6698  ;;  %1668 = vadd.xlane.f32.xlu1 %v1667_v57  ;;  %v6250_v57 = vpop.f32.mrf.mxu0 }
 0xab6   :  { %v1664_v59 = vsel %vm164_vm2, %v6699_v58, 0.0 }
 0xab7   :  { %v6701_v60 = vpop.eup %6700  ;;  %1665 = vadd.xlane.f32.xlu0 %v1664_v59 }
 0xab8   :  { %v1673_v61 = vsel %vm164_vm2, %v6701_v60, 0.0 }
 0xab9   :  { %v6703_v62 = vpop.eup %6702  ;;  %1674 = vadd.xlane.f32.xlu1 %v1673_v61  ;;  %v2057_v61 = vpop.f32.mrf.mxu0 }
 0xaba   :  { %v1670_v63 = vsel %vm164_vm2, %v6703_v62, 0.0 }
 0xabb   :  { %1671 = vadd.xlane.f32.xlu0 %v1670_v63  ;;  %v1918_v63 = vadd.f32 %v6234_v44, %v7302_v24 }
 0xb3e   :  { %v1669_v0 = vpop.xlane.xlu1 %1668 }
 0xb3f   :  { %6704 = vrcp.f32 %v1669_v0 }
 0xb40   :  { %v1666_v1 = vpop.xlane.xlu0 %1665 }
 0xb41   :  { %6706 = vrcp.f32 %v1666_v1 }
 0xb42   :  { %v1675_v2 = vpop.xlane.xlu1 %1674 }
 0xb43   :  { %6708 = vrcp.f32 %v1675_v2 }
 0xb44   :  { %v1672_v3 = vpop.xlane.xlu0 %1671 }
 0xb45   :  { %6710 = vrcp.f32 %v1672_v3 }
 0xb4c   :  { %v6705_v4 = vpop.eup %6704 }
 0xb4d   :  { %v1681_v8 = vmul.f32 %v6705_v4, %v6697_v55 }
 0xb4e   :  { %v6707_v5 = vpop.eup %6706 }
 0xb4f   :  { %v1680_v6 = vmul.f32 %v6707_v5, %v6699_v58  ;;  %v5503_v58 = vld [vmem:[%s7994_s11 + $0x3] ss:$0 sm:$0xff] }
 0xb50   :  { %v6709_v11 = vpop.eup %6708  ;;  %v2066_v59 = vadd.f32 %v6250_v57, %v5503_v58  ;;  %v2058_v0 = vadd.f32 %v5503_v58, %v2057_v61  ;;  %v2055_v1 = vadd.f32 %v5503_v58, %v2054_v54 }
 0xb51   :  { %6215 = vmatprep.mubr.msk.f32.mxu1 %vm164_vm2, %v1680_v6  ;;  %v1683_v16 = vmul.f32 %v6709_v11, %v6701_v60  ;;  %v1910_v60 = vadd.f32 %v7302_v24, %v1909_v45 }
 0xb52   :  { %v6711_v12 = vpop.eup %6710  ;;  %6216 = vmatmul.mubr.msk.f32.vlgmr.msra.gmra.mxu1 %vm164_vm2, %v1681_v8 }
 0xb53   :  { %v1682_v13 = vmul.f32 %v6711_v12, %v6703_v62  ;;  %6222 = vmatpush3.bf16.msra.mxu1 %v1792_v19  ;;  %v2063_v62 = vadd.f32 %v6249_v53, %v5503_v58 }
 0xb54   :  { %6235 = vmatprep.subr.bf16.mxu1 %v6610_v20 }
 0xb55   :  { %6218 = vmatprep.mubr.msk.f32.mxu1 %vm164_vm2, %v1682_v13 }
 0xb56   :  { %6219 = vmatmul.mubr.msk.f32.gmra.mxu1 %vm164_vm2, %v1683_v16 }
 0xc12   :  { %v6217_v21 = vpop.f32.mrf.mxu1 }
 0xc14   :  { %v1762_v22 = vpop.f32.mrf.mxu1 }
 0xc15   :  { %v1781_v23 = vpack.c.bf16 %v6217_v21, %v1762_v22 }
 0xc16   :  { %v6220_v25 = vpop.f32.mrf.mxu1 }
 0xc17   :  { %6223 = vmatprep.mubr.msk.bf16.mxu1 %vm462_vm3, %v1781_v23 }
 0xc18   :  { %v1772_v26 = vpop.f32.mrf.mxu1 }
 0xc19   :  { %v1782_v27 = vpack.c.bf16 %v6220_v25, %v1772_v26 }
 0xc1b   :  { %6224 = vmatmul.mubr.msk.bf16.vlgmr.msra.gmra.mxu1 %vm462_vm3, %v1782_v27 }
 0xc1c   :  { %6236 = vmatpush3.bf16.msra.mxu1 %v6610_v20  ;;  %6239 = vmatprep.mubr.msk.bf16.mxu1 %vm164_vm2, %v7050_v9 }
 0xc1d   :  { %6237 = vmatprep.subr.bf16.mxu1 %v6611_v29 }
 0xc20   :  { %6238 = vmatpush3.bf16.msra.mxu1 %v6611_v29 }
 0xc23   :  { %6240 = vmatmul.mubr.msk.bf16.vlgmr.msra.gmra.mxu1 %vm164_vm2, %v7056_v15 }
 0xcdb   :  { %v6225_v31 = vpop.f32.mrf.mxu1 }
 0xcdc   :  { %v7341_v33 = vadd.f32 %v6225_v31, %v1303_v30 }
 0xcdd   :  { %v1828_v34 = vpop.f32.mrf.mxu1 }
 0xcde   :  { %v7345_v40 = vadd.f32 %v1828_v34, %v1295_v32 }
 0xcdf   :  { %v6226_v9 = vpop.f32.mrf.mxu1 }
 0xce0   :  { %v7349_v15 = vadd.f32 %v6226_v9, %v1306_v36 }
 0xce1   :  { %v1831_v42 = vpop.f32.mrf.mxu1 }
 0xce2   :  { %v7351_v35 = vadd.f32 %v1831_v42, %v1298_v41 }
 0xce3   :  { %v6241_v43 = vpop.f32.mrf.mxu1 }
 0xce4   :  { %v1989_v51 = vadd.f32 %v6241_v43, %v5493_v50 }
 0xce5   :  { %v1980_v37 = vpop.f32.mrf.mxu1 }
 0xce6   :  { %v1981_v55 = vadd.f32 %v5493_v50, %v1980_v37 }
 0xce7   :  { %v6242_v38 = vpop.f32.mrf.mxu1 }
 0xce8   :  { %v1992_v46 = vadd.f32 %v6242_v38, %v5493_v50 }
 0xce9   :  { %v1983_v39 = vpop.f32.mrf.mxu1 }
 0xcea   :  { %6251 = vmatprep.subr.msk.mxu0 %vm462_vm3, %v1992_v46  ;;  %v1984_v48 = vadd.f32 %v5493_v50, %v1983_v39 }
 0xceb   :  { %6252 = vmatpush3.xpose.msk.msra.mxu0 %vm462_vm3, %v1992_v46 }
 0xcec   :  { %6253 = vmatprep.subr.msk.mxu0 %vm462_vm3, %v1989_v51 }
 0xcef   :  { %6254 = vmatpush3.xpose.msk.msra.mxu0 %vm462_vm3, %v1989_v51 }
 0xcf0   :  { %6255 = vmatprep.subr.msk.mxu0 %vm462_vm3, %v1984_v48 }
 0xcf3   :  { %6256 = vmatpush3.xpose.msk.msra.mxu0 %vm462_vm3, %v1984_v48  ;;  %v5520_v48 = vld [vmem:[%s7995_s12 + $0xc] sm:$0xf] }
 0xcf4   :  { %6257 = vmatprep.subr.msk.mxu0 %vm462_vm3, %v1981_v55  ;;  %v2330_v54 = vsel %vm1198_vm4, %v5520_v48, 0 }
 0xcf7   :  { %6258 = vmatpush3.xpose.msk.msra.mxu0 %vm462_vm3, %v1981_v55 }
 0xcf8   :  { %6265 = vmatprep.subr.mxu0 %v2066_v59 }
 0xcfa   :  { %6260 = vmatmul.mubr.msk.f32.vlgmr.msra.gmra.mxu0 %vm462_vm3, %v1910_v60 }
 0xcfb   :  { %6262 = vmatprep.mubr.msk.f32.mxu0 %vm462_vm3, %v7307_v28  ;;  %6266 = vmatpush3.msra.mxu0 %v2066_v59 }
 0xcfc   :  { %6267 = vmatprep.subr.mxu0 %v2063_v62 }
 0xcfd   :  { %6268 = vmatpush3.msra.mxu0 %v2063_v62 }
 0xcfe   :  { %6263 = vmatmul.mubr.msk.f32.gmra.mxu0 %vm462_vm3, %v1918_v63  ;;  %6269 = vmatprep.subr.mxu0 %v2058_v0 }
 0xcff   :  { %6270 = vmatpush3.msra.mxu0 %v2058_v0 }
 0xd00   :  { %6271 = vmatprep.subr.mxu0 %v2055_v1 }
 0xd01   :  { %6272 = vmatpush3.msra.mxu0 %v2055_v1 }
 0xd02   :  { %6577 = vmatprep.subr.msk.bf16.mxu0 %vm1198_vm4, %v5520_v48 }
 0xdba   :  { %v6261_v2 = vpop.f32.mrf.mxu0 }
 0xdbb   :  { %v2165_v3 = vadd.f32 %v6261_v2, %v7103_v47 }
 0xdbc   :  { %v2159_v4 = vpop.f32.mrf.mxu0 }
 0xdbd   :  { %v2160_v5 = vadd.f32 %v2159_v4, %v7108_v49  ;;  %v2181_v28 = vsel %vm164_vm2, %v2165_v3, -inf }
 0xdbe   :  { %2182 = vmax.xlane.f32.xlu1 %v2181_v28  ;;  %v6264_v24 = vpop.f32.mrf.mxu0  ;;  %v5523_v28 = vld [vmem:[%s7996_s13] ss:$0 sm:$0xff] }
 0xdbf   :  { %v2175_v6 = vadd.f32 %v6264_v24, %v7114_v52  ;;  %v2178_v8 = vsel %vm164_vm2, %v2160_v5, -inf }
 0xdc0   :  { %v2169_v11 = vpop.f32.mrf.mxu0  ;;  %2179 = vmax.xlane.f32.xlu0 %v2178_v8 }
 0xdc1   :  { %v2170_v12 = vadd.f32 %v2169_v11, %v7121_v56  ;;  %v2187_v13 = vsel %vm164_vm2, %v2175_v6, -inf }
 0xdc2   :  { %2188 = vmax.xlane.f32.xlu1 %v2187_v13 }
 0xdc3   :  { %v2184_v47 = vsel %vm164_vm2, %v2170_v12, -inf }
 0xdc4   :  { %2185 = vmax.xlane.f32.xlu0 %v2184_v47 }
 0xe47   :  { %v2183_v16 = vpop.xlane.xlu1 %2182 }
 0xe48   :  { %v2191_v49 = vsub.f32 %v2165_v3, %v2183_v16 }
 0xe49   :  { %v2180_v18 = vpop.xlane.xlu0 %2179 }
 0xe4a   :  { %v2196_v19 = vmul.f32 1.442695, %v2191_v49  ;;  %v2190_v20 = vsub.f32 %v2160_v5, %v2180_v18 }
 0xe4b   :  { %v2189_v21 = vpop.xlane.xlu1 %2188 }
 0xe4c   :  { %6712 = vpow2.f32 %v2196_v19  ;;  %v2194_v52 = vmul.f32 1.442695, %v2190_v20  ;;  %v2193_v22 = vsub.f32 %v2175_v6, %v2189_v21 }
 0xe4d   :  { %v2186_v23 = vpop.xlane.xlu0 %2185 }
 0xe4e   :  { %6714 = vpow2.f32 %v2194_v52  ;;  %v2200_v25 = vmul.f32 1.442695, %v2193_v22  ;;  %v2192_v26 = vsub.f32 %v2170_v12, %v2186_v23 }
 0xe50   :  { %6716 = vpow2.f32 %v2200_v25  ;;  %v2198_v56 = vmul.f32 1.442695, %v2192_v26 }
 0xe52   :  { %6718 = vpow2.f32 %v2198_v56 }
 0xe59   :  { %v6713_v27 = vpop.eup %6712 }
 0xe5a   :  { %v2205_v29 = vsel %vm164_vm2, %v6713_v27, 0.0 }
 0xe5b   :  { %v6715_v30 = vpop.eup %6714  ;;  %2206 = vadd.xlane.f32.xlu1 %v2205_v29 }
 0xe5c   :  { %v2202_v31 = vsel %vm164_vm2, %v6715_v30, 0.0 }
 0xe5d   :  { %v6717_v32 = vpop.eup %6716  ;;  %2203 = vadd.xlane.f32.xlu0 %v2202_v31 }
 0xe5e   :  { %v2211_v34 = vsel %vm164_vm2, %v6717_v32, 0.0 }
 0xe5f   :  { %v6719_v36 = vpop.eup %6718  ;;  %2212 = vadd.xlane.f32.xlu1 %v2211_v34  ;;  %v6612_v34 = vld [vmem:[%s7999_s16 + $0x8] sm:$0xff]  }
 0xe60   :  { %v2208_v9 = vsel %vm164_vm2, %v6719_v36, 0.0  ;;  %6285 = vmatprep.subr.bf16.mxu1 %v6612_v34 }
 0xe61   :  { %2209 = vadd.xlane.f32.xlu0 %v2208_v9  ;;  %6286 = vmatpush3.bf16.msra.mxu1 %v6612_v34 }
 0xee4   :  { %v2207_v41 = vpop.xlane.xlu1 %2206 }
 0xee5   :  { %6720 = vrcp.f32 %v2207_v41 }
 0xee6   :  { %v2204_v42 = vpop.xlane.xlu0 %2203 }
 0xee7   :  { %6722 = vrcp.f32 %v2204_v42 }
 0xee8   :  { %v2213_v44 = vpop.xlane.xlu1 %2212 }
 0xee9   :  { %6724 = vrcp.f32 %v2213_v44 }
 0xeea   :  { %v2210_v43 = vpop.xlane.xlu0 %2209 }
 0xeeb   :  { %6726 = vrcp.f32 %v2210_v43 }
 0xef2   :  { %v6721_v37 = vpop.eup %6720 }
 0xef3   :  { %v2219_v38 = vmul.f32 %v6721_v37, %v6713_v27 }
 0xef4   :  { %v6723_v45 = vpop.eup %6722 }
 0xef5   :  { %v2218_v50 = vmul.f32 %v6723_v45, %v6715_v30 }
 0xef6   :  { %v6725_v46 = vpop.eup %6724 }
 0xef7   :  { %6273 = vmatprep.mubr.msk.f32.mxu0 %vm164_vm2, %v2218_v50  ;;  %v2221_v39 = vmul.f32 %v6725_v46, %v6717_v32 }
 0xef8   :  { %v6727_v51 = vpop.eup %6726  ;;  %6274 = vmatmul.mubr.msk.f32.vlgmr.msra.gmra.mxu0 %vm164_vm2, %v2219_v38 }
 0xef9   :  { %v2220_v53 = vmul.f32 %v6727_v51, %v6719_v36  ;;  %6280 = vmatpush3.bf16.msra.mxu0 %v2330_v54  ;;  %v6613_v36 = vld [vmem:[%s7999_s16] sm:$0xff]  }
 0xefa   :  { %6287 = vmatprep.subr.bf16.mxu1 %v6613_v36  ;;  %v5524_v54 = vld [vmem:[%s7997_s14] ss:$0 sm:$0xff] }
 0xefb   :  { %6276 = vmatprep.mubr.msk.f32.mxu0 %vm164_vm2, %v2220_v53  ;;  %6288 = vmatpush3.bf16.msra.mxu1 %v6613_v36 }
 0xefc   :  { %6277 = vmatmul.mubr.msk.f32.gmra.mxu0 %vm164_vm2, %v2221_v39 }
 0xfb8   :  { %v6275_v55 = vpop.f32.mrf.mxu0 }
 0xfba   :  { %v2300_v57 = vpop.f32.mrf.mxu0 }
 0xfbb   :  { %v2319_v58 = vpack.c.bf16 %v6275_v55, %v2300_v57 }
 0xfbc   :  { %v6278_v59 = vpop.f32.mrf.mxu0 }
 0xfbd   :  { %6281 = vmatprep.mubr.msk.bf16.mxu0 %vm462_vm3, %v2319_v58 }
 0xfbe   :  { %v2310_v60 = vpop.f32.mrf.mxu0 }
 0xfbf   :  { %v2320_v61 = vpack.c.bf16 %v6278_v59, %v2310_v60 }
 0xfc1   :  { %6282 = vmatmul.mubr.msk.bf16.vlgmr.msra.gmra.mxu0 %vm462_vm3, %v2320_v61  ;;  %v5525_v61 = vld [vmem:[%s7998_s15] ss:$0 sm:$0xff] }
0x1081   :  { %v6283_v62 = vpop.f32.mrf.mxu0 }
0x1082   :  { %v2383_v63 = vadd.f32 %v6283_v62, %v7341_v33 }
0x1083   :  { %v2366_v0 = vpop.f32.mrf.mxu0 }
0x1084   :  { %v2381_v1 = vadd.f32 %v2366_v0, %v7345_v40  ;;  %v2387_v3 = vadd.f32 %v2383_v63, %v6999_v7 }
0x1085   :  { %v6284_v2 = vpop.f32.mrf.mxu0 }
0x1086   :  { %v2385_v4 = vadd.f32 %v2381_v1, %v7004_v10  ;;  %v2384_v5 = vadd.f32 %v6284_v2, %v7349_v15  ;;  %v7407_v33 = vadd.f32 %v5523_v28, %v2387_v3 }
0x1087   :  { %v2369_v24 = vpop.f32.mrf.mxu0 }
0x1088   :  { %v7404_v6 = vadd.f32 %v5523_v28, %v2385_v4  ;;  %v2382_v8 = vadd.f32 %v2369_v24, %v7351_v35  ;;  %v2388_v40 = vadd.f32 %v2384_v5, %v7011_v14  ;;  %v2408_v35 = vsel %vm164_vm2, %v7407_v33, 0.0 }
0x108a   :  { %v2386_v11 = vadd.f32 %v2382_v8, %v7015_v17  ;;  %v2402_v7 = vsel %vm164_vm2, %v7404_v6, 0.0  ;;  %v7415_v15 = vadd.f32 %v5523_v28, %v2388_v40  ;;  %v6614_v40 = vld [vmem:[%s8001_s18 + $0x38] sm:$0xff]  }
0x108b   :  { %2403 = vadd.xlane.f32.xlu0 %v2402_v7  ;;  %6293 = vmatprep.subr.bf16.mxu0 %v6614_v40  ;;  %v6616_v7 = vld [vmem:[%s8001_s18 + $0x28] sm:$0xff]  }
0x108c   :  { %v7413_v10 = vadd.f32 %v5523_v28, %v2386_v11  ;;  %v2411_v14 = vsel %vm164_vm2, %v7415_v15, 0.0  ;;  %6294 = vmatpush3.bf16.msra.mxu0 %v6614_v40  ;;  %v6615_v11 = vld [vmem:[%s8001_s18 + $0x30] sm:$0xff]  }
0x108d   :  { %6295 = vmatprep.subr.bf16.mxu0 %v6615_v11 }
0x108e   :  { %v2405_v12 = vsel %vm164_vm2, %v7413_v10, 0.0 }
0x108f   :  { %2406 = vadd.xlane.f32.xlu1 %v2405_v12  ;;  %2409 = vadd.xlane.f32.xlu0 %v2408_v35  ;;  %v6617_v12 = vld [vmem:[%s8001_s18 + $0x20] sm:$0xff]   ;;  %v6618_v35 = vld [vmem:[%s8001_s18 + $0x18] sm:$0xff]  }
0x1090   :  { %6296 = vmatpush3.bf16.msra.mxu0 %v6615_v11 }
0x1091   :  { %6297 = vmatprep.subr.bf16.mxu0 %v6616_v7 }
0x1093   :  { %2412 = vadd.xlane.f32.xlu1 %v2411_v14  ;;  %v6619_v14 = vld [vmem:[%s8001_s18 + $0x10] sm:$0xff]  }
0x1094   :  { %6298 = vmatpush3.bf16.msra.mxu0 %v6616_v7 }
0x1095   :  { %6299 = vmatprep.subr.bf16.mxu0 %v6617_v12 }
0x1098   :  { %6300 = vmatpush3.bf16.msra.mxu0 %v6617_v12 }
0x1099   :  { %6301 = vmatprep.subr.bf16.mxu0 %v6618_v35 }
0x109c   :  { %6302 = vmatpush3.bf16.msra.mxu0 %v6618_v35 }
0x109d   :  { %6303 = vmatprep.subr.bf16.mxu0 %v6619_v14 }
0x10a0   :  { %6304 = vmatpush3.bf16.msra.mxu0 %v6619_v14 }
0x1114   :  { %v2404_v17 = vpop.xlane.xlu0 %2403 }
0x1115   :  { %v2414_v13 = vmul.f32 0.03125, %v2404_v17  ;;  %v6620_v17 = vld [vmem:[%s8001_s18 + $0x8] sm:$0xff]  }
0x1116   :  { %6305 = vmatprep.subr.bf16.mxu0 %v6620_v17 }
0x1117   :  { %v2418_v47 = vsub.f32 %v7404_v6, %v2414_v13  ;;  %6306 = vmatpush3.bf16.msra.mxu0 %v6620_v17  ;;  %v6621_v13 = vld [vmem:[%s8001_s18] sm:$0xff]  }
0x1118   :  { %v2407_v16 = vpop.xlane.xlu1 %2406  ;;  %v2410_v49 = vpop.xlane.xlu0 %2409  ;;  %6307 = vmatprep.subr.bf16.mxu0 %v6621_v13 }
0x1119   :  { %v2415_v18 = vmul.f32 0.03125, %v2407_v16  ;;  %v2416_v19 = vmul.f32 0.03125, %v2410_v49  ;;  %v2422_v20 = vmul.f32 %v2418_v47, %v2418_v47 }
0x111b   :  { %v2419_v21 = vsub.f32 %v7413_v10, %v2415_v18  ;;  %v2420_v52 = vsub.f32 %v7407_v33, %v2416_v19  ;;  %v2426_v22 = vsel %vm164_vm2, %v2422_v20, 0.0  ;;  %6308 = vmatpush3.bf16.msra.mxu0 %v6621_v13 }
0x111c   :  { %v2413_v23 = vpop.xlane.xlu1 %2412  ;;  %2427 = vadd.xlane.f32.xlu0 %v2426_v22 }
0x111d   :  { %v2417_v25 = vmul.f32 0.03125, %v2413_v23  ;;  %v2423_v26 = vmul.f32 %v2419_v21, %v2419_v21  ;;  %v2424_v56 = vmul.f32 %v2420_v52, %v2420_v52 }
0x111f   :  { %v2421_v27 = vsub.f32 %v7415_v15, %v2417_v25  ;;  %v2429_v29 = vsel %vm164_vm2, %v2423_v26, 0.0  ;;  %v2432_v30 = vsel %vm164_vm2, %v2424_v56, 0.0 }
0x1120   :  { %2430 = vadd.xlane.f32.xlu1 %v2429_v29  ;;  %2433 = vadd.xlane.f32.xlu0 %v2432_v30 }
0x1121   :  { %v2425_v31 = vmul.f32 %v2421_v27, %v2421_v27 }
0x1123   :  { %v2435_v32 = vsel %vm164_vm2, %v2425_v31, 0.0 }
0x1124   :  { %2436 = vadd.xlane.f32.xlu1 %v2435_v32 }
0x11a5   :  { %v2428_v9 = vpop.xlane.xlu0 %2427 }
0x11a6   :  { %v2438_v41 = vmul.f32 0.03125, %v2428_v9 }
0x11a8   :  { %v2442_v42 = vadd.f32 1e-05, %v2438_v41 }
0x11a9   :  { %v2431_v44 = vpop.xlane.xlu1 %2430  ;;  %v2434_v43 = vpop.xlane.xlu0 %2433 }
0x11aa   :  { %6728 = vrsqrt.f32 %v2442_v42  ;;  %v2439_v37 = vmul.f32 0.03125, %v2431_v44  ;;  %v2440_v45 = vmul.f32 0.03125, %v2434_v43 }
0x11ac   :  { %v2443_v50 = vadd.f32 1e-05, %v2439_v37  ;;  %v2444_v38 = vadd.f32 1e-05, %v2440_v45 }
0x11ad   :  { %v2437_v46 = vpop.xlane.xlu1 %2436 }
0x11ae   :  { %6730 = vrsqrt.f32 %v2443_v50  ;;  %v2441_v51 = vmul.f32 0.03125, %v2437_v46 }
0x11af   :  { %6732 = vrsqrt.f32 %v2444_v38 }
0x11b0   :  { %v2445_v53 = vadd.f32 1e-05, %v2441_v51 }
0x11b2   :  { %6734 = vrsqrt.f32 %v2445_v53 }
0x11b7   :  { %v6729_v39 = vpop.eup %6728 }
0x11b8   :  { %v2450_v48 = vmul.f32 %v6729_v39, %v2418_v47  ;;  %v5526_v47 = vld [vmem:[%s8000_s17] ss:$0 sm:$0xff] }
0x11ba   :  { %v2460_v59 = vmul.f32 %v5524_v54, %v2450_v48 }
0x11bb   :  { %v6731_v55 = vpop.eup %6730 }
0x11bc   :  { %v6733_v57 = vpop.eup %6732  ;;  %v2451_v58 = vmul.f32 %v6731_v55, %v2419_v21  ;;  %v2470_v1 = vadd.f32 %v5525_v61, %v2460_v59  ;;  %v5539_v55 = vld [vmem:[%s8002_s19] ss:$0 sm:$0xff] }
0x11bd   :  { %v2452_v60 = vmul.f32 %v6733_v57, %v2420_v52 }
0x11be   :  { %v2461_v62 = vmul.f32 %v5524_v54, %v2451_v58 }
0x11bf   :  { %v6735_v63 = vpop.eup %6734  ;;  %v2462_v3 = vmul.f32 %v5524_v54, %v2452_v60 }
0x11c0   :  { %v2453_v0 = vmul.f32 %v6735_v63, %v2421_v27  ;;  %v2471_v2 = vadd.f32 %v5525_v61, %v2461_v62 }
0x11c1   :  { %v2472_v28 = vadd.f32 %v5525_v61, %v2462_v3 }
0x11c2   :  { %v2474_v4 = vpack.c.bf16 %v2471_v2, %v2470_v1  ;;  %v2463_v5 = vmul.f32 %v5524_v54, %v2453_v0 }
0x11c4   :  { %6289 = vmatprep.mubr.msk.bf16.mxu1 %vm164_vm2, %v2474_v4  ;;  %v2473_v24 = vadd.f32 %v5525_v61, %v2463_v5 }
0x11c6   :  { %v2475_v8 = vpack.c.bf16 %v2473_v24, %v2472_v28 }
0x11c8   :  { %6290 = vmatmul.mubr.msk.bf16.vlgmr.msra.gmra.mxu1 %vm164_vm2, %v2475_v8 }
0x1288   :  { %v6291_v16 = vpop.f32.mrf.mxu1 }
0x1289   :  { %v2548_v49 = vadd.f32 %v6291_v16, %v5526_v47 }
0x128a   :  { %v2539_v18 = vpop.f32.mrf.mxu1 }
0x128b   :  { %v2540_v19 = vadd.f32 %v5526_v47, %v2539_v18  ;;  %v2560_v20 = vmul.f32 0.70710677, %v2548_v49  ;;  %v2556_v43 = vmul.f32 0.5, %v2548_v49 }
0x128c   :  { %v6292_v21 = vpop.f32.mrf.mxu1 }
0x128d   :  { %v2558_v52 = vmul.f32 0.70710677, %v2540_v19  ;;  %v2551_v22 = vadd.f32 %v6292_v21, %v5526_v47  ;;  %v2554_v41 = vmul.f32 0.5, %v2540_v19  ;;  %v6622_v19 = vld [vmem:[%s8022_s23 + $0x48] sm:$0xff]  }
0x128e   :  { %v2542_v23 = vpop.f32.mrf.mxu1  ;;  %6313 = vmatprep.subr.bf16.mxu1 %v6622_v19  ;;  %v6624_v21 = vld [vmem:[%s7990_s7 + $0x48] sm:$0xff]  }
0x128f   :  { %6736 = verf.f32 %v2558_v52  ;;  %v2561_v25 = vmul.f32 0.70710677, %v2551_v22  ;;  %v2543_v26 = vadd.f32 %v5526_v47, %v2542_v23  ;;  %v2557_v9 = vmul.f32 0.5, %v2551_v22  ;;  %6314 = vmatpush3.bf16.msra.mxu1 %v6622_v19 }
0x1290   :  { %6738 = verf.f32 %v2560_v20  ;;  %v6623_v20 = vld [vmem:[%s8022_s23 + $0x40] sm:$0xff]  }
0x1291   :  { %6740 = verf.f32 %v2561_v25  ;;  %v2559_v56 = vmul.f32 0.70710677, %v2543_v26  ;;  %v2555_v42 = vmul.f32 0.5, %v2543_v26  ;;  %6315 = vmatprep.subr.bf16.mxu1 %v6623_v20 }
0x1293   :  { %6742 = verf.f32 %v2559_v56  ;;  %6316 = vmatpush3.bf16.msra.mxu1 %v6623_v20  ;;  %v6628_v20 = vld [vmem:[%s7990_s7 + $0x58] sm:$0xff]  }
0x1294   :  { %6321 = vmatprep.subr.bf16.mxu1 %v6624_v21 }
0x129c   :  { %v6737_v27 = vpop.eup %6736 }
0x129d   :  { %v6739_v29 = vpop.eup %6738  ;;  %v2566_v31 = vadd.f32 1.0, %v6737_v27 }
0x129e   :  { %v6741_v30 = vpop.eup %6740  ;;  %v2568_v36 = vadd.f32 1.0, %v6739_v29 }
0x129f   :  { %v2569_v32 = vadd.f32 1.0, %v6741_v30  ;;  %v2570_v45 = vmul.f32 %v2566_v31, %v2554_v41  ;;  %v5542_v41 = vld [vmem:[%s8023_s3 + $0x1] ss:$0 sm:$0xff] }
0x12a0   :  { %v6743_v34 = vpop.eup %6742  ;;  %v2572_v38 = vmul.f32 %v2568_v36, %v2556_v43 }
0x12a1   :  { %v2567_v44 = vadd.f32 1.0, %v6743_v34  ;;  %v2573_v37 = vmul.f32 %v2569_v32, %v2557_v9 }
0x12a3   :  { %v2571_v50 = vmul.f32 %v2567_v44, %v2555_v42  ;;  %v2575_v51 = vpack.c.bf16 %v2573_v37, %v2572_v38 }
0x12a5   :  { %v2574_v46 = vpack.c.bf16 %v2571_v50, %v2570_v45  ;;  %v5543_v50 = vld [vmem:[%s8024_s30 + $0x1] ss:$0 sm:$0xff] }
0x12a7   :  { %6309 = vmatprep.mubr.bf16.mxu0 %v2574_v46 }
0x12a8   :  { %6310 = vmatmul.mubr.bf16.vlgmr.msra.gmra.mxu0 %v2575_v51 }
0x1368   :  { %v6311_v53 = vpop.f32.mrf.mxu0 }
0x1369   :  { %v2691_v48 = vadd.f32 %v6311_v53, %v7407_v33 }
0x136a   :  { %v2674_v39 = vpop.f32.mrf.mxu0 }
0x136b   :  { %v2689_v54 = vadd.f32 %v2674_v39, %v7404_v6  ;;  %v7479_v60 = vadd.f32 %v5539_v55, %v2691_v48 }
0x136c   :  { %v6312_v57 = vpop.f32.mrf.mxu0 }
0x136d   :  { %v7477_v58 = vadd.f32 %v5539_v55, %v2689_v54  ;;  %v2692_v61 = vadd.f32 %v6312_v57, %v7415_v15  ;;  %v2714_v0 = vsel %vm164_vm2, %v7479_v60, 0.0 }
0x136e   :  { %v2677_v59 = vpop.f32.mrf.mxu0 }
0x136f   :  { %v2690_v62 = vadd.f32 %v2677_v59, %v7413_v10  ;;  %v2708_v63 = vsel %vm164_vm2, %v7477_v58, 0.0  ;;  %v7487_v6 = vadd.f32 %v5539_v55, %v2692_v61 }
0x1370   :  { %2709 = vadd.xlane.f32.xlu0 %v2708_v63  ;;  %v6626_v63 = vld [vmem:[%s7991_s8 + $0x48] sm:$0xff]  }
0x1371   :  { %v7485_v33 = vadd.f32 %v5539_v55, %v2690_v62  ;;  %v2717_v15 = vsel %vm164_vm2, %v7487_v6, 0.0  ;;  %v6625_v62 = vld [vmem:[%s7990_s7 + $0x40] sm:$0xff]  }
0x1373   :  { %v2711_v1 = vsel %vm164_vm2, %v7485_v33, 0.0 }
0x1374   :  { %2715 = vadd.xlane.f32.xlu0 %v2714_v0  ;;  %2712 = vadd.xlane.f32.xlu1 %v2711_v1  ;;  %v6627_v0 = vld [vmem:[%s7991_s8 + $0x40] sm:$0xff]  }
0x1378   :  { %2718 = vadd.xlane.f32.xlu1 %v2717_v15  ;;  %v5549_v15 = vld [vmem:[%s7992_s9 + $0x4] ss:$0 sm:$0xff] }
0x13f9   :  { %v2710_v10 = vpop.xlane.xlu0 %2709 }
0x13fa   :  { %v2720_v2 = vmul.f32 0.03125, %v2710_v10 }
0x13fc   :  { %v2724_v3 = vsub.f32 %v7477_v58, %v2720_v2 }
0x13fd   :  { %v2716_v4 = vpop.xlane.xlu0 %2715  ;;  %v2713_v5 = vpop.xlane.xlu1 %2712 }
0x13fe   :  { %v2722_v28 = vmul.f32 0.03125, %v2716_v4  ;;  %v2721_v24 = vmul.f32 0.03125, %v2713_v5  ;;  %v2728_v8 = vmul.f32 %v2724_v3, %v2724_v3 }
0x1400   :  { %v2726_v40 = vsub.f32 %v7479_v60, %v2722_v28  ;;  %v2725_v11 = vsub.f32 %v7485_v33, %v2721_v24  ;;  %v2732_v7 = vsel %vm164_vm2, %v2728_v8, 0.0  ;;  %v5559_v24 = vld [vmem:[%s7993_s10 + $0x4] ss:$0 sm:$0xff] }
0x1401   :  { %2733 = vadd.xlane.f32.xlu0 %v2732_v7  ;;  %v2719_v12 = vpop.xlane.xlu1 %2718 }
0x1402   :  { %v2723_v35 = vmul.f32 0.03125, %v2719_v12  ;;  %v2730_v14 = vmul.f32 %v2726_v40, %v2726_v40  ;;  %v2729_v17 = vmul.f32 %v2725_v11, %v2725_v11 }
0x1404   :  { %v2727_v13 = vsub.f32 %v7487_v6, %v2723_v35  ;;  %v2738_v47 = vsel %vm164_vm2, %v2730_v14, 0.0  ;;  %v2735_v16 = vsel %vm164_vm2, %v2729_v17, 0.0  ;;  %v5569_v17 = vld [vmem:[%s7994_s11 + $0x4] ss:$0 sm:$0xff] }
0x1405   :  { %2739 = vadd.xlane.f32.xlu0 %v2738_v47  ;;  %2736 = vadd.xlane.f32.xlu1 %v2735_v16 }
0x1406   :  { %v2731_v49 = vmul.f32 %v2727_v13, %v2727_v13 }
0x1408   :  { %v2741_v18 = vsel %vm164_vm2, %v2731_v49, 0.0 }
0x1409   :  { %2742 = vadd.xlane.f32.xlu1 %v2741_v18 }
0x148a   :  { %v2734_v52 = vpop.xlane.xlu0 %2733 }
0x148b   :  { %v2744_v22 = vmul.f32 0.03125, %v2734_v52 }
0x148d   :  { %v2748_v23 = vadd.f32 1e-05, %v2744_v22  ;;  %v6629_v22 = vld [vmem:[%s7990_s7 + $0x50] sm:$0xff]  }
0x148e   :  { %v2740_v25 = vpop.xlane.xlu0 %2739  ;;  %v2737_v26 = vpop.xlane.xlu1 %2736 }
0x148f   :  { %6744 = vrsqrt.f32 %v2748_v23  ;;  %v2746_v56 = vmul.f32 0.03125, %v2740_v25  ;;  %v2745_v27 = vmul.f32 0.03125, %v2737_v26 }
0x1491   :  { %v2750_v29 = vadd.f32 1e-05, %v2746_v56  ;;  %v2749_v30 = vadd.f32 1e-05, %v2745_v27  ;;  %v7577_v56 = vld [vmem:[%s8025_s1 + $0x8] sm:$0xff] }
0x1492   :  { %v2743_v31 = vpop.xlane.xlu1 %2742 }
0x1493   :  { %6746 = vrsqrt.f32 %v2750_v29  ;;  %v2747_v32 = vmul.f32 0.03125, %v2743_v31 }
0x1494   :  { %6748 = vrsqrt.f32 %v2749_v30  ;;  %v7583_v30 = vld [vmem:[%s8025_s1] sm:$0xff] }
0x1495   :  { %v2751_v34 = vadd.f32 1e-05, %v2747_v32 }
0x1497   :  { %6750 = vrsqrt.f32 %v2751_v34 }
0x149c   :  { %v6745_v36 = vpop.eup %6744 }
0x149d   :  { %v2756_v9 = vmul.f32 %v6745_v36, %v2724_v3  ;;  %v7590_v36 = vld [vmem:[%s8025_s1 + $0x18] sm:$0xff] }
0x149f   :  { %v2766_v37 = vmul.f32 %v5542_v41, %v2756_v9 }
0x14a0   :  { %v6747_v42 = vpop.eup %6746 }
0x14a1   :  { %v6749_v44 = vpop.eup %6748  ;;  %v2758_v43 = vmul.f32 %v6747_v42, %v2726_v40  ;;  %v2776_v39 = vadd.f32 %v5543_v50, %v2766_v37 }
0x14a2   :  { %v2757_v45 = vmul.f32 %v6749_v44, %v2725_v11  ;;  %v7597_v44 = vld [vmem:[%s8025_s1 + $0x10] sm:$0xff] }
0x14a3   :  { %v2768_v51 = vmul.f32 %v5542_v41, %v2758_v43 }
0x14a4   :  { %v6751_v38 = vpop.eup %6750  ;;  %v2767_v46 = vmul.f32 %v5542_v41, %v2757_v45 }
0x14a5   :  { %v2759_v53 = vmul.f32 %v6751_v38, %v2727_v13  ;;  %v2778_v57 = vadd.f32 %v5543_v50, %v2768_v51 }
0x14a6   :  { %v2777_v48 = vadd.f32 %v5543_v50, %v2767_v46  ;;  %v5602_v46 = vld [vmem:[%s7993_s10 + $0x5] ss:$0 sm:$0xff] }
0x14a7   :  { %v2769_v54 = vmul.f32 %v5542_v41, %v2759_v53 }
0x14a8   :  { %v7518_v55 = vpack.c.bf16 %v2777_v48, %v2776_v39 }
0x14a9   :  { %v2779_v59 = vadd.f32 %v5543_v50, %v2769_v54 }
0x14aa   :  { %6317 = vmatprep.mubr.msk.bf16.mxu1 %vm164_vm2, %v7518_v55 }
0x14ab   :  { %v7522_v61 = vpack.c.bf16 %v2779_v59, %v2778_v57 }
0x14ad   :  { %6318 = vmatmul.mubr.msk.bf16.vlgmr.msra.gmra.mxu1 %vm164_vm2, %v7522_v61 }
0x14ae   :  { %6322 = vmatpush3.bf16.msra.mxu1 %v6624_v21  ;;  %6325 = vmatprep.mubr.msk.bf16.mxu1 %vm164_vm2, %v7518_v55 }
0x14af   :  { %6323 = vmatprep.subr.bf16.mxu1 %v6625_v62 }
0x14b2   :  { %6324 = vmatpush3.bf16.msra.mxu1 %v6625_v62 }
0x14b3   :  { %6329 = vmatprep.subr.bf16.mxu1 %v6626_v63 }
0x14b5   :  { %6326 = vmatmul.mubr.msk.bf16.vlgmr.msra.gmra.mxu1 %vm164_vm2, %v7522_v61 }
0x14b6   :  { %6330 = vmatpush3.bf16.msra.mxu1 %v6626_v63  ;;  %6333 = vmatprep.mubr.msk.bf16.mxu1 %vm164_vm2, %v7518_v55 }
0x14b7   :  { %6331 = vmatprep.subr.bf16.mxu1 %v6627_v0 }
0x14ba   :  { %6332 = vmatpush3.bf16.msra.mxu1 %v6627_v0 }
0x14bd   :  { %6334 = vmatmul.mubr.msk.bf16.vlgmr.msra.gmra.mxu1 %vm164_vm2, %v7522_v61 }
0x156d   :  { %v6319_v1 = vpop.f32.mrf.mxu1 }
0x156e   :  { %v2856_v23 = vadd.f32 %v6319_v1, %v5549_v15 }
0x156f   :  { %v2847_v10 = vpop.f32.mrf.mxu1 }
0x1570   :  { %v2848_v2 = vadd.f32 %v5549_v15, %v2847_v10 }
0x1571   :  { %v6320_v3 = vpop.f32.mrf.mxu1 }
0x1572   :  { %6345 = vmatprep.mubr.msk.f32.mxu1 %vm462_vm3, %v2848_v2  ;;  %v2859_v25 = vadd.f32 %v6320_v3, %v5549_v15 }
0x1573   :  { %v2850_v4 = vpop.f32.mrf.mxu1 }
0x1574   :  { %v2851_v52 = vadd.f32 %v5549_v15, %v2850_v4 }
0x1575   :  { %v6327_v5 = vpop.f32.mrf.mxu1 }
0x1576   :  { %v2930_v7 = vadd.f32 %v6327_v5, %v5559_v24 }
0x1577   :  { %v2921_v28 = vpop.f32.mrf.mxu1 }
0x1578   :  { %v2922_v49 = vadd.f32 %v5559_v24, %v2921_v28 }
0x1579   :  { %v6328_v8 = vpop.f32.mrf.mxu1 }
0x157a   :  { %v2933_v40 = vadd.f32 %v6328_v8, %v5559_v24 }
0x157b   :  { %v2924_v11 = vpop.f32.mrf.mxu1 }
0x157c   :  { %6337 = vmatprep.subr.msk.mxu1 %vm462_vm3, %v2933_v40  ;;  %v2925_v14 = vadd.f32 %v5559_v24, %v2924_v11 }
0x157d   :  { %v6335_v12 = vpop.f32.mrf.mxu1  ;;  %6338 = vmatpush3.xpose.msk.msra.mxu1 %vm462_vm3, %v2933_v40 }
0x157e   :  { %6339 = vmatprep.subr.msk.mxu1 %vm462_vm3, %v2930_v7  ;;  %v3004_v18 = vadd.f32 %v6335_v12, %v5569_v17 }
0x157f   :  { %v2995_v35 = vpop.f32.mrf.mxu1 }
0x1580   :  { %v2996_v21 = vadd.f32 %v5569_v17, %v2995_v35 }
0x1581   :  { %v6336_v13 = vpop.f32.mrf.mxu1  ;;  %6340 = vmatpush3.xpose.msk.msra.mxu1 %vm462_vm3, %v2930_v7 }
0x1582   :  { %v3007_v47 = vadd.f32 %v6336_v13, %v5569_v17  ;;  %6341 = vmatprep.subr.msk.mxu1 %vm462_vm3, %v2925_v14 }
0x1583   :  { %v2998_v16 = vpop.f32.mrf.mxu1 }
0x1584   :  { %6351 = vmatprep.subr.mxu0 %v3007_v47  ;;  %v2999_v19 = vadd.f32 %v5569_v17, %v2998_v16  ;;  %v6630_v17 = vld [vmem:[%s8022_s23 + $0x58] sm:$0xff]  }
0x1585   :  { %6342 = vmatpush3.xpose.msk.msra.mxu1 %vm462_vm3, %v2925_v14  ;;  %6352 = vmatpush3.msra.mxu0 %v3007_v47 }
0x1586   :  { %6343 = vmatprep.subr.msk.mxu1 %vm462_vm3, %v2922_v49  ;;  %6353 = vmatprep.subr.mxu0 %v3004_v18 }
0x1587   :  { %6354 = vmatpush3.msra.mxu0 %v3004_v18 }
0x1588   :  { %6355 = vmatprep.subr.mxu0 %v2999_v19 }
0x1589   :  { %6344 = vmatpush3.xpose.msk.msra.mxu1 %vm462_vm3, %v2922_v49  ;;  %6356 = vmatpush3.msra.mxu0 %v2999_v19 }
0x158a   :  { %6357 = vmatprep.subr.mxu0 %v2996_v21  ;;  %6373 = vmatprep.subr.bf16.mxu1 %v6628_v20 }
0x158b   :  { %6358 = vmatpush3.msra.mxu0 %v2996_v21 }
0x158c   :  { %6346 = vmatmul.mubr.msk.f32.vlgmr.msra.gmra.mxu1 %vm462_vm3, %v2851_v52  ;;  %6365 = vmatprep.subr.bf16.mxu0 %v6630_v17  ;;  %v6631_v52 = vld [vmem:[%s8022_s23 + $0x50] sm:$0xff]  }
0x158d   :  { %6348 = vmatprep.mubr.msk.f32.mxu1 %vm462_vm3, %v2856_v23  ;;  %6374 = vmatpush3.bf16.msra.mxu1 %v6628_v20 }
0x158e   :  { %6375 = vmatprep.subr.bf16.mxu1 %v6629_v22 }
0x1590   :  { %6349 = vmatmul.mubr.msk.f32.gmra.mxu1 %vm462_vm3, %v2859_v25 }
0x1591   :  { %6376 = vmatpush3.bf16.msra.mxu1 %v6629_v22  ;;  %6377 = vmatprep.mubr.msk.bf16.mxu1 %vm164_vm2, %v7518_v55 }
0x1594   :  { %6378 = vmatmul.mubr.msk.bf16.vlgmr.msra.gmra.mxu1 %vm164_vm2, %v7522_v61 }
0x164c   :  { %v6347_v26 = vpop.f32.mrf.mxu1 }
0x164d   :  { %v3106_v27 = vadd.f32 %v7577_v56, %v6347_v26 }
0x164e   :  { %v3100_v29 = vpop.f32.mrf.mxu1 }
0x164f   :  { %v3101_v31 = vadd.f32 %v7583_v30, %v3100_v29  ;;  %v3122_v32 = vsel %vm164_vm2, %v3106_v27, -inf  ;;  %v6633_v29 = vld [vmem:[%s7991_s8 + $0x50] sm:$0xff]  }
0x1650   :  { %3123 = vmax.xlane.f32.xlu1 %v3122_v32  ;;  %v6350_v34 = vpop.f32.mrf.mxu1 }
0x1651   :  { %v3116_v9 = vadd.f32 %v7590_v36, %v6350_v34  ;;  %v3119_v41 = vsel %vm164_vm2, %v3101_v31, -inf }
0x1652   :  { %v3110_v42 = vpop.f32.mrf.mxu1  ;;  %3120 = vmax.xlane.f32.xlu0 %v3119_v41 }
0x1653   :  { %v3111_v43 = vadd.f32 %v7597_v44, %v3110_v42  ;;  %v3128_v37 = vsel %vm164_vm2, %v3116_v9, -inf }
0x1654   :  { %3129 = vmax.xlane.f32.xlu1 %v3128_v37  ;;  %v6379_v45 = vpop.f32.mrf.mxu1 }
0x1655   :  { %v3125_v50 = vsel %vm164_vm2, %v3111_v43, -inf  ;;  %v3406_v39 = vadd.f32 %v6379_v45, %v5602_v46 }
0x1656   :  { %v3397_v38 = vpop.f32.mrf.mxu1  ;;  %3126 = vmax.xlane.f32.xlu0 %v3125_v50 }
0x1657   :  { %v3398_v57 = vadd.f32 %v5602_v46, %v3397_v38 }
0x1658   :  { %v6380_v51 = vpop.f32.mrf.mxu1 }
0x1659   :  { %v3409_v53 = vadd.f32 %v6380_v51, %v5602_v46 }
0x165a   :  { %v3400_v48 = vpop.f32.mrf.mxu1 }
0x165b   :  { %6389 = vmatprep.subr.msk.mxu1 %vm462_vm3, %v3409_v53  ;;  %v3401_v54 = vadd.f32 %v5602_v46, %v3400_v48 }
0x165c   :  { %6390 = vmatpush3.xpose.msk.msra.mxu1 %vm462_vm3, %v3409_v53  ;;  %v6634_v53 = vld [vmem:[%s7990_s7 + $0x68] sm:$0xff]  }
0x165d   :  { %6391 = vmatprep.subr.msk.mxu1 %vm462_vm3, %v3406_v39 }
0x1660   :  { %6392 = vmatpush3.xpose.msk.msra.mxu1 %vm462_vm3, %v3406_v39 }
0x1661   :  { %6393 = vmatprep.subr.msk.mxu1 %vm462_vm3, %v3401_v54 }
0x1664   :  { %6394 = vmatpush3.xpose.msk.msra.mxu1 %vm462_vm3, %v3401_v54 }
0x1665   :  { %6395 = vmatprep.subr.msk.mxu1 %vm462_vm3, %v3398_v57 }
0x1668   :  { %6396 = vmatpush3.xpose.msk.msra.mxu1 %vm462_vm3, %v3398_v57 }
0x16d9   :  { %v3124_v59 = vpop.xlane.xlu1 %3123 }
0x16da   :  { %v3132_v62 = vsub.f32 %v3106_v27, %v3124_v59  ;;  %v6632_v27 = vld [vmem:[%s7991_s8 + $0x58] sm:$0xff]  }
0x16db   :  { %v3121_v63 = vpop.xlane.xlu0 %3120 }
0x16dc   :  { %v3137_v0 = vmul.f32 1.442695, %v3132_v62  ;;  %v3131_v1 = vsub.f32 %v3101_v31, %v3121_v63  ;;  %v5586_v31 = vld [vmem:[%s7995_s12 + $0x10] sm:$0xf]  ;;  %v5612_v62 = vld [vmem:[%s7994_s11 + $0x5] ss:$0 sm:$0xff] }
0x16dd   :  { %v3130_v15 = vpop.xlane.xlu1 %3129  ;;  %6579 = vmatprep.subr.msk.bf16.mxu1 %vm1198_vm4, %v5586_v31  ;;  %v3805_v51 = vsel %vm1198_vm4, %v5586_v31, 0 }
0x16de   :  { %6752 = vpow2.f32 %v3137_v0  ;;  %v3135_v10 = vmul.f32 1.442695, %v3131_v1  ;;  %v3134_v2 = vsub.f32 %v3116_v9, %v3130_v15 }
0x16df   :  { %v3127_v3 = vpop.xlane.xlu0 %3126 }
0x16e0   :  { %6754 = vpow2.f32 %v3135_v10  ;;  %v3141_v4 = vmul.f32 1.442695, %v3134_v2  ;;  %v3133_v5 = vsub.f32 %v3111_v43, %v3127_v3  ;;  %v5592_v43 = vld [vmem:[%s7992_s9 + $0x5] ss:$0 sm:$0xff] }
0x16e1   :  { %v6635_v2 = vld [vmem:[%s7990_s7 + $0x60] sm:$0xff]  }
0x16e2   :  { %6756 = vpow2.f32 %v3141_v4  ;;  %v3139_v28 = vmul.f32 1.442695, %v3133_v5 }
0x16e4   :  { %6758 = vpow2.f32 %v3139_v28 }
0x16eb   :  { %v6753_v24 = vpop.eup %6752 }
0x16ec   :  { %v3146_v8 = vsel %vm164_vm2, %v6753_v24, 0.0 }
0x16ed   :  { %v6755_v40 = vpop.eup %6754  ;;  %3147 = vadd.xlane.f32.xlu1 %v3146_v8 }
0x16ee   :  { %v3143_v11 = vsel %vm164_vm2, %v6755_v40, 0.0 }
0x16ef   :  { %v6757_v7 = vpop.eup %6756  ;;  %3144 = vadd.xlane.f32.xlu0 %v3143_v11 }
0x16f0   :  { %v3152_v12 = vsel %vm164_vm2, %v6757_v7, 0.0 }
0x16f1   :  { %v6759_v35 = vpop.eup %6758  ;;  %3153 = vadd.xlane.f32.xlu1 %v3152_v12 }
0x16f2   :  { %v3149_v14 = vsel %vm164_vm2, %v6759_v35, 0.0 }
0x16f3   :  { %3150 = vadd.xlane.f32.xlu0 %v3149_v14 }
0x1776   :  { %v3148_v13 = vpop.xlane.xlu1 %3147 }
0x1777   :  { %6760 = vrcp.f32 %v3148_v13 }
0x1778   :  { %v3145_v47 = vpop.xlane.xlu0 %3144 }
0x1779   :  { %6762 = vrcp.f32 %v3145_v47 }
0x177a   :  { %v3154_v16 = vpop.xlane.xlu1 %3153 }
0x177b   :  { %6764 = vrcp.f32 %v3154_v16 }
0x177c   :  { %v3151_v49 = vpop.xlane.xlu0 %3150 }
0x177d   :  { %6766 = vrcp.f32 %v3151_v49 }
0x1784   :  { %v6761_v18 = vpop.eup %6760 }
0x1785   :  { %v3160_v21 = vmul.f32 %v6761_v18, %v6753_v24 }
0x1786   :  { %v6763_v19 = vpop.eup %6762 }
0x1787   :  { %v3159_v20 = vmul.f32 %v6763_v19, %v6755_v40 }
0x1788   :  { %v6765_v22 = vpop.eup %6764 }
0x1789   :  { %6359 = vmatprep.mubr.msk.f32.mxu0 %vm164_vm2, %v3159_v20  ;;  %v3162_v26 = vmul.f32 %v6765_v22, %v6757_v7 }
0x178a   :  { %v6767_v23 = vpop.eup %6766  ;;  %6360 = vmatmul.mubr.msk.f32.vlgmr.msra.gmra.mxu0 %vm164_vm2, %v3160_v21  ;;  %v5649_v21 = vld [vmem:[%s7993_s10 + $0x6] ss:$0 sm:$0xff] }
0x178b   :  { %6366 = vmatpush3.bf16.msra.mxu0 %v6630_v17  ;;  %v3161_v25 = vmul.f32 %v6767_v23, %v6759_v35 }
0x178c   :  { %6367 = vmatprep.subr.bf16.mxu0 %v6631_v52 }
0x178d   :  { %6362 = vmatprep.mubr.msk.f32.mxu0 %vm164_vm2, %v3161_v25 }
0x178e   :  { %6363 = vmatmul.mubr.msk.f32.gmra.mxu0 %vm164_vm2, %v3162_v26 }
0x178f   :  { %6368 = vmatpush3.bf16.msra.mxu0 %v6631_v52  ;;  %6369 = vmatprep.mubr.msk.bf16.mxu0 %vm164_vm2, %v7518_v55 }
0x1790   :  { %6381 = vmatprep.subr.bf16.mxu0 %v6632_v27 }
0x1792   :  { %6370 = vmatmul.mubr.msk.bf16.vlgmr.msra.gmra.mxu0 %vm164_vm2, %v7522_v61 }
0x1793   :  { %6382 = vmatpush3.bf16.msra.mxu0 %v6632_v27  ;;  %6385 = vmatprep.mubr.msk.bf16.mxu0 %vm164_vm2, %v7518_v55 }
0x1794   :  { %6383 = vmatprep.subr.bf16.mxu0 %v6633_v29 }
0x1797   :  { %6384 = vmatpush3.bf16.msra.mxu0 %v6633_v29 }
0x179a   :  { %6386 = vmatmul.mubr.msk.bf16.vlgmr.msra.gmra.mxu0 %vm164_vm2, %v7522_v61 }
0x184a   :  { %v6361_v32 = vpop.f32.mrf.mxu0 }
0x184c   :  { %v3241_v34 = vpop.f32.mrf.mxu0 }
0x184d   :  { %v3260_v59 = vpack.c.bf16 %v6361_v32, %v3241_v34 }
0x184e   :  { %v6364_v9 = vpop.f32.mrf.mxu0 }
0x1850   :  { %v3251_v41 = vpop.f32.mrf.mxu0 }
0x1851   :  { %v3261_v15 = vpack.c.bf16 %v6364_v9, %v3251_v41 }
0x1852   :  { %v6371_v42 = vpop.f32.mrf.mxu0 }
0x1853   :  { %v3332_v39 = vadd.f32 %v6371_v42, %v5592_v43 }
0x1854   :  { %v3323_v37 = vpop.f32.mrf.mxu0 }
0x1855   :  { %v3324_v45 = vadd.f32 %v5592_v43, %v3323_v37 }
0x1856   :  { %v6372_v50 = vpop.f32.mrf.mxu0 }
0x1857   :  { %6397 = vmatprep.mubr.msk.f32.mxu1 %vm462_vm3, %v3324_v45  ;;  %v3335_v57 = vadd.f32 %v6372_v50, %v5592_v43 }
0x1858   :  { %v3326_v38 = vpop.f32.mrf.mxu0 }
0x1859   :  { %v3327_v46 = vadd.f32 %v5592_v43, %v3326_v38 }
0x185a   :  { %v6387_v48 = vpop.f32.mrf.mxu0 }
0x185b   :  { %6398 = vmatmul.mubr.msk.f32.vlgmr.msra.gmra.mxu1 %vm462_vm3, %v3327_v46  ;;  %v3480_v10 = vadd.f32 %v6387_v48, %v5612_v62 }
0x185c   :  { %v3471_v54 = vpop.f32.mrf.mxu0  ;;  %6400 = vmatprep.mubr.msk.f32.mxu1 %vm462_vm3, %v3332_v39  ;;  %6424 = vmatpush3.bf16.msra.mxu1 %v3805_v51 }
0x185d   :  { %6437 = vmatprep.subr.bf16.mxu1 %v6634_v53  ;;  %v3472_v4 = vadd.f32 %v5612_v62, %v3471_v54 }
0x185e   :  { %v6388_v63 = vpop.f32.mrf.mxu0 }
0x185f   :  { %v3483_v0 = vadd.f32 %v6388_v63, %v5612_v62  ;;  %6401 = vmatmul.mubr.msk.f32.gmra.mxu1 %vm462_vm3, %v3335_v57 }
0x1860   :  { %v3474_v1 = vpop.f32.mrf.mxu0  ;;  %6425 = vmatprep.mubr.msk.bf16.mxu1 %vm462_vm3, %v3260_v59 }
0x1861   :  { %6403 = vmatprep.subr.mxu0 %v3483_v0  ;;  %v3475_v3 = vadd.f32 %v5612_v62, %v3474_v1 }
0x1862   :  { %6404 = vmatpush3.msra.mxu0 %v3483_v0 }
0x1863   :  { %6405 = vmatprep.subr.mxu0 %v3480_v10  ;;  %6426 = vmatmul.mubr.msk.bf16.vlgmr.msra.gmra.mxu1 %vm462_vm3, %v3261_v15 }
0x1864   :  { %6406 = vmatpush3.msra.mxu0 %v3480_v10  ;;  %6438 = vmatpush3.bf16.msra.mxu1 %v6634_v53 }
0x1865   :  { %6441 = vmatprep.mubr.msk.bf16.mxu1 %vm164_vm2, %v7518_v55  ;;  %6407 = vmatprep.subr.mxu0 %v3475_v3 }
0x1866   :  { %6408 = vmatpush3.msra.mxu0 %v3475_v3  ;;  %6439 = vmatprep.subr.bf16.mxu1 %v6635_v2 }
0x1867   :  { %6409 = vmatprep.subr.mxu0 %v3472_v4 }
0x1868   :  { %6410 = vmatpush3.msra.mxu0 %v3472_v4  ;;  %6440 = vmatpush3.bf16.msra.mxu1 %v6635_v2 }
0x186b   :  { %6442 = vmatmul.mubr.msk.bf16.vlgmr.msra.gmra.mxu1 %vm164_vm2, %v7522_v61 }
0x191b   :  { %v6399_v5 = vpop.f32.mrf.mxu1 }
0x191c   :  { %v3582_v28 = vadd.f32 %v7577_v56, %v6399_v5 }
0x191d   :  { %v3576_v24 = vpop.f32.mrf.mxu1 }
0x191e   :  { %v3577_v8 = vadd.f32 %v7583_v30, %v3576_v24  ;;  %v3598_v40 = vsel %vm164_vm2, %v3582_v28, -inf }
0x191f   :  { %3599 = vmax.xlane.f32.xlu1 %v3598_v40  ;;  %v6402_v11 = vpop.f32.mrf.mxu1 }
0x1920   :  { %v3592_v7 = vadd.f32 %v7590_v36, %v6402_v11  ;;  %v3595_v12 = vsel %vm164_vm2, %v3577_v8, -inf  ;;  %v6636_v11 = vld [vmem:[%s8022_s23 + $0x68] sm:$0xff]  }
0x1921   :  { %v3586_v35 = vpop.f32.mrf.mxu1  ;;  %3596 = vmax.xlane.f32.xlu0 %v3595_v12 }
0x1922   :  { %v3587_v14 = vadd.f32 %v7597_v44, %v3586_v35  ;;  %v3604_v17 = vsel %vm164_vm2, %v3592_v7, -inf }
0x1923   :  { %3605 = vmax.xlane.f32.xlu1 %v3604_v17  ;;  %v7675_v13 = vpop.f32.mrf.mxu1 }
0x1924   :  { %v3601_v47 = vsel %vm164_vm2, %v3587_v14, -inf }
0x1925   :  { %3602 = vmax.xlane.f32.xlu0 %v3601_v47  ;;  %v7678_v16 = vpop.f32.mrf.mxu1 }
0x1927   :  { %v7680_v49 = vpop.f32.mrf.mxu1 }
0x1929   :  { %v7682_v18 = vpop.f32.mrf.mxu1 }
0x192b   :  { %v6443_v19 = vpop.f32.mrf.mxu1 }
0x192c   :  { %v3998_v23 = vadd.f32 %v6443_v19, %v5649_v21  ;;  %v6637_v19 = vld [vmem:[%s8022_s23 + $0x60] sm:$0xff]  }
0x192d   :  { %v3989_v20 = vpop.f32.mrf.mxu1 }
0x192e   :  { %v3990_v27 = vadd.f32 %v5649_v21, %v3989_v20  ;;  %v6638_v20 = vld [vmem:[%s7991_s8 + $0x68] sm:$0xff]  }
0x192f   :  { %v6444_v52 = vpop.f32.mrf.mxu1 }
0x1930   :  { %v4001_v22 = vadd.f32 %v6444_v52, %v5649_v21  ;;  %v6640_v52 = vld [vmem:[%s8022_s23 + $0x78] sm:$0xff]  }
0x1931   :  { %v3992_v25 = vpop.f32.mrf.mxu1 }
0x1932   :  { %6453 = vmatprep.subr.msk.mxu1 %vm462_vm3, %v4001_v22  ;;  %v3993_v26 = vadd.f32 %v5649_v21, %v3992_v25  ;;  %v6639_v21 = vld [vmem:[%s7991_s8 + $0x60] sm:$0xff]  }
0x1933   :  { %6454 = vmatpush3.xpose.msk.msra.mxu1 %vm462_vm3, %v4001_v22 }
0x1934   :  { %6455 = vmatprep.subr.msk.mxu1 %vm462_vm3, %v3998_v23 }
0x1937   :  { %6456 = vmatpush3.xpose.msk.msra.mxu1 %vm462_vm3, %v3998_v23 }
0x1938   :  { %6457 = vmatprep.subr.msk.mxu1 %vm462_vm3, %v3993_v26 }
0x193b   :  { %6458 = vmatpush3.xpose.msk.msra.mxu1 %vm462_vm3, %v3993_v26 }
0x193c   :  { %6459 = vmatprep.subr.msk.mxu1 %vm462_vm3, %v3990_v27 }
0x193f   :  { %6460 = vmatpush3.xpose.msk.msra.mxu1 %vm462_vm3, %v3990_v27 }
0x1940   :  { %6487 = vmatprep.subr.bf16.mxu1 %v6640_v52 }
0x19a8   :  { %v3600_v29 = vpop.xlane.xlu1 %3599 }
0x19a9   :  { %v3608_v31 = vsub.f32 %v3582_v28, %v3600_v29  ;;  %v5639_v29 = vld [vmem:[%s7992_s9 + $0x6] ss:$0 sm:$0xff] }
0x19aa   :  { %v3597_v32 = vpop.xlane.xlu0 %3596 }
0x19ab   :  { %v3613_v34 = vmul.f32 1.442695, %v3608_v31  ;;  %v3607_v9 = vsub.f32 %v3577_v8, %v3597_v32  ;;  %v5629_v8 = vld [vmem:[%s7995_s12 + $0x14] sm:$0xf] }
0x19ac   :  { %v3606_v41 = vpop.xlane.xlu1 %3605  ;;  %6578 = vmatprep.subr.msk.bf16.mxu0 %vm1198_vm4, %v5629_v8  ;;  %v3747_v40 = vsel %vm1198_vm4, %v5629_v8, 0 }
0x19ad   :  { %6768 = vpow2.f32 %v3613_v34  ;;  %v3611_v42 = vmul.f32 1.442695, %v3607_v9  ;;  %v3610_v43 = vsub.f32 %v3592_v7, %v3606_v41 }
0x19ae   :  { %v3603_v37 = vpop.xlane.xlu0 %3602 }
0x19af   :  { %6770 = vpow2.f32 %v3611_v42  ;;  %v3617_v45 = vmul.f32 1.442695, %v3610_v43  ;;  %v3609_v50 = vsub.f32 %v3587_v14, %v3603_v37  ;;  %v6641_v42 = vld [vmem:[%s8022_s23 + $0x70] sm:$0xff]  }
0x19b1   :  { %6772 = vpow2.f32 %v3617_v45  ;;  %v3615_v38 = vmul.f32 1.442695, %v3609_v50 }
0x19b3   :  { %6774 = vpow2.f32 %v3615_v38  ;;  %v6642_v38 = vld [vmem:[%s7991_s8 + $0x78] sm:$0xff]  }
0x19ba   :  { %v6769_v46 = vpop.eup %6768 }
0x19bb   :  { %v3622_v51 = vsel %vm164_vm2, %v6769_v46, 0.0 }
0x19bc   :  { %v6771_v53 = vpop.eup %6770  ;;  %3623 = vadd.xlane.f32.xlu1 %v3622_v51 }
0x19bd   :  { %v3619_v39 = vsel %vm164_vm2, %v6771_v53, 0.0 }
0x19be   :  { %v6773_v48 = vpop.eup %6772  ;;  %3620 = vadd.xlane.f32.xlu0 %v3619_v39 }
0x19bf   :  { %v3628_v54 = vsel %vm164_vm2, %v6773_v48, 0.0 }
0x19c0   :  { %v6775_v57 = vpop.eup %6774  ;;  %3629 = vadd.xlane.f32.xlu1 %v3628_v54  ;;  %v6643_v54 = vld [vmem:[%s7991_s8 + $0x70] sm:$0xff]  }
0x19c1   :  { %v3625_v59 = vsel %vm164_vm2, %v6775_v57, 0.0 }
0x19c2   :  { %3626 = vadd.xlane.f32.xlu0 %v3625_v59 }
0x1a45   :  { %v3624_v62 = vpop.xlane.xlu1 %3623 }
0x1a46   :  { %6776 = vrcp.f32 %v3624_v62 }
0x1a47   :  { %v3621_v63 = vpop.xlane.xlu0 %3620 }
0x1a48   :  { %6778 = vrcp.f32 %v3621_v63 }
0x1a49   :  { %v3630_v0 = vpop.xlane.xlu1 %3629 }
0x1a4a   :  { %6780 = vrcp.f32 %v3630_v0 }
0x1a4b   :  { %v3627_v1 = vpop.xlane.xlu0 %3626 }
0x1a4c   :  { %6782 = vrcp.f32 %v3627_v1 }
0x1a53   :  { %v6777_v15 = vpop.eup %6776 }
0x1a54   :  { %v3636_v3 = vmul.f32 %v6777_v15, %v6769_v46  ;;  %v5659_v46 = vld [vmem:[%s7994_s11 + $0x6] ss:$0 sm:$0xff] }
0x1a55   :  { %v6779_v10 = vpop.eup %6778 }
0x1a56   :  { %v3635_v2 = vmul.f32 %v6779_v10, %v6771_v53 }
0x1a57   :  { %v6781_v4 = vpop.eup %6780 }
0x1a58   :  { %6411 = vmatprep.mubr.msk.f32.mxu0 %vm164_vm2, %v3635_v2  ;;  %v3638_v24 = vmul.f32 %v6781_v4, %v6773_v48 }
0x1a59   :  { %v6783_v5 = vpop.eup %6782  ;;  %6412 = vmatmul.mubr.msk.f32.vlgmr.msra.gmra.mxu0 %vm164_vm2, %v3636_v3 }
0x1a5a   :  { %v3637_v28 = vmul.f32 %v6783_v5, %v6775_v57  ;;  %6418 = vmatpush3.bf16.msra.mxu0 %v3747_v40  ;;  %v7776_v5 = vld [vmem:[%s7992_s9 + $0x7] ss:$0 sm:$0xff] }
0x1a5b   :  { %6429 = vmatprep.subr.bf16.mxu0 %v6636_v11 }
0x1a5c   :  { %6414 = vmatprep.mubr.msk.f32.mxu0 %vm164_vm2, %v3637_v28 }
0x1a5d   :  { %6415 = vmatmul.mubr.msk.f32.gmra.mxu0 %vm164_vm2, %v3638_v24 }
0x1b19   :  { %v6413_v7 = vpop.f32.mrf.mxu0 }
0x1b1b   :  { %v3717_v12 = vpop.f32.mrf.mxu0 }
0x1b1c   :  { %v3736_v35 = vpack.c.bf16 %v6413_v7, %v3717_v12 }
0x1b1d   :  { %v6416_v14 = vpop.f32.mrf.mxu0 }
0x1b1e   :  { %6419 = vmatprep.mubr.msk.bf16.mxu0 %vm462_vm3, %v3736_v35 }
0x1b1f   :  { %v3727_v17 = vpop.f32.mrf.mxu0 }
0x1b20   :  { %v3737_v47 = vpack.c.bf16 %v6416_v14, %v3727_v17 }
0x1b22   :  { %6420 = vmatmul.mubr.msk.bf16.vlgmr.msra.gmra.mxu0 %vm462_vm3, %v3737_v47 }
0x1b23   :  { %6430 = vmatpush3.bf16.msra.mxu0 %v6636_v11  ;;  %6433 = vmatprep.mubr.msk.bf16.mxu0 %vm164_vm2, %v7518_v55 }
0x1b24   :  { %6431 = vmatprep.subr.bf16.mxu0 %v6637_v19 }
0x1b27   :  { %6432 = vmatpush3.bf16.msra.mxu0 %v6637_v19 }
0x1b28   :  { %6445 = vmatprep.subr.bf16.mxu0 %v6638_v20 }
0x1b2a   :  { %6434 = vmatmul.mubr.msk.bf16.vlgmr.msra.gmra.mxu0 %vm164_vm2, %v7522_v61 }
0x1b2b   :  { %6446 = vmatpush3.bf16.msra.mxu0 %v6638_v20  ;;  %6449 = vmatprep.mubr.msk.bf16.mxu0 %vm164_vm2, %v7518_v55  ;;  %v5704_v20 = vld [vmem:[%s7994_s11 + $0x7] ss:$0 sm:$0xff] }
0x1b2c   :  { %6447 = vmatprep.subr.bf16.mxu0 %v6639_v21 }
0x1b2f   :  { %6448 = vmatpush3.bf16.msra.mxu0 %v6639_v21 }
0x1b32   :  { %6450 = vmatmul.mubr.msk.bf16.vlgmr.msra.gmra.mxu0 %vm164_vm2, %v7522_v61 }
0x1be2   :  { %v7733_v22 = vpop.f32.mrf.mxu0 }
0x1be4   :  { %v7735_v23 = vpop.f32.mrf.mxu0 }
0x1be6   :  { %v7737_v25 = vpop.f32.mrf.mxu0 }
0x1be8   :  { %v7739_v26 = vpop.f32.mrf.mxu0 }
0x1bea   :  { %v6435_v27 = vpop.f32.mrf.mxu0 }
0x1beb   :  { %v3924_v43 = vadd.f32 %v6435_v27, %v5639_v29 }
0x1bec   :  { %v3915_v31 = vpop.f32.mrf.mxu0 }
0x1bed   :  { %v3916_v32 = vadd.f32 %v5639_v29, %v3915_v31 }
0x1bee   :  { %v6436_v34 = vpop.f32.mrf.mxu0 }
0x1bef   :  { %6461 = vmatprep.mubr.msk.f32.mxu1 %vm462_vm3, %v3916_v32  ;;  %v3927_v50 = vadd.f32 %v6436_v34, %v5639_v29 }
0x1bf0   :  { %v3918_v9 = vpop.f32.mrf.mxu0 }
0x1bf1   :  { %v3919_v41 = vadd.f32 %v5639_v29, %v3918_v9 }
0x1bf2   :  { %v6451_v37 = vpop.f32.mrf.mxu0 }
0x1bf3   :  { %6462 = vmatmul.mubr.msk.f32.vlgmr.msra.gmra.mxu1 %vm462_vm3, %v3919_v41  ;;  %v4072_v48 = vadd.f32 %v6451_v37, %v5659_v46 }
0x1bf4   :  { %v4063_v45 = vpop.f32.mrf.mxu0  ;;  %6464 = vmatprep.mubr.msk.f32.mxu1 %vm462_vm3, %v3924_v43  ;;  %6488 = vmatpush3.bf16.msra.mxu1 %v6640_v52 }
0x1bf5   :  { %6489 = vmatprep.subr.bf16.mxu1 %v6641_v42  ;;  %v4064_v59 = vadd.f32 %v5659_v46, %v4063_v45 }
0x1bf6   :  { %v6452_v51 = vpop.f32.mrf.mxu0 }
0x1bf7   :  { %v4075_v53 = vadd.f32 %v6452_v51, %v5659_v46  ;;  %6465 = vmatmul.mubr.msk.f32.gmra.mxu1 %vm462_vm3, %v3927_v50 }
0x1bf8   :  { %v4066_v39 = vpop.f32.mrf.mxu0  ;;  %6490 = vmatpush3.bf16.msra.mxu1 %v6641_v42  ;;  %6491 = vmatprep.mubr.msk.bf16.mxu1 %vm164_vm2, %v7518_v55 }
0x1bf9   :  { %6467 = vmatprep.subr.mxu0 %v4075_v53  ;;  %6503 = vmatprep.subr.bf16.mxu1 %v6642_v38  ;;  %v4067_v57 = vadd.f32 %v5659_v46, %v4066_v39 }
0x1bfa   :  { %6468 = vmatpush3.msra.mxu0 %v4075_v53 }
0x1bfb   :  { %6469 = vmatprep.subr.mxu0 %v4072_v48  ;;  %6492 = vmatmul.mubr.msk.bf16.vlgmr.msra.gmra.mxu1 %vm164_vm2, %v7522_v61 }
0x1bfc   :  { %6470 = vmatpush3.msra.mxu0 %v4072_v48  ;;  %6504 = vmatpush3.bf16.msra.mxu1 %v6642_v38 }
0x1bfd   :  { %6507 = vmatprep.mubr.msk.bf16.mxu1 %vm164_vm2, %v7518_v55  ;;  %6471 = vmatprep.subr.mxu0 %v4067_v57 }
0x1bfe   :  { %6472 = vmatpush3.msra.mxu0 %v4067_v57  ;;  %6505 = vmatprep.subr.bf16.mxu1 %v6643_v54 }
0x1bff   :  { %6473 = vmatprep.subr.mxu0 %v4064_v59 }
0x1c00   :  { %6474 = vmatpush3.msra.mxu0 %v4064_v59  ;;  %6506 = vmatpush3.bf16.msra.mxu1 %v6643_v54 }
0x1c03   :  { %6508 = vmatmul.mubr.msk.bf16.vlgmr.msra.gmra.mxu1 %vm164_vm2, %v7522_v61 }
0x1cb3   :  { %v6463_v62 = vpop.f32.mrf.mxu1 }
0x1cb4   :  { %v4174_v63 = vadd.f32 %v7577_v56, %v6463_v62 }
0x1cb5   :  { %v4168_v0 = vpop.f32.mrf.mxu1 }
0x1cb6   :  { %v4169_v1 = vadd.f32 %v7583_v30, %v4168_v0  ;;  %v4190_v15 = vsel %vm164_vm2, %v4174_v63, -inf }
0x1cb7   :  { %4191 = vmax.xlane.f32.xlu1 %v4190_v15  ;;  %v6466_v10 = vpop.f32.mrf.mxu1 }
0x1cb8   :  { %v4184_v2 = vadd.f32 %v7590_v36, %v6466_v10  ;;  %v4187_v3 = vsel %vm164_vm2, %v4169_v1, -inf }
0x1cb9   :  { %v4178_v4 = vpop.f32.mrf.mxu1  ;;  %4188 = vmax.xlane.f32.xlu0 %v4187_v3 }
0x1cba   :  { %v4179_v28 = vadd.f32 %v7597_v44, %v4178_v4  ;;  %v4196_v24 = vsel %vm164_vm2, %v4184_v2, -inf }
0x1cbb   :  { %4197 = vmax.xlane.f32.xlu1 %v4196_v24  ;;  %v6493_v8 = vpop.f32.mrf.mxu1 }
0x1cbc   :  { %v7781_v40 = vadd.f32 %v6493_v8, %v7776_v5  ;;  %v4193_v11 = vsel %vm164_vm2, %v4179_v28, -inf }
0x1cbd   :  { %v7784_v7 = vpop.f32.mrf.mxu1  ;;  %4194 = vmax.xlane.f32.xlu0 %v4193_v11 }
0x1cbf   :  { %v6494_v12 = vpop.f32.mrf.mxu1 }
0x1cc0   :  { %v7787_v35 = vadd.f32 %v6494_v12, %v7776_v5 }
0x1cc1   :  { %v4456_v14 = vpop.f32.mrf.mxu1 }
0x1cc2   :  { %v7790_v17 = vadd.f32 %v7776_v5, %v4456_v14 }
0x1cc3   :  { %v6509_v47 = vpop.f32.mrf.mxu1 }
0x1cc4   :  { %v4610_v29 = vadd.f32 %v6509_v47, %v5704_v20  ;;  %v5676_v47 = vld [vmem:[%s7995_s12 + $0x18] sm:$0xf] }
0x1cc5   :  { %v4601_v19 = vpop.f32.mrf.mxu1  ;;  %6580 = vmatprep.subr.msk.bf16.mxu0 %vm1198_vm4, %v5676_v47 }
0x1cc6   :  { %v4602_v32 = vadd.f32 %v5704_v20, %v4601_v19  ;;  %v4339_v19 = vsel %vm1198_vm4, %v5676_v47, 0 }
0x1cc7   :  { %v6510_v21 = vpop.f32.mrf.mxu1 }
0x1cc8   :  { %v4613_v52 = vadd.f32 %v6510_v21, %v5704_v20 }
0x1cc9   :  { %v4604_v27 = vpop.f32.mrf.mxu1 }
0x1cca   :  { %6525 = vmatprep.subr.mxu1 %v4613_v52  ;;  %v4605_v31 = vadd.f32 %v5704_v20, %v4604_v27  ;;  %v6644_v20 = vld [vmem:[%s7990_s7 + $0x78] sm:$0xff]  }
0x1ccb   :  { %6526 = vmatpush3.msra.mxu1 %v4613_v52 }
0x1ccc   :  { %6527 = vmatprep.subr.mxu1 %v4610_v29 }
0x1ccd   :  { %6528 = vmatpush3.msra.mxu1 %v4610_v29 }
0x1cce   :  { %6529 = vmatprep.subr.mxu1 %v4605_v31 }
0x1ccf   :  { %6530 = vmatpush3.msra.mxu1 %v4605_v31 }
0x1cd0   :  { %6531 = vmatprep.subr.mxu1 %v4602_v32 }
0x1cd1   :  { %6532 = vmatpush3.msra.mxu1 %v4602_v32 }
0x1d40   :  { %v4192_v34 = vpop.xlane.xlu1 %4191 }
0x1d41   :  { %v4200_v9 = vsub.f32 %v4174_v63, %v4192_v34  ;;  %v6645_v34 = vld [vmem:[%s7990_s7 + $0x70] sm:$0xff]  }
0x1d42   :  { %v4189_v41 = vpop.xlane.xlu0 %4188 }
0x1d43   :  { %v4205_v42 = vmul.f32 1.442695, %v4200_v9  ;;  %v4199_v43 = vsub.f32 %v4169_v1, %v4189_v41  ;;  %v4454_v9 = vadd.f32 %v7776_v5, %v7784_v7  ;;  %v3850_v41 = vadd.f32 %v7675_v13, %v7733_v22 }
0x1d44   :  { %v4198_v37 = vpop.xlane.xlu1 %4197 }
0x1d45   :  { %6784 = vpow2.f32 %v4205_v42  ;;  %v4203_v45 = vmul.f32 1.442695, %v4199_v43  ;;  %v4202_v50 = vsub.f32 %v4184_v2, %v4198_v37  ;;  %v3842_v43 = vadd.f32 %v7678_v16, %v7735_v23  ;;  %v5694_v16 = vld [vmem:[%s7993_s10 + $0x7] ss:$0 sm:$0xff] }
0x1d46   :  { %v4195_v38 = vpop.xlane.xlu0 %4194 }
0x1d47   :  { %6786 = vpow2.f32 %v4203_v45  ;;  %v4209_v46 = vmul.f32 1.442695, %v4202_v50  ;;  %v4201_v51 = vsub.f32 %v4179_v28, %v4195_v38  ;;  %v3853_v45 = vadd.f32 %v7680_v49, %v7737_v25 }
0x1d49   :  { %6788 = vpow2.f32 %v4209_v46  ;;  %v4207_v53 = vmul.f32 1.442695, %v4201_v51 }
0x1d4b   :  { %6790 = vpow2.f32 %v4207_v53 }
0x1d52   :  { %v6785_v39 = vpop.eup %6784 }
0x1d53   :  { %v4214_v48 = vsel %vm164_vm2, %v6785_v39, 0.0 }
0x1d54   :  { %v6787_v54 = vpop.eup %6786  ;;  %4215 = vadd.xlane.f32.xlu1 %v4214_v48 }
0x1d55   :  { %v4211_v57 = vsel %vm164_vm2, %v6787_v54, 0.0 }
0x1d56   :  { %v6789_v59 = vpop.eup %6788  ;;  %4212 = vadd.xlane.f32.xlu0 %v4211_v57 }
0x1d57   :  { %v4220_v62 = vsel %vm164_vm2, %v6789_v59, 0.0 }
0x1d58   :  { %v6791_v63 = vpop.eup %6790  ;;  %4221 = vadd.xlane.f32.xlu1 %v4220_v62 }
0x1d59   :  { %v4217_v0 = vsel %vm164_vm2, %v6791_v63, 0.0 }
0x1d5a   :  { %4218 = vadd.xlane.f32.xlu0 %v4217_v0 }
0x1ddd   :  { %v4216_v1 = vpop.xlane.xlu1 %4215 }
0x1dde   :  { %6792 = vrcp.f32 %v4216_v1 }
0x1ddf   :  { %v4213_v15 = vpop.xlane.xlu0 %4212 }
0x1de0   :  { %6794 = vrcp.f32 %v4213_v15 }
0x1de1   :  { %v4222_v10 = vpop.xlane.xlu1 %4221 }
0x1de2   :  { %6796 = vrcp.f32 %v4222_v10 }
0x1de3   :  { %v4219_v2 = vpop.xlane.xlu0 %4218 }
0x1de4   :  { %6798 = vrcp.f32 %v4219_v2 }
0x1deb   :  { %v6793_v3 = vpop.eup %6792 }
0x1dec   :  { %v4228_v24 = vmul.f32 %v6793_v3, %v6785_v39 }
0x1ded   :  { %v6795_v4 = vpop.eup %6794 }
0x1dee   :  { %v4227_v28 = vmul.f32 %v6795_v4, %v6787_v54 }
0x1def   :  { %v6797_v8 = vpop.eup %6796 }
0x1df0   :  { %6475 = vmatprep.mubr.msk.f32.mxu0 %vm164_vm2, %v4227_v28  ;;  %v4230_v14 = vmul.f32 %v6797_v8, %v6789_v59 }
0x1df1   :  { %v6799_v11 = vpop.eup %6798  ;;  %6476 = vmatmul.mubr.msk.f32.vlgmr.msra.gmra.mxu0 %vm164_vm2, %v4228_v24 }
0x1df2   :  { %v4229_v12 = vmul.f32 %v6799_v11, %v6791_v63  ;;  %6482 = vmatpush3.bf16.msra.mxu0 %v4339_v19 }
0x1df3   :  { %6495 = vmatprep.subr.bf16.mxu0 %v6644_v20 }
0x1df4   :  { %6478 = vmatprep.mubr.msk.f32.mxu0 %vm164_vm2, %v4229_v12 }
0x1df5   :  { %6479 = vmatmul.mubr.msk.f32.gmra.mxu0 %vm164_vm2, %v4230_v14 }
0x1eb1   :  { %v6477_v21 = vpop.f32.mrf.mxu0 }
0x1eb3   :  { %v4309_v52 = vpop.f32.mrf.mxu0 }
0x1eb4   :  { %v4328_v27 = vpack.c.bf16 %v6477_v21, %v4309_v52 }
0x1eb5   :  { %v6480_v29 = vpop.f32.mrf.mxu0 }
0x1eb6   :  { %6483 = vmatprep.mubr.msk.bf16.mxu0 %vm462_vm3, %v4328_v27 }
0x1eb7   :  { %v4319_v31 = vpop.f32.mrf.mxu0 }
0x1eb8   :  { %v4329_v32 = vpack.c.bf16 %v6480_v29, %v4319_v31 }
0x1eba   :  { %6484 = vmatmul.mubr.msk.bf16.vlgmr.msra.gmra.mxu0 %vm462_vm3, %v4329_v32 }
0x1ebb   :  { %6496 = vmatpush3.bf16.msra.mxu0 %v6644_v20  ;;  %6499 = vmatprep.mubr.msk.bf16.mxu0 %vm164_vm2, %v7518_v55 }
0x1ebc   :  { %6497 = vmatprep.subr.bf16.mxu0 %v6645_v34 }
0x1ebf   :  { %6498 = vmatpush3.bf16.msra.mxu0 %v6645_v34 }
0x1ec2   :  { %6500 = vmatmul.mubr.msk.bf16.vlgmr.msra.gmra.mxu0 %vm164_vm2, %v7522_v61  ;;  %v3845_v61 = vadd.f32 %v7682_v18, %v7739_v26 }
0x1ec3   :  { %6519 = vmatprep.mubr.msk.f32.mxu0 %vm462_vm3, %v4454_v9 }
0x1f7a   :  { %v6485_v42 = vpop.f32.mrf.mxu0 }
0x1f7b   :  { %v7827_v37 = vadd.f32 %v6485_v42, %v3850_v41 }
0x1f7c   :  { %v4375_v55 = vpop.f32.mrf.mxu0 }
0x1f7d   :  { %v7831_v50 = vadd.f32 %v4375_v55, %v3842_v43 }
0x1f7e   :  { %v6486_v5 = vpop.f32.mrf.mxu0 }
0x1f7f   :  { %v7835_v7 = vadd.f32 %v6486_v5, %v3853_v45  ;;  %v5721_v5 = vld [vmem:[%s7995_s12 + $0x1c] sm:$0xf] }
0x1f80   :  { %v4378_v38 = vpop.f32.mrf.mxu0  ;;  %6581 = vmatprep.subr.msk.bf16.mxu1 %vm1198_vm4, %v5721_v5 }
0x1f81   :  { %v7837_v13 = vadd.f32 %v4378_v38, %v3845_v61  ;;  %v4877_v61 = vsel %vm1198_vm4, %v5721_v5, 0 }
0x1f82   :  { %v6501_v22 = vpop.f32.mrf.mxu0 }
0x1f83   :  { %v4536_v49 = vadd.f32 %v6501_v22, %v5694_v16 }
0x1f84   :  { %v4527_v46 = vpop.f32.mrf.mxu0 }
0x1f85   :  { %v4528_v26 = vadd.f32 %v5694_v16, %v4527_v46 }
0x1f86   :  { %v6502_v23 = vpop.f32.mrf.mxu0 }
0x1f87   :  { %v4539_v51 = vadd.f32 %v6502_v23, %v5694_v16 }
0x1f88   :  { %v4530_v25 = vpop.f32.mrf.mxu0 }
0x1f89   :  { %6511 = vmatprep.subr.msk.mxu0 %vm462_vm3, %v4539_v51  ;;  %v4531_v18 = vadd.f32 %v5694_v16, %v4530_v25 }
0x1f8a   :  { %6512 = vmatpush3.xpose.msk.msra.mxu0 %vm462_vm3, %v4539_v51 }
0x1f8b   :  { %6513 = vmatprep.subr.msk.mxu0 %vm462_vm3, %v4536_v49 }
0x1f8e   :  { %6514 = vmatpush3.xpose.msk.msra.mxu0 %vm462_vm3, %v4536_v49 }
0x1f8f   :  { %6515 = vmatprep.subr.msk.mxu0 %vm462_vm3, %v4531_v18 }
0x1f92   :  { %6516 = vmatpush3.xpose.msk.msra.mxu0 %vm462_vm3, %v4531_v18 }
0x1f93   :  { %6517 = vmatprep.subr.msk.mxu0 %vm462_vm3, %v4528_v26 }
0x1f96   :  { %6518 = vmatpush3.xpose.msk.msra.mxu0 %vm462_vm3, %v4528_v26 }
0x1f99   :  { %6520 = vmatmul.mubr.msk.f32.vlgmr.msra.gmra.mxu0 %vm462_vm3, %v7790_v17 }
0x1f9a   :  { %6522 = vmatprep.mubr.msk.f32.mxu0 %vm462_vm3, %v7781_v40 }
0x1f9d   :  { %6523 = vmatmul.mubr.msk.f32.gmra.mxu0 %vm462_vm3, %v7787_v35 }
0x2059   :  { %v6521_v53 = vpop.f32.mrf.mxu0 }
0x205a   :  { %v4712_v39 = vadd.f32 %v7577_v56, %v6521_v53 }
0x205b   :  { %v4706_v48 = vpop.f32.mrf.mxu0 }
0x205c   :  { %v4707_v54 = vadd.f32 %v7583_v30, %v4706_v48  ;;  %v4728_v57 = vsel %vm164_vm2, %v4712_v39, -inf }
0x205d   :  { %4729 = vmax.xlane.f32.xlu1 %v4728_v57  ;;  %v6524_v59 = vpop.f32.mrf.mxu0  ;;  %v5725_v57 = vld [vmem:[%s7996_s13 + $0x1] ss:$0 sm:$0xff] }
0x205e   :  { %v4722_v62 = vadd.f32 %v7590_v36, %v6524_v59  ;;  %v4725_v17 = vsel %vm164_vm2, %v4707_v54, -inf }
0x205f   :  { %v4716_v63 = vpop.f32.mrf.mxu0  ;;  %4726 = vmax.xlane.f32.xlu0 %v4725_v17 }
0x2060   :  { %v4717_v40 = vadd.f32 %v7597_v44, %v4716_v63  ;;  %v4734_v35 = vsel %vm164_vm2, %v4722_v62, -inf }
0x2061   :  { %4735 = vmax.xlane.f32.xlu1 %v4734_v35 }
0x2062   :  { %v4731_v56 = vsel %vm164_vm2, %v4717_v40, -inf }
0x2063   :  { %4732 = vmax.xlane.f32.xlu0 %v4731_v56 }
0x20e6   :  { %v4730_v0 = vpop.xlane.xlu1 %4729 }
0x20e7   :  { %v4738_v30 = vsub.f32 %v4712_v39, %v4730_v0 }
0x20e8   :  { %v4727_v1 = vpop.xlane.xlu0 %4726 }
0x20e9   :  { %v4743_v15 = vmul.f32 1.442695, %v4738_v30  ;;  %v4737_v10 = vsub.f32 %v4707_v54, %v4727_v1 }
0x20ea   :  { %v4736_v2 = vpop.xlane.xlu1 %4735 }
0x20eb   :  { %6800 = vpow2.f32 %v4743_v15  ;;  %v4741_v36 = vmul.f32 1.442695, %v4737_v10  ;;  %v4740_v3 = vsub.f32 %v4722_v62, %v4736_v2 }
0x20ec   :  { %v4733_v4 = vpop.xlane.xlu0 %4732 }
0x20ed   :  { %6802 = vpow2.f32 %v4741_v36  ;;  %v4747_v28 = vmul.f32 1.442695, %v4740_v3  ;;  %v4739_v24 = vsub.f32 %v4717_v40, %v4733_v4 }
0x20ef   :  { %6804 = vpow2.f32 %v4747_v28  ;;  %v4745_v44 = vmul.f32 1.442695, %v4739_v24 }
0x20f1   :  { %6806 = vpow2.f32 %v4745_v44 }
0x20f8   :  { %v6801_v8 = vpop.eup %6800 }
0x20f9   :  { %v4752_v11 = vsel %vm164_vm2, %v6801_v8, 0.0 }
0x20fa   :  { %v6803_v12 = vpop.eup %6802  ;;  %4753 = vadd.xlane.f32.xlu1 %v4752_v11 }
0x20fb   :  { %v4749_v14 = vsel %vm164_vm2, %v6803_v12, 0.0 }
0x20fc   :  { %v6805_v47 = vpop.eup %6804  ;;  %4750 = vadd.xlane.f32.xlu0 %v4749_v14 }
0x20fd   :  { %v4758_v19 = vsel %vm164_vm2, %v6805_v47, 0.0 }
0x20fe   :  { %v6807_v20 = vpop.eup %6806  ;;  %4759 = vadd.xlane.f32.xlu1 %v4758_v19  ;;  %v6646_v19 = vld [vmem:[%s7999_s16 + $0x18] sm:$0xff]  }
0x20ff   :  { %v4755_v21 = vsel %vm164_vm2, %v6807_v20, 0.0  ;;  %6545 = vmatprep.subr.bf16.mxu0 %v6646_v19 }
0x2100   :  { %4756 = vadd.xlane.f32.xlu0 %v4755_v21  ;;  %6546 = vmatpush3.bf16.msra.mxu0 %v6646_v19 }
0x2183   :  { %v4754_v52 = vpop.xlane.xlu1 %4753 }
0x2184   :  { %6808 = vrcp.f32 %v4754_v52 }
0x2185   :  { %v4751_v27 = vpop.xlane.xlu0 %4750 }
0x2186   :  { %6810 = vrcp.f32 %v4751_v27 }
0x2187   :  { %v4760_v29 = vpop.xlane.xlu1 %4759 }
0x2188   :  { %6812 = vrcp.f32 %v4760_v29 }
0x2189   :  { %v4757_v31 = vpop.xlane.xlu0 %4756 }
0x218a   :  { %6814 = vrcp.f32 %v4757_v31 }
0x2191   :  { %v6809_v32 = vpop.eup %6808 }
0x2192   :  { %v4766_v41 = vmul.f32 %v6809_v32, %v6801_v8 }
0x2193   :  { %v6811_v34 = vpop.eup %6810 }
0x2194   :  { %v4765_v9 = vmul.f32 %v6811_v34, %v6803_v12 }
0x2195   :  { %v6813_v42 = vpop.eup %6812 }
0x2196   :  { %6533 = vmatprep.mubr.msk.f32.mxu1 %vm164_vm2, %v4765_v9  ;;  %v4768_v45 = vmul.f32 %v6813_v42, %v6805_v47 }
0x2197   :  { %v6815_v43 = vpop.eup %6814  ;;  %6534 = vmatmul.mubr.msk.f32.vlgmr.msra.gmra.mxu1 %vm164_vm2, %v4766_v41 }
0x2198   :  { %v4767_v55 = vmul.f32 %v6815_v43, %v6807_v20  ;;  %6540 = vmatpush3.bf16.msra.mxu1 %v4877_v61  ;;  %v6647_v20 = vld [vmem:[%s7999_s16 + $0x10] sm:$0xff]   ;;  %v5728_v61 = vld [vmem:[%s7997_s14 + $0x1] ss:$0 sm:$0xff] }
0x2199   :  { %6547 = vmatprep.subr.bf16.mxu0 %v6647_v20 }
0x219a   :  { %6536 = vmatprep.mubr.msk.f32.mxu1 %vm164_vm2, %v4767_v55  ;;  %6548 = vmatpush3.bf16.msra.mxu0 %v6647_v20 }
0x219b   :  { %6537 = vmatmul.mubr.msk.f32.gmra.mxu1 %vm164_vm2, %v4768_v45 }
0x2257   :  { %v6535_v38 = vpop.f32.mrf.mxu1 }
0x2259   :  { %v4847_v22 = vpop.f32.mrf.mxu1 }
0x225a   :  { %v4866_v46 = vpack.c.bf16 %v6535_v38, %v4847_v22 }
0x225b   :  { %v6538_v16 = vpop.f32.mrf.mxu1 }
0x225c   :  { %6541 = vmatprep.mubr.msk.bf16.mxu1 %vm462_vm3, %v4866_v46 }
0x225d   :  { %v4857_v23 = vpop.f32.mrf.mxu1 }
0x225e   :  { %v4867_v51 = vpack.c.bf16 %v6538_v16, %v4857_v23 }
0x2260   :  { %6542 = vmatmul.mubr.msk.bf16.vlgmr.msra.gmra.mxu1 %vm462_vm3, %v4867_v51  ;;  %v5729_v51 = vld [vmem:[%s7998_s15 + $0x1] ss:$0 sm:$0xff] }
0x2320   :  { %v6543_v49 = vpop.f32.mrf.mxu1 }
0x2321   :  { %v4930_v25 = vadd.f32 %v6543_v49, %v7827_v37 }
0x2322   :  { %v4913_v18 = vpop.f32.mrf.mxu1 }
0x2323   :  { %v4928_v26 = vadd.f32 %v4913_v18, %v7831_v50  ;;  %v4934_v39 = vadd.f32 %v4930_v25, %v7479_v60 }
0x2324   :  { %v6544_v53 = vpop.f32.mrf.mxu1 }
0x2325   :  { %v4932_v48 = vadd.f32 %v4928_v26, %v7477_v58  ;;  %v4931_v54 = vadd.f32 %v6544_v53, %v7835_v7  ;;  %v7890_v37 = vadd.f32 %v5725_v57, %v4934_v39 }
0x2326   :  { %v4916_v59 = vpop.f32.mrf.mxu1 }
0x2327   :  { %v7887_v62 = vadd.f32 %v5725_v57, %v4932_v48  ;;  %v4929_v17 = vadd.f32 %v4916_v59, %v7837_v13  ;;  %v4935_v50 = vadd.f32 %v4931_v54, %v7487_v6  ;;  %v4958_v13 = vsel %vm164_vm2, %v7890_v37, 0.0 }
0x2329   :  { %v4933_v63 = vadd.f32 %v4929_v17, %v7485_v33  ;;  %v4952_v58 = vsel %vm164_vm2, %v7887_v62, 0.0  ;;  %v7898_v7 = vadd.f32 %v5725_v57, %v4935_v50  ;;  %v6648_v50 = vld [vmem:[%s8001_s18 + $0x78] sm:$0xff]  }
0x232a   :  { %4953 = vadd.xlane.f32.xlu0 %v4952_v58  ;;  %6553 = vmatprep.subr.bf16.mxu1 %v6648_v50  ;;  %v6650_v58 = vld [vmem:[%s8001_s18 + $0x68] sm:$0xff]  }
0x232b   :  { %v7896_v60 = vadd.f32 %v5725_v57, %v4933_v63  ;;  %v4961_v6 = vsel %vm164_vm2, %v7898_v7, 0.0  ;;  %6554 = vmatpush3.bf16.msra.mxu1 %v6648_v50  ;;  %v6649_v63 = vld [vmem:[%s8001_s18 + $0x70] sm:$0xff]  }
0x232c   :  { %6555 = vmatprep.subr.bf16.mxu1 %v6649_v63 }
0x232d   :  { %v4955_v40 = vsel %vm164_vm2, %v7896_v60, 0.0 }
0x232e   :  { %4956 = vadd.xlane.f32.xlu1 %v4955_v40  ;;  %4959 = vadd.xlane.f32.xlu0 %v4958_v13  ;;  %v6651_v40 = vld [vmem:[%s8001_s18 + $0x60] sm:$0xff]   ;;  %v6652_v13 = vld [vmem:[%s8001_s18 + $0x58] sm:$0xff]  }
0x232f   :  { %6556 = vmatpush3.bf16.msra.mxu1 %v6649_v63 }
0x2330   :  { %6557 = vmatprep.subr.bf16.mxu1 %v6650_v58 }
0x2332   :  { %4962 = vadd.xlane.f32.xlu1 %v4961_v6  ;;  %v6653_v6 = vld [vmem:[%s8001_s18 + $0x50] sm:$0xff]  }
0x2333   :  { %6558 = vmatpush3.bf16.msra.mxu1 %v6650_v58 }
0x2334   :  { %6559 = vmatprep.subr.bf16.mxu1 %v6651_v40 }
0x2337   :  { %6560 = vmatpush3.bf16.msra.mxu1 %v6651_v40 }
0x2338   :  { %6561 = vmatprep.subr.bf16.mxu1 %v6652_v13 }
0x233b   :  { %6562 = vmatpush3.bf16.msra.mxu1 %v6652_v13 }
0x233c   :  { %6563 = vmatprep.subr.bf16.mxu1 %v6653_v6 }
0x233f   :  { %6564 = vmatpush3.bf16.msra.mxu1 %v6653_v6 }
0x23b3   :  { %v4954_v33 = vpop.xlane.xlu0 %4953 }
0x23b4   :  { %v4964_v35 = vmul.f32 0.03125, %v4954_v33  ;;  %v6654_v33 = vld [vmem:[%s8001_s18 + $0x48] sm:$0xff]  }
0x23b5   :  { %6565 = vmatprep.subr.bf16.mxu1 %v6654_v33 }
0x23b6   :  { %v4968_v56 = vsub.f32 %v7887_v62, %v4964_v35  ;;  %6566 = vmatpush3.bf16.msra.mxu1 %v6654_v33  ;;  %v6655_v35 = vld [vmem:[%s8001_s18 + $0x40] sm:$0xff]  }
0x23b7   :  { %v4957_v0 = vpop.xlane.xlu1 %4956  ;;  %v4960_v30 = vpop.xlane.xlu0 %4959  ;;  %6567 = vmatprep.subr.bf16.mxu1 %v6655_v35 }
0x23b8   :  { %v4965_v1 = vmul.f32 0.03125, %v4957_v0  ;;  %v4966_v15 = vmul.f32 0.03125, %v4960_v30  ;;  %v4972_v10 = vmul.f32 %v4968_v56, %v4968_v56 }
0x23ba   :  { %v4969_v2 = vsub.f32 %v7896_v60, %v4965_v1  ;;  %v4970_v36 = vsub.f32 %v7890_v37, %v4966_v15  ;;  %v4976_v3 = vsel %vm164_vm2, %v4972_v10, 0.0  ;;  %6568 = vmatpush3.bf16.msra.mxu1 %v6655_v35 }
0x23bb   :  { %v4963_v4 = vpop.xlane.xlu1 %4962  ;;  %4977 = vadd.xlane.f32.xlu0 %v4976_v3 }
0x23bc   :  { %v4967_v28 = vmul.f32 0.03125, %v4963_v4  ;;  %v4973_v24 = vmul.f32 %v4969_v2, %v4969_v2  ;;  %v4974_v44 = vmul.f32 %v4970_v36, %v4970_v36 }
0x23be   :  { %v4971_v8 = vsub.f32 %v7898_v7, %v4967_v28  ;;  %v4979_v11 = vsel %vm164_vm2, %v4973_v24, 0.0  ;;  %v4982_v12 = vsel %vm164_vm2, %v4974_v44, 0.0 }
0x23bf   :  { %4980 = vadd.xlane.f32.xlu1 %v4979_v11  ;;  %4983 = vadd.xlane.f32.xlu0 %v4982_v12 }
0x23c0   :  { %v4975_v14 = vmul.f32 %v4971_v8, %v4971_v8 }
0x23c2   :  { %v4985_v47 = vsel %vm164_vm2, %v4975_v14, 0.0 }
0x23c3   :  { %4986 = vadd.xlane.f32.xlu1 %v4985_v47 }
0x2444   :  { %v4978_v21 = vpop.xlane.xlu0 %4977 }
0x2445   :  { %v4988_v52 = vmul.f32 0.03125, %v4978_v21 }
0x2447   :  { %v4992_v27 = vadd.f32 1e-05, %v4988_v52 }
0x2448   :  { %v4981_v29 = vpop.xlane.xlu1 %4980  ;;  %v4984_v31 = vpop.xlane.xlu0 %4983 }
0x2449   :  { %6816 = vrsqrt.f32 %v4992_v27  ;;  %v4989_v32 = vmul.f32 0.03125, %v4981_v29  ;;  %v4990_v34 = vmul.f32 0.03125, %v4984_v31 }
0x244b   :  { %v4993_v9 = vadd.f32 1e-05, %v4989_v32  ;;  %v4994_v41 = vadd.f32 1e-05, %v4990_v34 }
0x244c   :  { %v4987_v42 = vpop.xlane.xlu1 %4986 }
0x244d   :  { %6818 = vrsqrt.f32 %v4993_v9  ;;  %v4991_v43 = vmul.f32 0.03125, %v4987_v42 }
0x244e   :  { %6820 = vrsqrt.f32 %v4994_v41 }
0x244f   :  { %v4995_v55 = vadd.f32 1e-05, %v4991_v43 }
0x2451   :  { %6822 = vrsqrt.f32 %v4995_v55 }
0x2456   :  { %v6817_v45 = vpop.eup %6816 }
0x2457   :  { %v5000_v5 = vmul.f32 %v6817_v45, %v4968_v56  ;;  %v5735_v56 = vld [vmem:[%s8000_s17 + $0x1] ss:$0 sm:$0xff] }
0x2459   :  { %v5010_v16 = vmul.f32 %v5728_v61, %v5000_v5 }
0x245a   :  { %v6819_v38 = vpop.eup %6818 }
0x245b   :  { %v6821_v22 = vpop.eup %6820  ;;  %v5001_v46 = vmul.f32 %v6819_v38, %v4969_v2  ;;  %v5020_v53 = vadd.f32 %v5729_v51, %v5010_v16  ;;  %v5765_v38 = vld [vmem:[%s8002_s19 + $0x1] ss:$0 sm:$0xff] }
0x245c   :  { %v5002_v23 = vmul.f32 %v6821_v22, %v4970_v36 }
0x245d   :  { %v5011_v49 = vmul.f32 %v5728_v61, %v5001_v46 }
0x245e   :  { %v6823_v25 = vpop.eup %6822  ;;  %v5012_v26 = vmul.f32 %v5728_v61, %v5002_v23 }
0x245f   :  { %v5003_v18 = vmul.f32 %v6823_v25, %v4971_v8  ;;  %v5021_v39 = vadd.f32 %v5729_v51, %v5011_v49 }
0x2460   :  { %v5022_v57 = vadd.f32 %v5729_v51, %v5012_v26 }
0x2461   :  { %v5013_v48 = vmul.f32 %v5728_v61, %v5003_v18  ;;  %v5024_v54 = vpack.c.bf16 %v5021_v39, %v5020_v53 }
0x2463   :  { %v5023_v59 = vadd.f32 %v5729_v51, %v5013_v48  ;;  %6549 = vmatprep.mubr.msk.bf16.mxu0 %vm164_vm2, %v5024_v54 }
0x2465   :  { %v5025_v17 = vpack.c.bf16 %v5023_v59, %v5022_v57 }
0x2467   :  { %6550 = vmatmul.mubr.msk.bf16.vlgmr.msra.gmra.mxu0 %vm164_vm2, %v5025_v17 }
0x2527   :  { %v6551_v0 = vpop.f32.mrf.mxu0 }
0x2528   :  { %v5100_v30 = vadd.f32 %v6551_v0, %v5735_v56 }
0x2529   :  { %v5091_v1 = vpop.f32.mrf.mxu0 }
0x252a   :  { %v5092_v15 = vadd.f32 %v5735_v56, %v5091_v1  ;;  %v5112_v10 = vmul.f32 0.70710677, %v5100_v30  ;;  %v5108_v31 = vmul.f32 0.5, %v5100_v30 }
0x252b   :  { %v6552_v2 = vpop.f32.mrf.mxu0 }
0x252c   :  { %v5110_v36 = vmul.f32 0.70710677, %v5092_v15  ;;  %v5103_v3 = vadd.f32 %v6552_v2, %v5735_v56  ;;  %v5106_v52 = vmul.f32 0.5, %v5092_v15 }
0x252d   :  { %v5094_v4 = vpop.f32.mrf.mxu0 }
0x252e   :  { %6824 = verf.f32 %v5110_v36  ;;  %v5113_v28 = vmul.f32 0.70710677, %v5103_v3  ;;  %v5095_v24 = vadd.f32 %v5735_v56, %v5094_v4  ;;  %v5109_v21 = vmul.f32 0.5, %v5103_v3 }
0x252f   :  { %6826 = verf.f32 %v5112_v10 }
0x2530   :  { %6828 = verf.f32 %v5113_v28  ;;  %v5111_v44 = vmul.f32 0.70710677, %v5095_v24  ;;  %v5107_v27 = vmul.f32 0.5, %v5095_v24 }
0x2532   :  { %6830 = verf.f32 %v5111_v44 }
0x253b   :  { %v6825_v8 = vpop.eup %6824 }
0x253c   :  { %v6827_v11 = vpop.eup %6826  ;;  %v5118_v14 = vadd.f32 1.0, %v6825_v8 }
0x253d   :  { %v6829_v12 = vpop.eup %6828  ;;  %v5120_v20 = vadd.f32 1.0, %v6827_v11 }
0x253e   :  { %v5121_v47 = vadd.f32 1.0, %v6829_v12  ;;  %v5122_v34 = vmul.f32 %v5118_v14, %v5106_v52 }
0x253f   :  { %v6831_v19 = vpop.eup %6830  ;;  %v5124_v41 = vmul.f32 %v5120_v20, %v5108_v31  ;;  %v5767_v20 = vld [vmem:[%s8004_s21] ss:$0 sm:$0xff] }
0x2540   :  { %v5119_v29 = vadd.f32 1.0, %v6831_v19  ;;  %v5125_v32 = vmul.f32 %v5121_v47, %v5109_v21  ;;  %v5766_v47 = vld [vmem:[%s8003_s20] ss:$0 sm:$0xff]  ;;  %s6866_s20 = smov [#allocation2]  }
0x2541   :  { %s5341_s16 = sshll.u32 %s6866_s20, 4  ;;  %s5342_s16 = int_to_ptr.vmem [resolvable:$true] %s5341_s16 }
0x2542   :  { %v5123_v9 = vmul.f32 %v5119_v29, %v5107_v27  ;;  %v5127_v43 = vpack.c.bf16 %v5125_v32, %v5124_v41  ;;  %s6844_s21 = scalar_lea.vmem %s5342_s16, 512  ;;  %p6849_p1 = scmp.lt.s32.totalorder %s5342_s16, %s5342_s16 }
0x2543   :  { %p6845_p0 = scmp.ne.s32.totalorder %s5342_s16, %s6844_s21  ;;  %p6850_p2 = scmp.lt.s32.totalorder %s6844_s21, %s6844_s21 }
0x2544   :  { %v5126_v42 = vpack.c.bf16 %v5123_v9, %v5122_v34 }
0x2545   :  { %p6851_p3 = por %p6850_p2, %p6849_p1 }
0x2546   :  { %6569 = vmatprep.mubr.bf16.mxu1 %v5126_v42 }
0x2547   :  { %6570 = vmatmul.mubr.bf16.vlgmr.msra.gmra.mxu1 %v5127_v43  ;;  %p6852_p4 = pnand %p6851_p3, %p6845_p0 }
0x2607   :  { %v6571_v55 = vpop.f32.mrf.mxu1 }
0x2608   :  { %v5244_v5 = vadd.f32 %v6571_v55, %v7890_v37 }
0x2609   :  { %v5227_v45 = vpop.f32.mrf.mxu1 }
0x260a   :  { %v5242_v61 = vadd.f32 %v5227_v45, %v7887_v62  ;;  %v5256_v23 = vadd.f32 %v5765_v38, %v5244_v5 }
0x260b   :  { %v6572_v22 = vpop.f32.mrf.mxu1 }
0x260c   :  { %v5254_v46 = vadd.f32 %v5765_v38, %v5242_v61  ;;  %v5245_v51 = vadd.f32 %v6572_v22, %v7898_v7  ;;  %v5266_v37 = vsel %vm164_vm2, %v5256_v23, 0.0 }
0x260d   :  { %v5230_v16 = vpop.f32.mrf.mxu1 }
0x260e   :  { %v5243_v49 = vadd.f32 %v5230_v16, %v7896_v60  ;;  %v5260_v25 = vsel %vm164_vm2, %v5254_v46, 0.0  ;;  %v5257_v26 = vadd.f32 %v5765_v38, %v5245_v51 }
0x260f   :  { %5261 = vadd.xlane.f32.xlu0 %v5260_v25 }
0x2610   :  { %v5255_v18 = vadd.f32 %v5765_v38, %v5243_v49  ;;  %v5269_v53 = vsel %vm164_vm2, %v5257_v26, 0.0 }
0x2612   :  { %v5263_v62 = vsel %vm164_vm2, %v5255_v18, 0.0 }
0x2613   :  { %5267 = vadd.xlane.f32.xlu0 %v5266_v37  ;;  %5264 = vadd.xlane.f32.xlu1 %v5263_v62 }
0x2617   :  { %5270 = vadd.xlane.f32.xlu1 %v5269_v53 }
0x2698   :  { %v5262_v39 = vpop.xlane.xlu0 %5261 }
0x2699   :  { %v5272_v48 = vmul.f32 0.03125, %v5262_v39 }
0x269b   :  { %v5276_v54 = vsub.f32 %v5254_v46, %v5272_v48 }
0x269c   :  { %v5268_v7 = vpop.xlane.xlu0 %5267  ;;  %v5265_v57 = vpop.xlane.xlu1 %5264 }
0x269d   :  { %v5274_v60 = vmul.f32 0.03125, %v5268_v7  ;;  %v5273_v59 = vmul.f32 0.03125, %v5265_v57  ;;  %v5280_v17 = vmul.f32 %v5276_v54, %v5276_v54 }
0x269f   :  { %v5278_v50 = vsub.f32 %v5256_v23, %v5274_v60  ;;  %v5277_v63 = vsub.f32 %v5255_v18, %v5273_v59  ;;  %v5284_v58 = vsel %vm164_vm2, %v5280_v17, 0.0 }
0x26a0   :  { %5285 = vadd.xlane.f32.xlu0 %v5284_v58  ;;  %v5271_v40 = vpop.xlane.xlu1 %5270 }
0x26a1   :  { %v5275_v13 = vmul.f32 0.03125, %v5271_v40  ;;  %v5282_v6 = vmul.f32 %v5278_v50, %v5278_v50  ;;  %v5281_v33 = vmul.f32 %v5277_v63, %v5277_v63 }
0x26a3   :  { %v5279_v35 = vsub.f32 %v5257_v26, %v5275_v13  ;;  %v5290_v56 = vsel %vm164_vm2, %v5282_v6, 0.0  ;;  %v5287_v0 = vsel %vm164_vm2, %v5281_v33, 0.0 }
0x26a4   :  { %5291 = vadd.xlane.f32.xlu0 %v5290_v56  ;;  %5288 = vadd.xlane.f32.xlu1 %v5287_v0 }
0x26a5   :  { %v5283_v30 = vmul.f32 %v5279_v35, %v5279_v35 }
0x26a7   :  { %v5293_v1 = vsel %vm164_vm2, %v5283_v30, 0.0 }
0x26a8   :  { %5294 = vadd.xlane.f32.xlu1 %v5293_v1 }
0x2729   :  { %v5286_v15 = vpop.xlane.xlu0 %5285 }
0x272a   :  { %v5296_v10 = vmul.f32 0.03125, %v5286_v15 }
0x272c   :  { %v5300_v2 = vadd.f32 1e-05, %v5296_v10 }
0x272d   :  { %v5292_v36 = vpop.xlane.xlu0 %5291  ;;  %v5289_v3 = vpop.xlane.xlu1 %5288 }
0x272e   :  { %6832 = vrsqrt.f32 %v5300_v2  ;;  %v5298_v4 = vmul.f32 0.03125, %v5292_v36  ;;  %v5297_v28 = vmul.f32 0.03125, %v5289_v3 }
0x2730   :  { %v5302_v24 = vadd.f32 1e-05, %v5298_v4  ;;  %v5301_v44 = vadd.f32 1e-05, %v5297_v28 }
0x2731   :  { %v5295_v8 = vpop.xlane.xlu1 %5294 }
0x2732   :  { %6834 = vrsqrt.f32 %v5302_v24  ;;  %v5299_v11 = vmul.f32 0.03125, %v5295_v8 }
0x2733   :  { %6836 = vrsqrt.f32 %v5301_v44 }
0x2734   :  { %v5303_v12 = vadd.f32 1e-05, %v5299_v11 }
0x2736   :  { %6838 = vrsqrt.f32 %v5303_v12 }
0x273b   :  { %v6833_v14 = vpop.eup %6832 }
0x273c   :  { %v5308_v19 = vmul.f32 %v6833_v14, %v5276_v54 }
0x273e   :  { %v5318_v21 = vmul.f32 %v5766_v47, %v5308_v19 }
0x273f   :  { %v6835_v52 = vpop.eup %6834 }
0x2740   :  { %v6837_v27 = vpop.eup %6836  ;;  %v5310_v29 = vmul.f32 %v6835_v52, %v5278_v50  ;;  %v5328_v31 = vadd.f32 %v5767_v20, %v5318_v21 }
0x2741   :  { %v5309_v32 = vmul.f32 %v6837_v27, %v5277_v63 }
0x2742   :  { %v5320_v34 = vmul.f32 %v5766_v47, %v5310_v29  ;;  %5332 = vst.msk [vmem:[#allocation2] sm:$0xff] %vm164_vm2, %v5328_v31 }
0x2743   :  { %v6839_v9 = vpop.eup %6838  ;;  %v5319_v41 = vmul.f32 %v5766_v47, %v5309_v32 }
0x2744   :  { %v5311_v42 = vmul.f32 %v6839_v9, %v5279_v35  ;;  %v5330_v43 = vadd.f32 %v5767_v20, %v5320_v34 }
0x2745   :  { %v5329_v55 = vadd.f32 %v5767_v20, %v5319_v41 }
0x2746   :  { %v5321_v45 = vmul.f32 %v5766_v47, %v5311_v42  ;;  %5334 = vst.msk [vmem:[#allocation2 + $0x10] sm:$0xff] %vm164_vm2, %v5330_v43 }
0x2747   :  { %5333 = vst.msk [vmem:[#allocation2 + $0x8] sm:$0xff] %vm164_vm2, %v5329_v55 }
0x2748   :  { %v5331_v5 = vadd.f32 %v5767_v20, %v5321_v45 }
0x274a   :  { %5335 = vst.msk [vmem:[#allocation2 + $0x18] sm:$0xff] %vm164_vm2, %v5331_v5 }
0x274b   :  { %6855 = shalt.err (!%p6852_p4)
}
0x274c   :  { %s6867_s23 = smov 128   ;;  %s6868_s25 = smov 8  }
0x274d   :  { %5347 = dma.vmem_to_hbm [thread:$0]  %s5342_s16, 512, %s8005_s22, [#allocation3], %s6867_s23, %s6867_s23, %s6868_s25  }
0x274e   :  { %6864 = dma.done.wait [#allocation3], 512  }
0x274f   :  { %6865 = vsyncadd [#allocation3], 4294966784 }
0x2750   :  { %5351 = vsyncpa [#allocation3], 1 }

</bundles_post_ra>
